<compile_context>
chip_gen: v5e
topology: v5e:2x2
jax: 0.10.0
libtpu: 0.0.40
codegen_flags: <defaults>
</compile_context>

<pallas_src>
import functools
import numpy as np

import jax
import jax.numpy as jnp
from jax import lax
from jax.experimental import pallas as pl
from jax.experimental.pallas import tpu as pltpu


# ----------------------------------------------------------------------------
# Pallas kernel: full forward pass for a tile of Bt batch elements.
# ----------------------------------------------------------------------------
def _encoder_kernel(x_ref, w1_ref, b1_ref, w2_ref, b2_ref,
                    win_ref, bin_ref, wout_ref, bout_ref,
                    wih_ref, whh_ref, blstm_ref,
                    wf1_ref, bf1_ref, wf2_ref, bf2_ref,
                    out_ref, *, num_heads):
    f32 = jnp.float32
    cdt = win_ref.dtype                       # MXU operand dtype (f32 or bf16)

    x3 = x_ref[...]                           # (Bt, L, D)
    Bt, L, D = x3.shape
    R = Bt * L
    H = w2_ref.shape[1]
    Hd = H // num_heads
    x2 = x3.reshape(R, D).astype(f32)         # rows r = b*L + t, channels on lanes

    # Time masks shared by both convs (hoisted: JAX does not CSE broadcasts).
    t_idx = lax.broadcasted_iota(jnp.int32, (R, 1), 0) % L
    m_prev = t_idx >= 1                       # row has a valid t-1 neighbour
    m_next = t_idx <= L - 2                   # row has a valid t+1 neighbour

    def conv1d_relu(inp, w_ref, b_ref):
        # Conv1d(k=3, pad=1) as ONE matmul: [x_{t-1} | x_t | x_{t+1}] @ W_cat.
        # Rolls wrap across batch boundaries; the masks zero those rows.
        xp = jnp.where(m_prev, pltpu.roll(inp, shift=1, axis=0), 0.0)
        xn = jnp.where(m_next, pltpu.roll(inp, shift=R - 1, axis=0), 0.0)
        xcat = jnp.concatenate([xp, inp, xn], axis=-1)          # (R, 3*Cin)
        y = jnp.dot(xcat.astype(w_ref.dtype), w_ref[...],
                    preferred_element_type=f32) + b_ref[...]
        return jnp.maximum(y, 0.0)

    h1 = conv1d_relu(x2, w1_ref, b1_ref)      # (R, H//2)
    h2 = conv1d_relu(h1, w2_ref, b2_ref)      # (R, H)

    # ---- multi-head self-attention (batch_first, q=k=v=h2) -----------------
    scale = 1.0 / float(np.sqrt(Hd))
    qkv = (jnp.dot(h2.astype(cdt), win_ref[...], preferred_element_type=f32)
           + bin_ref[...])                                       # (R, 3H)
    qkv3 = qkv.reshape(Bt, L, 3 * H)
    # Fold heads into the leading batch axis -> two single-batch-dim einsums
    # plus ONE (R,H)@(H,H) out-projection (instead of num_heads tiny matmuls).
    q_h = jnp.concatenate(
        [qkv3[:, :, hh * Hd:(hh + 1) * Hd] for hh in range(num_heads)],
        axis=0) * scale                                          # (nh*Bt, L, Hd)
    k_h = jnp.concatenate(
        [qkv3[:, :, H + hh * Hd:H + (hh + 1) * Hd] for hh in range(num_heads)],
        axis=0)
    v_h = jnp.concatenate(
        [qkv3[:, :, 2 * H + hh * Hd:2 * H + (hh + 1) * Hd]
         for hh in range(num_heads)], axis=0)
    s = jnp.einsum('bqd,bkd->bqk', q_h.astype(cdt), k_h.astype(cdt),
                   preferred_element_type=f32)                   # (nh*Bt, L, L)
    s = s - jnp.max(s, axis=-1, keepdims=True)
    p = jnp.exp(s)
    p = p * pl.reciprocal(jnp.sum(p, axis=-1, keepdims=True), approx=True)
    o = jnp.einsum('bqk,bkd->bqd', p.astype(cdt), v_h.astype(cdt),
                   preferred_element_type=f32)                   # (nh*Bt, L, Hd)
    o_cat = jnp.concatenate(
        [o[hh * Bt:(hh + 1) * Bt] for hh in range(num_heads)], axis=-1)
    attn = (jnp.dot(o_cat.reshape(R, H).astype(cdt), wout_ref[...],
                    preferred_element_type=f32) + bout_ref[...])  # (R, H)

    # ---- single-layer LSTM (batch_first, h0=c0=0), gate order i,f,g,o ------
    # Input-to-hidden matmul hoisted out of the recurrence as one big matmul;
    # only the small (Bt,H)@(H,4H) f32 dot stays on the serial critical path.
    gx = (jnp.dot(attn.astype(wih_ref.dtype), wih_ref[...],
                  preferred_element_type=f32) + blstm_ref[...])   # (R, 4H)
    gx3 = gx.reshape(Bt, L, 4 * H)
    whh = whh_ref[...]                                            # (H, 4H) f32
    h_t = jnp.zeros((Bt, H), f32)
    c_t = jnp.zeros((Bt, H), f32)
    hs = []
    # TODO(synk): for large L switch to lax.fori_loop with gx / h states staged
    # in VMEM scratch to bound vreg live ranges; static unroll is fine at L=8.
    for t in range(L):
        g = gx3[:, t, :] + jnp.dot(h_t, whh, preferred_element_type=f32)
        i_g = jax.nn.sigmoid(g[:, 0 * H:1 * H])
        f_g = jax.nn.sigmoid(g[:, 1 * H:2 * H])
        c_g = jnp.tanh(g[:, 2 * H:3 * H])
        o_g = jax.nn.sigmoid(g[:, 3 * H:4 * H])
        c_t = f_g * c_t + i_g * c_g
        h_t = o_g * jnp.tanh(c_t)
        hs.append(h_t)
    # de-fused fc1: flatten(L, H) row-major == lane-concat of per-step states.
    h_flat = jnp.concatenate(hs, axis=-1)                         # (Bt, L*H)

    # ---- compress: Linear(L*H->2H) + ReLU + Dropout(eval) + Linear(2H->H) --
    z1 = (jnp.dot(h_flat.astype(wf1_ref.dtype), wf1_ref[...],
                  preferred_element_type=f32) + bf1_ref[...])
    z1 = jnp.maximum(z1, 0.0)
    # TODO(synk): Dropout(p=0.1) implemented with eval semantics (identity).
    z = (jnp.dot(z1.astype(wf2_ref.dtype), wf2_ref[...],
                 preferred_element_type=f32) + bf2_ref[...])
    out_ref[...] = z.astype(out_ref.dtype)                        # (Bt, H)


# ----------------------------------------------------------------------------
# Wrapper: parameter re-layout, tile sizing and pallas_call.
# ----------------------------------------------------------------------------
def multivariate_ts_encoder(x, p, *, hidden_dim, num_heads, batch_tile=None,
                            compute_dtype=jnp.float32):
    B, L, D = x.shape
    H = hidden_dim
    f32, cdt = jnp.float32, compute_dtype

    # ---- parameter re-layout (PyTorch-native shapes -> kernel layouts) -----
    # conv (Cout, Cin, 3) -> fused-tap (3*Cin, Cout), tap order [prev|center|next]
    w1c = jnp.transpose(p['conv1_w'], (2, 1, 0)).reshape(3 * D, H // 2).astype(cdt)
    b1 = p['conv1_b'].reshape(1, -1).astype(f32)
    w2c = jnp.transpose(p['conv2_w'], (2, 1, 0)).reshape(3 * (H // 2), H).astype(cdt)
    b2 = p['conv2_b'].reshape(1, -1).astype(f32)
    win_t = p['attn_in_w'].T.astype(cdt)                  # (H, 3H)
    bin_ = p['attn_in_b'].reshape(1, -1).astype(f32)
    wout_t = p['attn_out_w'].T.astype(cdt)                 # (H, H)
    bout = p['attn_out_b'].reshape(1, -1).astype(f32)
    wih_t = p['lstm_w_ih'].T.astype(cdt)                   # (H, 4H)
    whh_t = p['lstm_w_hh'].T.astype(f32)                   # recurrence stays f32
    blstm = (p['lstm_b_ih'] + p['lstm_b_hh']).reshape(1, -1).astype(f32)
    wf1_t = p['fc1_w'].T.astype(cdt)                       # (L*H, 2H)
    bf1 = p['fc1_b'].reshape(1, -1).astype(f32)
    wf2_t = p['fc2_w'].T.astype(cdt)                       # (2H, H)
    bf2 = p['fc2_b'].reshape(1, -1).astype(f32)
    weights = (w1c, b1, w2c, b2, win_t, bin_, wout_t, bout,
               wih_t, whh_t, blstm, wf1_t, bf1, wf2_t, bf2)

    # ---- per-generation VMEM budget (v7x 64 MiB -> ~48; v5e/v6e -> ~96) ----
    try:
        vmem_phys = int(pltpu.get_tpu_info().vmem_capacity_bytes)
    except Exception:
        vmem_phys = 64 * 1024 * 1024                       # conservative default
    vmem_limit = int(min(vmem_phys * 3 // 4, 100 * 1024 * 1024))

    # ---- batch tile: target R = bt*L >= 256 MXU rows, bounded by VMEM ------
    weight_bytes = sum(int(np.prod(w.shape)) * w.dtype.itemsize for w in weights)
    # rough f32 working set per batch element (activations + scores), x3 headroom
    row_bytes = 3 * 4 * (L * (D + 14 * H) + num_heads * L * L + 2 * H)
    avail = max(vmem_limit - 2 * weight_bytes, vmem_limit // 4)
    bt_vmem = max(1, avail // row_bytes)
    if batch_tile is not None:
        bt = int(batch_tile)
    else:
        bt = min(B, max(1, 256 // L), bt_vmem)
        if bt < B:
            bt = min(max(8, (bt // 8) * 8), B)   # sublane-aligned output tile
    # pad B to a multiple of bt (instead of degrading bt for awkward/prime B)
    Bp = ((B + bt - 1) // bt) * bt
    xp = jnp.pad(x, ((0, Bp - B), (0, 0), (0, 0))) if Bp != B else x
    grid = (Bp // bt,)

    def _specs(single_buffer_weights):
        def wspec(a):
            if single_buffer_weights:
                # grid-invariant blocks are never re-fetched -> one buffer
                return pl.BlockSpec(a.shape, lambda b: (0, 0),
                                    pipeline_mode=pl.Buffered(1))
            return pl.BlockSpec(a.shape, lambda b: (0, 0))
        return ([pl.BlockSpec((bt, L, D), lambda b: (b, 0, 0))]
                + [wspec(w) for w in weights])

    kernel = functools.partial(_encoder_kernel, num_heads=num_heads)

    def _run(single_buffer_weights):
        out = pl.pallas_call(
            kernel,
            out_shape=jax.ShapeDtypeStruct((Bp, H), jnp.float32),
            grid=grid,
            in_specs=_specs(single_buffer_weights),
            out_specs=pl.BlockSpec((bt, H), lambda b: (b, 0)),
            compiler_params=pltpu.CompilerParams(
                dimension_semantics=("parallel",),
                vmem_limit_bytes=vmem_limit),
        )(xp, *weights)
        return jax.block_until_ready(out)

    try:
        out = _run(True)
    except Exception:
        # pl.Buffered(1) unsupported on this jax/libtpu -> default buffering
        out = _run(False)
    return out[:B]                                          # (B, H)


# ----------------------------------------------------------------------------
# Deterministic synthetic parameters (PyTorch-native shapes).
# ----------------------------------------------------------------------------
def init_params(key, input_dim, hidden_dim, seq_len):
    H, H2 = hidden_dim, hidden_dim // 2
    ks = jax.random.split(key, 16)

    def w(k, shape, scale):
        return jax.random.normal(k, shape, jnp.float32) * scale

    return {
        'conv1_w': w(ks[0], (H2, input_dim, 3), 0.3),
        'conv1_b': w(ks[1], (H2,), 0.1),
        'conv2_w': w(ks[2], (H, H2, 3), 0.15),
        'conv2_b': w(ks[3], (H,), 0.1),
        'attn_in_w': w(ks[4], (3 * H, H), 0.15),
        'attn_in_b': w(ks[5], (3 * H,), 0.05),
        'attn_out_w': w(ks[6], (H, H), 0.15),
        'attn_out_b': w(ks[7], (H,), 0.05),
        'lstm_w_ih': w(ks[8], (4 * H, H), 0.15),
        'lstm_w_hh': w(ks[9], (4 * H, H), 0.15),
        'lstm_b_ih': w(ks[10], (4 * H,), 0.05),
        'lstm_b_hh': w(ks[11], (4 * H,), 0.05),
        'fc1_w': w(ks[12], (2 * H, seq_len * H), 0.08),
        'fc1_b': w(ks[13], (2 * H,), 0.05),
        'fc2_w': w(ks[14], (H, 2 * H), 0.1),
        'fc2_b': w(ks[15], (H,), 0.05),
    }


# ----------------------------------------------------------------------------
# Pure-JAX reference (mirrors the PyTorch forward exactly) for validation.
# ----------------------------------------------------------------------------
def reference_forward(x, p, *, num_heads):
    def conv1d(inp, w, b):
        Bc, Lc, _ = inp.shape
        xpad = jnp.pad(inp, ((0, 0), (1, 1), (0, 0)))
        out = jnp.zeros((Bc, Lc, w.shape[0]), jnp.float32)
        for kk in range(3):
            out = out + jnp.einsum('blc,oc->blo', xpad[:, kk:kk + Lc, :],
                                   w[:, :, kk])
        return out + b

    h = jax.nn.relu(conv1d(x, p['conv1_w'], p['conv1_b']))
    h = jax.nn.relu(conv1d(h, p['conv2_w'], p['conv2_b']))
    Bx, Lx, H = h.shape
    hd = H // num_heads

    qkv = h @ p['attn_in_w'].T + p['attn_in_b']
    q, k, v = qkv[..., :H], qkv[..., H:2 * H], qkv[..., 2 * H:]

    def split(t):
        return t.reshape(Bx, Lx, num_heads, hd).transpose(0, 2, 1, 3)

    qh, kh, vh = split(q), split(k), split(v)
    s = jnp.einsum('bhqd,bhkd->bhqk', qh, kh) / jnp.sqrt(float(hd))
    pw = jax.nn.softmax(s, axis=-1)
    o = jnp.einsum('bhqk,bhkd->bhqd', pw, vh)
    o = o.transpose(0, 2, 1, 3).reshape(Bx, Lx, H)
    attn = o @ p['attn_out_w'].T + p['attn_out_b']

    ht = jnp.zeros((Bx, H), jnp.float32)
    ct = jnp.zeros((Bx, H), jnp.float32)
    outs = []
    for t in range(Lx):
        g = (attn[:, t] @ p['lstm_w_ih'].T + ht @ p['lstm_w_hh'].T
             + p['lstm_b_ih'] + p['lstm_b_hh'])
        i_g = jax.nn.sigmoid(g[:, :H])
        f_g = jax.nn.sigmoid(g[:, H:2 * H])
        c_g = jnp.tanh(g[:, 2 * H:3 * H])
        o_g = jax.nn.sigmoid(g[:, 3 * H:])
        ct = f_g * ct + i_g * c_g
        ht = o_g * jnp.tanh(ct)
        outs.append(ht)
    rnn = jnp.stack(outs, axis=1)

    flat = rnn.reshape(Bx, -1)
    z1 = jax.nn.relu(flat @ p['fc1_w'].T + p['fc1_b'])
    return z1 @ p['fc2_w'].T + p['fc2_b']


if __name__ == "__main__":
    B, L, D, H = 2, 8, 4, 32          # batch, seq_len, input_dim, hidden_dim
    num_heads = max(1, H // 16)

    key = jax.random.PRNGKey(0)
    kx, kp = jax.random.split(key)
    x = jax.random.normal(kx, (B, L, D), jnp.float32)
    params = init_params(kp, D, H, L)

    z_ref = reference_forward(x, params, num_heads=num_heads)

    # f32-operand path: strict parity with the PyTorch forward.
    z = multivariate_ts_encoder(x, params, hidden_dim=H, num_heads=num_heads)
    z = jax.block_until_ready(z)
    assert z.shape == (B, H)
    np.testing.assert_allclose(np.asarray(z), np.asarray(z_ref),
                               atol=5e-3, rtol=5e-3)

    # bf16 MXU-operand fast path (f32 accumulation, f32 recurrence/gate math);
    # sanity-checked with a relative-norm bound (typical error is ~1-3%).
    z_bf = multivariate_ts_encoder(x, params, hidden_dim=H,
                                   num_heads=num_heads,
                                   compute_dtype=jnp.bfloat16)
    z_bf = np.asarray(jax.block_until_ready(z_bf))
    rel = float(np.linalg.norm(z_bf - np.asarray(z_ref))
                / max(float(np.linalg.norm(np.asarray(z_ref))), 1e-6))
    assert np.isfinite(z_bf).all() and rel < 0.1, rel

    print("KERNEL_OK")
</pallas_src>

<mosaic_0001>
module attributes {stable_mosaic.version = 11 : i64} {
  func.func @_encoder_kernel(%arg0: i32, %arg1: memref<2x8x4xf32, #tpu.memory_space<vmem>>, %arg2: memref<12x16xf32, #tpu.memory_space<vmem>>, %arg3: memref<1x16xf32, #tpu.memory_space<vmem>>, %arg4: memref<48x32xf32, #tpu.memory_space<vmem>>, %arg5: memref<1x32xf32, #tpu.memory_space<vmem>>, %arg6: memref<32x96xf32, #tpu.memory_space<vmem>>, %arg7: memref<1x96xf32, #tpu.memory_space<vmem>>, %arg8: memref<32x32xf32, #tpu.memory_space<vmem>>, %arg9: memref<1x32xf32, #tpu.memory_space<vmem>>, %arg10: memref<32x128xf32, #tpu.memory_space<vmem>>, %arg11: memref<32x128xf32, #tpu.memory_space<vmem>>, %arg12: memref<1x128xf32, #tpu.memory_space<vmem>>, %arg13: memref<256x64xf32, #tpu.memory_space<vmem>>, %arg14: memref<1x64xf32, #tpu.memory_space<vmem>>, %arg15: memref<64x32xf32, #tpu.memory_space<vmem>>, %arg16: memref<1x32xf32, #tpu.memory_space<vmem>>, %arg17: memref<2x32xf32, #tpu.memory_space<vmem>>) attributes {dimension_semantics = [#tpu.dimension_semantics<parallel>], iteration_bounds = array<i64: 1>, scalar_prefetch = 0 : i64, scratch_operands = 0 : i64, tpu.core_type = #tpu.core_type<tc>, window_params = [{transform_indices = @transform_0, window_bounds = array<i64: 2, 8, 4>}, {pipeline_mode = #tpu.pipeline_mode<synchronous>, transform_indices = @transform_1, window_bounds = array<i64: 12, 16>}, {pipeline_mode = #tpu.pipeline_mode<synchronous>, transform_indices = @transform_2, window_bounds = array<i64: 1, 16>}, {pipeline_mode = #tpu.pipeline_mode<synchronous>, transform_indices = @transform_3, window_bounds = array<i64: 48, 32>}, {pipeline_mode = #tpu.pipeline_mode<synchronous>, transform_indices = @transform_4, window_bounds = array<i64: 1, 32>}, {pipeline_mode = #tpu.pipeline_mode<synchronous>, transform_indices = @transform_5, window_bounds = array<i64: 32, 96>}, {pipeline_mode = #tpu.pipeline_mode<synchronous>, transform_indices = @transform_6, window_bounds = array<i64: 1, 96>}, {pipeline_mode = #tpu.pipeline_mode<synchronous>, transform_indices = @transform_7, window_bounds = array<i64: 32, 32>}, {pipeline_mode = #tpu.pipeline_mode<synchronous>, transform_indices = @transform_8, window_bounds = array<i64: 1, 32>}, {pipeline_mode = #tpu.pipeline_mode<synchronous>, transform_indices = @transform_9, window_bounds = array<i64: 32, 128>}, {pipeline_mode = #tpu.pipeline_mode<synchronous>, transform_indices = @transform_10, window_bounds = array<i64: 32, 128>}, {pipeline_mode = #tpu.pipeline_mode<synchronous>, transform_indices = @transform_11, window_bounds = array<i64: 1, 128>}, {pipeline_mode = #tpu.pipeline_mode<synchronous>, transform_indices = @transform_12, window_bounds = array<i64: 256, 64>}, {pipeline_mode = #tpu.pipeline_mode<synchronous>, transform_indices = @transform_13, window_bounds = array<i64: 1, 64>}, {pipeline_mode = #tpu.pipeline_mode<synchronous>, transform_indices = @transform_14, window_bounds = array<i64: 64, 32>}, {pipeline_mode = #tpu.pipeline_mode<synchronous>, transform_indices = @transform_15, window_bounds = array<i64: 1, 32>}, {transform_indices = @transform_16, window_bounds = array<i64: 2, 32>}]} {
    %c0 = arith.constant 0 : index
    %c0_0 = arith.constant 0 : index
    %c0_1 = arith.constant 0 : index
    %0 = vector.load %arg1[%c0, %c0_0, %c0_1] : memref<2x8x4xf32, #tpu.memory_space<vmem>>, vector<2x8x4xf32>
    %1 = vector.shape_cast %0 : vector<2x8x4xf32> to vector<16x4xf32>
    %2 = tpu.iota {dimensions = array<i32: 0>} : vector<16x1xi32>
    %c8_i32 = arith.constant 8 : i32
    %c0_i32 = arith.constant 0 : i32
    %3 = arith.cmpi eq, %c8_i32, %c0_i32 : i32
    %c1_i32 = arith.constant 1 : i32
    %4 = arith.select %3, %c1_i32, %c8_i32 : i32
    %5 = vector.broadcast %4 : i32 to vector<16x1xi32>
    %6 = arith.remsi %2, %5 : vector<16x1xi32>
    %c0_i32_2 = arith.constant 0 : i32
    %7 = vector.broadcast %c0_i32_2 : i32 to vector<16x1xi32>
    %8 = arith.cmpi ne, %6, %7 : vector<16x1xi32>
    %c0_i32_3 = arith.constant 0 : i32
    %9 = vector.broadcast %c0_i32_3 : i32 to vector<16x1xi32>
    %10 = arith.cmpi slt, %6, %9 : vector<16x1xi32>
    %c0_i32_4 = arith.constant 0 : i32
    %11 = arith.cmpi slt, %4, %c0_i32_4 : i32
    %12 = vector.broadcast %11 : i1 to vector<16x1xi1>
    %13 = vector.broadcast %12 : vector<16x1xi1> to vector<16x1xi1>
    %14 = arith.xori %10, %13 : vector<16x1xi1>
    %15 = arith.andi %14, %8 : vector<16x1xi1>
    %16 = vector.broadcast %4 : i32 to vector<16x1xi32>
    %17 = arith.addi %6, %16 : vector<16x1xi32>
    %18 = arith.select %15, %17, %6 : vector<16x1xi1>, vector<16x1xi32>
    %c1_i32_5 = arith.constant 1 : i32
    %19 = vector.broadcast %c1_i32_5 : i32 to vector<16x1xi32>
    %20 = arith.cmpi sge, %18, %19 : vector<16x1xi32>
    %c6_i32 = arith.constant 6 : i32
    %21 = vector.broadcast %c6_i32 : i32 to vector<16x1xi32>
    %22 = arith.cmpi sle, %18, %21 : vector<16x1xi32>
    %c1_i32_6 = arith.constant 1 : i32
    %23 = tpu.dynamic_rotate %1 by %c1_i32_6 dim 0 : vector<16x4xf32>, i32 -> vector<16x4xf32>
    %cst = arith.constant 0.000000e+00 : f32
    %24 = vector.shape_cast %20 : vector<16x1xi1> to vector<16x1xi1>
    %25 = vector.broadcast %24 : vector<16x1xi1> to vector<16x4xi1>
    %26 = vector.broadcast %cst : f32 to vector<16x4xf32>
    %27 = arith.select %25, %23, %26 : vector<16x4xi1>, vector<16x4xf32>
    %c15_i32 = arith.constant 15 : i32
    %28 = tpu.dynamic_rotate %1 by %c15_i32 dim 0 : vector<16x4xf32>, i32 -> vector<16x4xf32>
    %cst_7 = arith.constant 0.000000e+00 : f32
    %29 = vector.shape_cast %22 : vector<16x1xi1> to vector<16x1xi1>
    %30 = vector.broadcast %29 : vector<16x1xi1> to vector<16x4xi1>
    %31 = vector.broadcast %cst_7 : f32 to vector<16x4xf32>
    %32 = arith.select %30, %28, %31 : vector<16x4xi1>, vector<16x4xf32>
    %33 = tpu.concatenate %27, %1, %32 in 1 : vector<16x4xf32>, vector<16x4xf32>, vector<16x4xf32> -> vector<16x12xf32>
    %c0_8 = arith.constant 0 : index
    %c0_9 = arith.constant 0 : index
    %34 = vector.load %arg2[%c0_8, %c0_9] : memref<12x16xf32, #tpu.memory_space<vmem>>, vector<12x16xf32>
    %cst_10 = arith.constant dense<0.000000e+00> : vector<16x16xf32>
    %35 = tpu.matmul %33, %34, %cst_10 {dimension_numbers = #tpu.dot_dimension_numbers<[1], [0], [0], [1], [0, 0, 1, 1], [], []>} : vector<16x12xf32>, vector<12x16xf32>, vector<16x16xf32> -> vector<16x16xf32>
    %c0_11 = arith.constant 0 : index
    %c0_12 = arith.constant 0 : index
    %36 = vector.load %arg3[%c0_11, %c0_12] : memref<1x16xf32, #tpu.memory_space<vmem>>, vector<1x16xf32>
    %37 = vector.broadcast %36 : vector<1x16xf32> to vector<16x16xf32>
    %38 = arith.addf %35, %37 : vector<16x16xf32>
    %cst_13 = arith.constant 0.000000e+00 : f32
    %39 = vector.broadcast %cst_13 : f32 to vector<16x16xf32>
    %40 = arith.maximumf %38, %39 : vector<16x16xf32>
    %c1_i32_14 = arith.constant 1 : i32
    %41 = tpu.dynamic_rotate %40 by %c1_i32_14 dim 0 : vector<16x16xf32>, i32 -> vector<16x16xf32>
    %cst_15 = arith.constant 0.000000e+00 : f32
    %42 = vector.shape_cast %20 : vector<16x1xi1> to vector<16x1xi1>
    %43 = vector.broadcast %42 : vector<16x1xi1> to vector<16x16xi1>
    %44 = vector.broadcast %cst_15 : f32 to vector<16x16xf32>
    %45 = arith.select %43, %41, %44 : vector<16x16xi1>, vector<16x16xf32>
    %c15_i32_16 = arith.constant 15 : i32
    %46 = tpu.dynamic_rotate %40 by %c15_i32_16 dim 0 : vector<16x16xf32>, i32 -> vector<16x16xf32>
    %cst_17 = arith.constant 0.000000e+00 : f32
    %47 = vector.shape_cast %22 : vector<16x1xi1> to vector<16x1xi1>
    %48 = vector.broadcast %47 : vector<16x1xi1> to vector<16x16xi1>
    %49 = vector.broadcast %cst_17 : f32 to vector<16x16xf32>
    %50 = arith.select %48, %46, %49 : vector<16x16xi1>, vector<16x16xf32>
    %51 = tpu.concatenate %45, %40, %50 in 1 : vector<16x16xf32>, vector<16x16xf32>, vector<16x16xf32> -> vector<16x48xf32>
    %c0_18 = arith.constant 0 : index
    %c0_19 = arith.constant 0 : index
    %52 = vector.load %arg4[%c0_18, %c0_19] : memref<48x32xf32, #tpu.memory_space<vmem>>, vector<48x32xf32>
    %cst_20 = arith.constant dense<0.000000e+00> : vector<16x32xf32>
    %53 = tpu.matmul %51, %52, %cst_20 {dimension_numbers = #tpu.dot_dimension_numbers<[1], [0], [0], [1], [0, 0, 1, 1], [], []>} : vector<16x48xf32>, vector<48x32xf32>, vector<16x32xf32> -> vector<16x32xf32>
    %c0_21 = arith.constant 0 : index
    %c0_22 = arith.constant 0 : index
    %54 = vector.load %arg5[%c0_21, %c0_22] : memref<1x32xf32, #tpu.memory_space<vmem>>, vector<1x32xf32>
    %55 = vector.broadcast %54 : vector<1x32xf32> to vector<16x32xf32>
    %56 = arith.addf %53, %55 : vector<16x32xf32>
    %cst_23 = arith.constant 0.000000e+00 : f32
    %57 = vector.broadcast %cst_23 : f32 to vector<16x32xf32>
    %58 = arith.maximumf %56, %57 : vector<16x32xf32>
    %c0_24 = arith.constant 0 : index
    %c0_25 = arith.constant 0 : index
    %59 = vector.load %arg6[%c0_24, %c0_25] : memref<32x96xf32, #tpu.memory_space<vmem>>, vector<32x96xf32>
    %cst_26 = arith.constant dense<0.000000e+00> : vector<16x96xf32>
    %60 = tpu.matmul %58, %59, %cst_26 {dimension_numbers = #tpu.dot_dimension_numbers<[1], [0], [0], [1], [0, 0, 1, 1], [], []>} : vector<16x32xf32>, vector<32x96xf32>, vector<16x96xf32> -> vector<16x96xf32>
    %c0_27 = arith.constant 0 : index
    %c0_28 = arith.constant 0 : index
    %61 = vector.load %arg7[%c0_27, %c0_28] : memref<1x96xf32, #tpu.memory_space<vmem>>, vector<1x96xf32>
    %62 = vector.broadcast %61 : vector<1x96xf32> to vector<16x96xf32>
    %63 = arith.addf %60, %62 : vector<16x96xf32>
    %64 = vector.shape_cast %63 : vector<16x96xf32> to vector<2x8x96xf32>
    %65 = vector.extract_strided_slice %64 {offsets = [0, 0, 0], sizes = [2, 8, 16], strides = [1, 1, 1]} : vector<2x8x96xf32> to vector<2x8x16xf32>
    %66 = vector.extract_strided_slice %64 {offsets = [0, 0, 16], sizes = [2, 8, 16], strides = [1, 1, 1]} : vector<2x8x96xf32> to vector<2x8x16xf32>
    %67 = tpu.concatenate %65, %66 in 0 : vector<2x8x16xf32>, vector<2x8x16xf32> -> vector<4x8x16xf32>
    %cst_29 = arith.constant 2.500000e-01 : f32
    %68 = vector.broadcast %cst_29 : f32 to vector<4x8x16xf32>
    %69 = arith.mulf %67, %68 : vector<4x8x16xf32>
    %70 = vector.extract_strided_slice %64 {offsets = [0, 0, 32], sizes = [2, 8, 16], strides = [1, 1, 1]} : vector<2x8x96xf32> to vector<2x8x16xf32>
    %71 = vector.extract_strided_slice %64 {offsets = [0, 0, 48], sizes = [2, 8, 16], strides = [1, 1, 1]} : vector<2x8x96xf32> to vector<2x8x16xf32>
    %72 = tpu.concatenate %70, %71 in 0 : vector<2x8x16xf32>, vector<2x8x16xf32> -> vector<4x8x16xf32>
    %73 = vector.extract_strided_slice %64 {offsets = [0, 0, 64], sizes = [2, 8, 16], strides = [1, 1, 1]} : vector<2x8x96xf32> to vector<2x8x16xf32>
    %74 = vector.extract_strided_slice %64 {offsets = [0, 0, 80], sizes = [2, 8, 16], strides = [1, 1, 1]} : vector<2x8x96xf32> to vector<2x8x16xf32>
    %75 = tpu.concatenate %73, %74 in 0 : vector<2x8x16xf32>, vector<2x8x16xf32> -> vector<4x8x16xf32>
    "tpu.trace_start"() <{level = 10 : i32, message = "bqd,bkd->bqk"}> : () -> ()
    %cst_30 = arith.constant dense<0.000000e+00> : vector<4x8x8xf32>
    %76 = tpu.matmul %69, %72, %cst_30 {dimension_numbers = #tpu.dot_dimension_numbers<[2], [2], [1], [1], [0, 0, 0, 1, 1, 1], [0], [0]>} : vector<4x8x16xf32>, vector<4x8x16xf32>, vector<4x8x8xf32> -> vector<4x8x8xf32>
    "tpu.trace_stop"() : () -> ()
    %cst_31 = arith.constant dense<0xFF800000> : vector<4x8xf32>
    %77 = vector.multi_reduction <maximumf>, %76, %cst_31 [2] : vector<4x8x8xf32> to vector<4x8xf32>
    %78 = vector.shape_cast %77 : vector<4x8xf32> to vector<4x8x1xf32>
    %79 = vector.broadcast %78 : vector<4x8x1xf32> to vector<4x8x8xf32>
    %80 = arith.subf %76, %79 : vector<4x8x8xf32>
    %81 = math.exp %80 : vector<4x8x8xf32>
    %cst_32 = arith.constant dense<0.000000e+00> : vector<4x8xf32>
    %82 = vector.multi_reduction <add>, %81, %cst_32 [2] : vector<4x8x8xf32> to vector<4x8xf32>
    %83 = vector.shape_cast %82 : vector<4x8xf32> to vector<4x8x1xf32>
    %84 = tpu.reciprocal %83 {approx = true} : vector<4x8x1xf32> -> vector<4x8x1xf32>
    %85 = vector.broadcast %84 : vector<4x8x1xf32> to vector<4x8x8xf32>
    %86 = arith.mulf %81, %85 : vector<4x8x8xf32>
    "tpu.trace_start"() <{level = 10 : i32, message = "bqk,bkd->bqd"}> : () -> ()
    %cst_33 = arith.constant dense<0.000000e+00> : vector<4x8x16xf32>
    %87 = tpu.matmul %86, %75, %cst_33 {dimension_numbers = #tpu.dot_dimension_numbers<[2], [1], [1], [2], [0, 0, 0, 1, 1, 2], [0], [0]>} : vector<4x8x8xf32>, vector<4x8x16xf32>, vector<4x8x16xf32> -> vector<4x8x16xf32>
    "tpu.trace_stop"() : () -> ()
    %88 = vector.extract_strided_slice %87 {offsets = [0, 0, 0], sizes = [2, 8, 16], strides = [1, 1, 1]} : vector<4x8x16xf32> to vector<2x8x16xf32>
    %89 = vector.extract_strided_slice %87 {offsets = [2, 0, 0], sizes = [2, 8, 16], strides = [1, 1, 1]} : vector<4x8x16xf32> to vector<2x8x16xf32>
    %90 = tpu.concatenate %88, %89 in 2 : vector<2x8x16xf32>, vector<2x8x16xf32> -> vector<2x8x32xf32>
    %91 = vector.shape_cast %90 : vector<2x8x32xf32> to vector<16x32xf32>
    %c0_34 = arith.constant 0 : index
    %c0_35 = arith.constant 0 : index
    %92 = vector.load %arg8[%c0_34, %c0_35] : memref<32x32xf32, #tpu.memory_space<vmem>>, vector<32x32xf32>
    %cst_36 = arith.constant dense<0.000000e+00> : vector<16x32xf32>
    %93 = tpu.matmul %91, %92, %cst_36 {dimension_numbers = #tpu.dot_dimension_numbers<[1], [0], [0], [1], [0, 0, 1, 1], [], []>} : vector<16x32xf32>, vector<32x32xf32>, vector<16x32xf32> -> vector<16x32xf32>
    %c0_37 = arith.constant 0 : index
    %c0_38 = arith.constant 0 : index
    %94 = vector.load %arg9[%c0_37, %c0_38] : memref<1x32xf32, #tpu.memory_space<vmem>>, vector<1x32xf32>
    %95 = vector.broadcast %94 : vector<1x32xf32> to vector<16x32xf32>
    %96 = arith.addf %93, %95 : vector<16x32xf32>
    %c0_39 = arith.constant 0 : index
    %c0_40 = arith.constant 0 : index
    %97 = vector.load %arg10[%c0_39, %c0_40] : memref<32x128xf32, #tpu.memory_space<vmem>>, vector<32x128xf32>
    %cst_41 = arith.constant dense<0.000000e+00> : vector<16x128xf32>
    %98 = tpu.matmul %96, %97, %cst_41 {dimension_numbers = #tpu.dot_dimension_numbers<[1], [0], [0], [1], [0, 0, 1, 1], [], []>} : vector<16x32xf32>, vector<32x128xf32>, vector<16x128xf32> -> vector<16x128xf32>
    %c0_42 = arith.constant 0 : index
    %c0_43 = arith.constant 0 : index
    %99 = vector.load %arg12[%c0_42, %c0_43] : memref<1x128xf32, #tpu.memory_space<vmem>>, vector<1x128xf32>
    %100 = vector.broadcast %99 : vector<1x128xf32> to vector<16x128xf32>
    %101 = arith.addf %98, %100 : vector<16x128xf32>
    %102 = vector.shape_cast %101 : vector<16x128xf32> to vector<2x8x128xf32>
    %c0_44 = arith.constant 0 : index
    %c0_45 = arith.constant 0 : index
    %103 = vector.load %arg11[%c0_44, %c0_45] : memref<32x128xf32, #tpu.memory_space<vmem>>, vector<32x128xf32>
    %cst_46 = arith.constant 0.000000e+00 : f32
    %104 = vector.broadcast %cst_46 : f32 to vector<2x32xf32>
    %cst_47 = arith.constant 0.000000e+00 : f32
    %105 = vector.broadcast %cst_47 : f32 to vector<2x32xf32>
    %106 = vector.extract_strided_slice %102 {offsets = [0, 0, 0], sizes = [2, 1, 128], strides = [1, 1, 1]} : vector<2x8x128xf32> to vector<2x1x128xf32>
    %107 = vector.shape_cast %106 : vector<2x1x128xf32> to vector<2x128xf32>
    %cst_48 = arith.constant dense<0.000000e+00> : vector<2x128xf32>
    %108 = tpu.matmul %104, %103, %cst_48 {dimension_numbers = #tpu.dot_dimension_numbers<[1], [0], [0], [1], [0, 0, 1, 1], [], []>} : vector<2x32xf32>, vector<32x128xf32>, vector<2x128xf32> -> vector<2x128xf32>
    %109 = arith.addf %107, %108 : vector<2x128xf32>
    %110 = vector.extract_strided_slice %109 {offsets = [0, 0], sizes = [2, 32], strides = [1, 1]} : vector<2x128xf32> to vector<2x32xf32>
    %111 = arith.negf %110 : vector<2x32xf32>
    %112 = math.exp %111 : vector<2x32xf32>
    %cst_49 = arith.constant 1.000000e+00 : f32
    %113 = vector.broadcast %cst_49 : f32 to vector<2x32xf32>
    %114 = arith.addf %113, %112 : vector<2x32xf32>
    %115 = arith.divf %113, %114 : vector<2x32xf32>
    %116 = vector.extract_strided_slice %109 {offsets = [0, 32], sizes = [2, 32], strides = [1, 1]} : vector<2x128xf32> to vector<2x32xf32>
    %117 = arith.negf %116 : vector<2x32xf32>
    %118 = math.exp %117 : vector<2x32xf32>
    %cst_50 = arith.constant 1.000000e+00 : f32
    %119 = vector.broadcast %cst_50 : f32 to vector<2x32xf32>
    %120 = arith.addf %119, %118 : vector<2x32xf32>
    %121 = arith.divf %119, %120 : vector<2x32xf32>
    %122 = vector.extract_strided_slice %109 {offsets = [0, 64], sizes = [2, 32], strides = [1, 1]} : vector<2x128xf32> to vector<2x32xf32>
    %123 = math.tanh %122 : vector<2x32xf32>
    %124 = vector.extract_strided_slice %109 {offsets = [0, 96], sizes = [2, 32], strides = [1, 1]} : vector<2x128xf32> to vector<2x32xf32>
    %125 = arith.negf %124 : vector<2x32xf32>
    %126 = math.exp %125 : vector<2x32xf32>
    %cst_51 = arith.constant 1.000000e+00 : f32
    %127 = vector.broadcast %cst_51 : f32 to vector<2x32xf32>
    %128 = arith.addf %127, %126 : vector<2x32xf32>
    %129 = arith.divf %127, %128 : vector<2x32xf32>
    %130 = arith.mulf %121, %105 : vector<2x32xf32>
    %131 = arith.mulf %115, %123 : vector<2x32xf32>
    %132 = arith.addf %130, %131 : vector<2x32xf32>
    %133 = math.tanh %132 : vector<2x32xf32>
    %134 = arith.mulf %129, %133 : vector<2x32xf32>
    %135 = vector.extract_strided_slice %102 {offsets = [0, 1, 0], sizes = [2, 1, 128], strides = [1, 1, 1]} : vector<2x8x128xf32> to vector<2x1x128xf32>
    %136 = vector.shape_cast %135 : vector<2x1x128xf32> to vector<2x128xf32>
    %cst_52 = arith.constant dense<0.000000e+00> : vector<2x128xf32>
    %137 = tpu.matmul %134, %103, %cst_52 {dimension_numbers = #tpu.dot_dimension_numbers<[1], [0], [0], [1], [0, 0, 1, 1], [], []>} : vector<2x32xf32>, vector<32x128xf32>, vector<2x128xf32> -> vector<2x128xf32>
    %138 = arith.addf %136, %137 : vector<2x128xf32>
    %139 = vector.extract_strided_slice %138 {offsets = [0, 0], sizes = [2, 32], strides = [1, 1]} : vector<2x128xf32> to vector<2x32xf32>
    %140 = arith.negf %139 : vector<2x32xf32>
    %141 = math.exp %140 : vector<2x32xf32>
    %cst_53 = arith.constant 1.000000e+00 : f32
    %142 = vector.broadcast %cst_53 : f32 to vector<2x32xf32>
    %143 = arith.addf %142, %141 : vector<2x32xf32>
    %144 = arith.divf %142, %143 : vector<2x32xf32>
    %145 = vector.extract_strided_slice %138 {offsets = [0, 32], sizes = [2, 32], strides = [1, 1]} : vector<2x128xf32> to vector<2x32xf32>
    %146 = arith.negf %145 : vector<2x32xf32>
    %147 = math.exp %146 : vector<2x32xf32>
    %cst_54 = arith.constant 1.000000e+00 : f32
    %148 = vector.broadcast %cst_54 : f32 to vector<2x32xf32>
    %149 = arith.addf %148, %147 : vector<2x32xf32>
    %150 = arith.divf %148, %149 : vector<2x32xf32>
    %151 = vector.extract_strided_slice %138 {offsets = [0, 64], sizes = [2, 32], strides = [1, 1]} : vector<2x128xf32> to vector<2x32xf32>
    %152 = math.tanh %151 : vector<2x32xf32>
    %153 = vector.extract_strided_slice %138 {offsets = [0, 96], sizes = [2, 32], strides = [1, 1]} : vector<2x128xf32> to vector<2x32xf32>
    %154 = arith.negf %153 : vector<2x32xf32>
    %155 = math.exp %154 : vector<2x32xf32>
    %cst_55 = arith.constant 1.000000e+00 : f32
    %156 = vector.broadcast %cst_55 : f32 to vector<2x32xf32>
    %157 = arith.addf %156, %155 : vector<2x32xf32>
    %158 = arith.divf %156, %157 : vector<2x32xf32>
    %159 = arith.mulf %150, %132 : vector<2x32xf32>
    %160 = arith.mulf %144, %152 : vector<2x32xf32>
    %161 = arith.addf %159, %160 : vector<2x32xf32>
    %162 = math.tanh %161 : vector<2x32xf32>
    %163 = arith.mulf %158, %162 : vector<2x32xf32>
    %164 = vector.extract_strided_slice %102 {offsets = [0, 2, 0], sizes = [2, 1, 128], strides = [1, 1, 1]} : vector<2x8x128xf32> to vector<2x1x128xf32>
    %165 = vector.shape_cast %164 : vector<2x1x128xf32> to vector<2x128xf32>
    %cst_56 = arith.constant dense<0.000000e+00> : vector<2x128xf32>
    %166 = tpu.matmul %163, %103, %cst_56 {dimension_numbers = #tpu.dot_dimension_numbers<[1], [0], [0], [1], [0, 0, 1, 1], [], []>} : vector<2x32xf32>, vector<32x128xf32>, vector<2x128xf32> -> vector<2x128xf32>
    %167 = arith.addf %165, %166 : vector<2x128xf32>
    %168 = vector.extract_strided_slice %167 {offsets = [0, 0], sizes = [2, 32], strides = [1, 1]} : vector<2x128xf32> to vector<2x32xf32>
    %169 = arith.negf %168 : vector<2x32xf32>
    %170 = math.exp %169 : vector<2x32xf32>
    %cst_57 = arith.constant 1.000000e+00 : f32
    %171 = vector.broadcast %cst_57 : f32 to vector<2x32xf32>
    %172 = arith.addf %171, %170 : vector<2x32xf32>
    %173 = arith.divf %171, %172 : vector<2x32xf32>
    %174 = vector.extract_strided_slice %167 {offsets = [0, 32], sizes = [2, 32], strides = [1, 1]} : vector<2x128xf32> to vector<2x32xf32>
    %175 = arith.negf %174 : vector<2x32xf32>
    %176 = math.exp %175 : vector<2x32xf32>
    %cst_58 = arith.constant 1.000000e+00 : f32
    %177 = vector.broadcast %cst_58 : f32 to vector<2x32xf32>
    %178 = arith.addf %177, %176 : vector<2x32xf32>
    %179 = arith.divf %177, %178 : vector<2x32xf32>
    %180 = vector.extract_strided_slice %167 {offsets = [0, 64], sizes = [2, 32], strides = [1, 1]} : vector<2x128xf32> to vector<2x32xf32>
    %181 = math.tanh %180 : vector<2x32xf32>
    %182 = vector.extract_strided_slice %167 {offsets = [0, 96], sizes = [2, 32], strides = [1, 1]} : vector<2x128xf32> to vector<2x32xf32>
    %183 = arith.negf %182 : vector<2x32xf32>
    %184 = math.exp %183 : vector<2x32xf32>
    %cst_59 = arith.constant 1.000000e+00 : f32
    %185 = vector.broadcast %cst_59 : f32 to vector<2x32xf32>
    %186 = arith.addf %185, %184 : vector<2x32xf32>
    %187 = arith.divf %185, %186 : vector<2x32xf32>
    %188 = arith.mulf %179, %161 : vector<2x32xf32>
    %189 = arith.mulf %173, %181 : vector<2x32xf32>
    %190 = arith.addf %188, %189 : vector<2x32xf32>
    %191 = math.tanh %190 : vector<2x32xf32>
    %192 = arith.mulf %187, %191 : vector<2x32xf32>
    %193 = vector.extract_strided_slice %102 {offsets = [0, 3, 0], sizes = [2, 1, 128], strides = [1, 1, 1]} : vector<2x8x128xf32> to vector<2x1x128xf32>
    %194 = vector.shape_cast %193 : vector<2x1x128xf32> to vector<2x128xf32>
    %cst_60 = arith.constant dense<0.000000e+00> : vector<2x128xf32>
    %195 = tpu.matmul %192, %103, %cst_60 {dimension_numbers = #tpu.dot_dimension_numbers<[1], [0], [0], [1], [0, 0, 1, 1], [], []>} : vector<2x32xf32>, vector<32x128xf32>, vector<2x128xf32> -> vector<2x128xf32>
    %196 = arith.addf %194, %195 : vector<2x128xf32>
    %197 = vector.extract_strided_slice %196 {offsets = [0, 0], sizes = [2, 32], strides = [1, 1]} : vector<2x128xf32> to vector<2x32xf32>
    %198 = arith.negf %197 : vector<2x32xf32>
    %199 = math.exp %198 : vector<2x32xf32>
    %cst_61 = arith.constant 1.000000e+00 : f32
    %200 = vector.broadcast %cst_61 : f32 to vector<2x32xf32>
    %201 = arith.addf %200, %199 : vector<2x32xf32>
    %202 = arith.divf %200, %201 : vector<2x32xf32>
    %203 = vector.extract_strided_slice %196 {offsets = [0, 32], sizes = [2, 32], strides = [1, 1]} : vector<2x128xf32> to vector<2x32xf32>
    %204 = arith.negf %203 : vector<2x32xf32>
    %205 = math.exp %204 : vector<2x32xf32>
    %cst_62 = arith.constant 1.000000e+00 : f32
    %206 = vector.broadcast %cst_62 : f32 to vector<2x32xf32>
    %207 = arith.addf %206, %205 : vector<2x32xf32>
    %208 = arith.divf %206, %207 : vector<2x32xf32>
    %209 = vector.extract_strided_slice %196 {offsets = [0, 64], sizes = [2, 32], strides = [1, 1]} : vector<2x128xf32> to vector<2x32xf32>
    %210 = math.tanh %209 : vector<2x32xf32>
    %211 = vector.extract_strided_slice %196 {offsets = [0, 96], sizes = [2, 32], strides = [1, 1]} : vector<2x128xf32> to vector<2x32xf32>
    %212 = arith.negf %211 : vector<2x32xf32>
    %213 = math.exp %212 : vector<2x32xf32>
    %cst_63 = arith.constant 1.000000e+00 : f32
    %214 = vector.broadcast %cst_63 : f32 to vector<2x32xf32>
    %215 = arith.addf %214, %213 : vector<2x32xf32>
    %216 = arith.divf %214, %215 : vector<2x32xf32>
    %217 = arith.mulf %208, %190 : vector<2x32xf32>
    %218 = arith.mulf %202, %210 : vector<2x32xf32>
    %219 = arith.addf %217, %218 : vector<2x32xf32>
    %220 = math.tanh %219 : vector<2x32xf32>
    %221 = arith.mulf %216, %220 : vector<2x32xf32>
    %222 = vector.extract_strided_slice %102 {offsets = [0, 4, 0], sizes = [2, 1, 128], strides = [1, 1, 1]} : vector<2x8x128xf32> to vector<2x1x128xf32>
    %223 = vector.shape_cast %222 : vector<2x1x128xf32> to vector<2x128xf32>
    %cst_64 = arith.constant dense<0.000000e+00> : vector<2x128xf32>
    %224 = tpu.matmul %221, %103, %cst_64 {dimension_numbers = #tpu.dot_dimension_numbers<[1], [0], [0], [1], [0, 0, 1, 1], [], []>} : vector<2x32xf32>, vector<32x128xf32>, vector<2x128xf32> -> vector<2x128xf32>
    %225 = arith.addf %223, %224 : vector<2x128xf32>
    %226 = vector.extract_strided_slice %225 {offsets = [0, 0], sizes = [2, 32], strides = [1, 1]} : vector<2x128xf32> to vector<2x32xf32>
    %227 = arith.negf %226 : vector<2x32xf32>
    %228 = math.exp %227 : vector<2x32xf32>
    %cst_65 = arith.constant 1.000000e+00 : f32
    %229 = vector.broadcast %cst_65 : f32 to vector<2x32xf32>
    %230 = arith.addf %229, %228 : vector<2x32xf32>
    %231 = arith.divf %229, %230 : vector<2x32xf32>
    %232 = vector.extract_strided_slice %225 {offsets = [0, 32], sizes = [2, 32], strides = [1, 1]} : vector<2x128xf32> to vector<2x32xf32>
    %233 = arith.negf %232 : vector<2x32xf32>
    %234 = math.exp %233 : vector<2x32xf32>
    %cst_66 = arith.constant 1.000000e+00 : f32
    %235 = vector.broadcast %cst_66 : f32 to vector<2x32xf32>
    %236 = arith.addf %235, %234 : vector<2x32xf32>
    %237 = arith.divf %235, %236 : vector<2x32xf32>
    %238 = vector.extract_strided_slice %225 {offsets = [0, 64], sizes = [2, 32], strides = [1, 1]} : vector<2x128xf32> to vector<2x32xf32>
    %239 = math.tanh %238 : vector<2x32xf32>
    %240 = vector.extract_strided_slice %225 {offsets = [0, 96], sizes = [2, 32], strides = [1, 1]} : vector<2x128xf32> to vector<2x32xf32>
    %241 = arith.negf %240 : vector<2x32xf32>
    %242 = math.exp %241 : vector<2x32xf32>
    %cst_67 = arith.constant 1.000000e+00 : f32
    %243 = vector.broadcast %cst_67 : f32 to vector<2x32xf32>
    %244 = arith.addf %243, %242 : vector<2x32xf32>
    %245 = arith.divf %243, %244 : vector<2x32xf32>
    %246 = arith.mulf %237, %219 : vector<2x32xf32>
    %247 = arith.mulf %231, %239 : vector<2x32xf32>
    %248 = arith.addf %246, %247 : vector<2x32xf32>
    %249 = math.tanh %248 : vector<2x32xf32>
    %250 = arith.mulf %245, %249 : vector<2x32xf32>
    %251 = vector.extract_strided_slice %102 {offsets = [0, 5, 0], sizes = [2, 1, 128], strides = [1, 1, 1]} : vector<2x8x128xf32> to vector<2x1x128xf32>
    %252 = vector.shape_cast %251 : vector<2x1x128xf32> to vector<2x128xf32>
    %cst_68 = arith.constant dense<0.000000e+00> : vector<2x128xf32>
    %253 = tpu.matmul %250, %103, %cst_68 {dimension_numbers = #tpu.dot_dimension_numbers<[1], [0], [0], [1], [0, 0, 1, 1], [], []>} : vector<2x32xf32>, vector<32x128xf32>, vector<2x128xf32> -> vector<2x128xf32>
    %254 = arith.addf %252, %253 : vector<2x128xf32>
    %255 = vector.extract_strided_slice %254 {offsets = [0, 0], sizes = [2, 32], strides = [1, 1]} : vector<2x128xf32> to vector<2x32xf32>
    %256 = arith.negf %255 : vector<2x32xf32>
    %257 = math.exp %256 : vector<2x32xf32>
    %cst_69 = arith.constant 1.000000e+00 : f32
    %258 = vector.broadcast %cst_69 : f32 to vector<2x32xf32>
    %259 = arith.addf %258, %257 : vector<2x32xf32>
    %260 = arith.divf %258, %259 : vector<2x32xf32>
    %261 = vector.extract_strided_slice %254 {offsets = [0, 32], sizes = [2, 32], strides = [1, 1]} : vector<2x128xf32> to vector<2x32xf32>
    %262 = arith.negf %261 : vector<2x32xf32>
    %263 = math.exp %262 : vector<2x32xf32>
    %cst_70 = arith.constant 1.000000e+00 : f32
    %264 = vector.broadcast %cst_70 : f32 to vector<2x32xf32>
    %265 = arith.addf %264, %263 : vector<2x32xf32>
    %266 = arith.divf %264, %265 : vector<2x32xf32>
    %267 = vector.extract_strided_slice %254 {offsets = [0, 64], sizes = [2, 32], strides = [1, 1]} : vector<2x128xf32> to vector<2x32xf32>
    %268 = math.tanh %267 : vector<2x32xf32>
    %269 = vector.extract_strided_slice %254 {offsets = [0, 96], sizes = [2, 32], strides = [1, 1]} : vector<2x128xf32> to vector<2x32xf32>
    %270 = arith.negf %269 : vector<2x32xf32>
    %271 = math.exp %270 : vector<2x32xf32>
    %cst_71 = arith.constant 1.000000e+00 : f32
    %272 = vector.broadcast %cst_71 : f32 to vector<2x32xf32>
    %273 = arith.addf %272, %271 : vector<2x32xf32>
    %274 = arith.divf %272, %273 : vector<2x32xf32>
    %275 = arith.mulf %266, %248 : vector<2x32xf32>
    %276 = arith.mulf %260, %268 : vector<2x32xf32>
    %277 = arith.addf %275, %276 : vector<2x32xf32>
    %278 = math.tanh %277 : vector<2x32xf32>
    %279 = arith.mulf %274, %278 : vector<2x32xf32>
    %280 = vector.extract_strided_slice %102 {offsets = [0, 6, 0], sizes = [2, 1, 128], strides = [1, 1, 1]} : vector<2x8x128xf32> to vector<2x1x128xf32>
    %281 = vector.shape_cast %280 : vector<2x1x128xf32> to vector<2x128xf32>
    %cst_72 = arith.constant dense<0.000000e+00> : vector<2x128xf32>
    %282 = tpu.matmul %279, %103, %cst_72 {dimension_numbers = #tpu.dot_dimension_numbers<[1], [0], [0], [1], [0, 0, 1, 1], [], []>} : vector<2x32xf32>, vector<32x128xf32>, vector<2x128xf32> -> vector<2x128xf32>
    %283 = arith.addf %281, %282 : vector<2x128xf32>
    %284 = vector.extract_strided_slice %283 {offsets = [0, 0], sizes = [2, 32], strides = [1, 1]} : vector<2x128xf32> to vector<2x32xf32>
    %285 = arith.negf %284 : vector<2x32xf32>
    %286 = math.exp %285 : vector<2x32xf32>
    %cst_73 = arith.constant 1.000000e+00 : f32
    %287 = vector.broadcast %cst_73 : f32 to vector<2x32xf32>
    %288 = arith.addf %287, %286 : vector<2x32xf32>
    %289 = arith.divf %287, %288 : vector<2x32xf32>
    %290 = vector.extract_strided_slice %283 {offsets = [0, 32], sizes = [2, 32], strides = [1, 1]} : vector<2x128xf32> to vector<2x32xf32>
    %291 = arith.negf %290 : vector<2x32xf32>
    %292 = math.exp %291 : vector<2x32xf32>
    %cst_74 = arith.constant 1.000000e+00 : f32
    %293 = vector.broadcast %cst_74 : f32 to vector<2x32xf32>
    %294 = arith.addf %293, %292 : vector<2x32xf32>
    %295 = arith.divf %293, %294 : vector<2x32xf32>
    %296 = vector.extract_strided_slice %283 {offsets = [0, 64], sizes = [2, 32], strides = [1, 1]} : vector<2x128xf32> to vector<2x32xf32>
    %297 = math.tanh %296 : vector<2x32xf32>
    %298 = vector.extract_strided_slice %283 {offsets = [0, 96], sizes = [2, 32], strides = [1, 1]} : vector<2x128xf32> to vector<2x32xf32>
    %299 = arith.negf %298 : vector<2x32xf32>
    %300 = math.exp %299 : vector<2x32xf32>
    %cst_75 = arith.constant 1.000000e+00 : f32
    %301 = vector.broadcast %cst_75 : f32 to vector<2x32xf32>
    %302 = arith.addf %301, %300 : vector<2x32xf32>
    %303 = arith.divf %301, %302 : vector<2x32xf32>
    %304 = arith.mulf %295, %277 : vector<2x32xf32>
    %305 = arith.mulf %289, %297 : vector<2x32xf32>
    %306 = arith.addf %304, %305 : vector<2x32xf32>
    %307 = math.tanh %306 : vector<2x32xf32>
    %308 = arith.mulf %303, %307 : vector<2x32xf32>
    %309 = vector.extract_strided_slice %102 {offsets = [0, 7, 0], sizes = [2, 1, 128], strides = [1, 1, 1]} : vector<2x8x128xf32> to vector<2x1x128xf32>
    %310 = vector.shape_cast %309 : vector<2x1x128xf32> to vector<2x128xf32>
    %cst_76 = arith.constant dense<0.000000e+00> : vector<2x128xf32>
    %311 = tpu.matmul %308, %103, %cst_76 {dimension_numbers = #tpu.dot_dimension_numbers<[1], [0], [0], [1], [0, 0, 1, 1], [], []>} : vector<2x32xf32>, vector<32x128xf32>, vector<2x128xf32> -> vector<2x128xf32>
    %312 = arith.addf %310, %311 : vector<2x128xf32>
    %313 = vector.extract_strided_slice %312 {offsets = [0, 0], sizes = [2, 32], strides = [1, 1]} : vector<2x128xf32> to vector<2x32xf32>
    %314 = arith.negf %313 : vector<2x32xf32>
    %315 = math.exp %314 : vector<2x32xf32>
    %cst_77 = arith.constant 1.000000e+00 : f32
    %316 = vector.broadcast %cst_77 : f32 to vector<2x32xf32>
    %317 = arith.addf %316, %315 : vector<2x32xf32>
    %318 = arith.divf %316, %317 : vector<2x32xf32>
    %319 = vector.extract_strided_slice %312 {offsets = [0, 32], sizes = [2, 32], strides = [1, 1]} : vector<2x128xf32> to vector<2x32xf32>
    %320 = arith.negf %319 : vector<2x32xf32>
    %321 = math.exp %320 : vector<2x32xf32>
    %cst_78 = arith.constant 1.000000e+00 : f32
    %322 = vector.broadcast %cst_78 : f32 to vector<2x32xf32>
    %323 = arith.addf %322, %321 : vector<2x32xf32>
    %324 = arith.divf %322, %323 : vector<2x32xf32>
    %325 = vector.extract_strided_slice %312 {offsets = [0, 64], sizes = [2, 32], strides = [1, 1]} : vector<2x128xf32> to vector<2x32xf32>
    %326 = math.tanh %325 : vector<2x32xf32>
    %327 = vector.extract_strided_slice %312 {offsets = [0, 96], sizes = [2, 32], strides = [1, 1]} : vector<2x128xf32> to vector<2x32xf32>
    %328 = arith.negf %327 : vector<2x32xf32>
    %329 = math.exp %328 : vector<2x32xf32>
    %cst_79 = arith.constant 1.000000e+00 : f32
    %330 = vector.broadcast %cst_79 : f32 to vector<2x32xf32>
    %331 = arith.addf %330, %329 : vector<2x32xf32>
    %332 = arith.divf %330, %331 : vector<2x32xf32>
    %333 = arith.mulf %324, %306 : vector<2x32xf32>
    %334 = arith.mulf %318, %326 : vector<2x32xf32>
    %335 = arith.addf %333, %334 : vector<2x32xf32>
    %336 = math.tanh %335 : vector<2x32xf32>
    %337 = arith.mulf %332, %336 : vector<2x32xf32>
    %338 = tpu.concatenate %134, %163, %192, %221, %250, %279, %308, %337 in 1 : vector<2x32xf32>, vector<2x32xf32>, vector<2x32xf32>, vector<2x32xf32>, vector<2x32xf32>, vector<2x32xf32>, vector<2x32xf32>, vector<2x32xf32> -> vector<2x256xf32>
    %c0_80 = arith.constant 0 : index
    %c0_81 = arith.constant 0 : index
    %339 = vector.load %arg13[%c0_80, %c0_81] : memref<256x64xf32, #tpu.memory_space<vmem>>, vector<256x64xf32>
    %cst_82 = arith.constant dense<0.000000e+00> : vector<2x64xf32>
    %340 = tpu.matmul %338, %339, %cst_82 {dimension_numbers = #tpu.dot_dimension_numbers<[1], [0], [0], [1], [0, 0, 1, 1], [], []>} : vector<2x256xf32>, vector<256x64xf32>, vector<2x64xf32> -> vector<2x64xf32>
    %c0_83 = arith.constant 0 : index
    %c0_84 = arith.constant 0 : index
    %341 = vector.load %arg14[%c0_83, %c0_84] : memref<1x64xf32, #tpu.memory_space<vmem>>, vector<1x64xf32>
    %342 = vector.broadcast %341 : vector<1x64xf32> to vector<2x64xf32>
    %343 = arith.addf %340, %342 : vector<2x64xf32>
    %cst_85 = arith.constant 0.000000e+00 : f32
    %344 = vector.broadcast %cst_85 : f32 to vector<2x64xf32>
    %345 = arith.maximumf %343, %344 : vector<2x64xf32>
    %c0_86 = arith.constant 0 : index
    %c0_87 = arith.constant 0 : index
    %346 = vector.load %arg15[%c0_86, %c0_87] : memref<64x32xf32, #tpu.memory_space<vmem>>, vector<64x32xf32>
    %cst_88 = arith.constant dense<0.000000e+00> : vector<2x32xf32>
    %347 = tpu.matmul %345, %346, %cst_88 {dimension_numbers = #tpu.dot_dimension_numbers<[1], [0], [0], [1], [0, 0, 1, 1], [], []>} : vector<2x64xf32>, vector<64x32xf32>, vector<2x32xf32> -> vector<2x32xf32>
    %c0_89 = arith.constant 0 : index
    %c0_90 = arith.constant 0 : index
    %348 = vector.load %arg16[%c0_89, %c0_90] : memref<1x32xf32, #tpu.memory_space<vmem>>, vector<1x32xf32>
    %349 = vector.broadcast %348 : vector<1x32xf32> to vector<2x32xf32>
    %350 = arith.addf %347, %349 : vector<2x32xf32>
    %c0_91 = arith.constant 0 : index
    %c0_92 = arith.constant 0 : index
    %351 = vector.load %arg17[%c0_91, %c0_92] : memref<2x32xf32, #tpu.memory_space<vmem>>, vector<2x32xf32>
    tpu.vector_store %arg17[%c0_91, %c0_92], %350 {strides = array<i32>} : memref<2x32xf32, #tpu.memory_space<vmem>>, vector<2x32xf32>,
    return
  }
  func.func @transform_0(%arg0: i32) -> (i32, i32, i32) {
    %c0_i32 = arith.constant 0 : i32
    %c0_i32_0 = arith.constant 0 : i32
    %c0_i32_1 = arith.constant 0 : i32
    return %arg0, %c0_i32, %c0_i32_0 : i32, i32, i32
  }
  func.func @transform_1(%arg0: i32) -> (i32, i32) {
    %c0_i32 = arith.constant 0 : i32
    %c0_i32_0 = arith.constant 0 : i32
    %c0_i32_1 = arith.constant 0 : i32
    return %c0_i32, %c0_i32_0 : i32, i32
  }
  func.func @transform_2(%arg0: i32) -> (i32, i32) {
    %c0_i32 = arith.constant 0 : i32
    %c0_i32_0 = arith.constant 0 : i32
    %c0_i32_1 = arith.constant 0 : i32
    return %c0_i32, %c0_i32_0 : i32, i32
  }
  func.func @transform_3(%arg0: i32) -> (i32, i32) {
    %c0_i32 = arith.constant 0 : i32
    %c0_i32_0 = arith.constant 0 : i32
    %c0_i32_1 = arith.constant 0 : i32
    return %c0_i32, %c0_i32_0 : i32, i32
  }
  func.func @transform_4(%arg0: i32) -> (i32, i32) {
    %c0_i32 = arith.constant 0 : i32
    %c0_i32_0 = arith.constant 0 : i32
    %c0_i32_1 = arith.constant 0 : i32
    return %c0_i32, %c0_i32_0 : i32, i32
  }
  func.func @transform_5(%arg0: i32) -> (i32, i32) {
    %c0_i32 = arith.constant 0 : i32
    %c0_i32_0 = arith.constant 0 : i32
    %c0_i32_1 = arith.constant 0 : i32
    return %c0_i32, %c0_i32_0 : i32, i32
  }
  func.func @transform_6(%arg0: i32) -> (i32, i32) {
    %c0_i32 = arith.constant 0 : i32
    %c0_i32_0 = arith.constant 0 : i32
    %c0_i32_1 = arith.constant 0 : i32
    return %c0_i32, %c0_i32_0 : i32, i32
  }
  func.func @transform_7(%arg0: i32) -> (i32, i32) {
    %c0_i32 = arith.constant 0 : i32
    %c0_i32_0 = arith.constant 0 : i32
    %c0_i32_1 = arith.constant 0 : i32
    return %c0_i32, %c0_i32_0 : i32, i32
  }
  func.func @transform_8(%arg0: i32) -> (i32, i32) {
    %c0_i32 = arith.constant 0 : i32
    %c0_i32_0 = arith.constant 0 : i32
    %c0_i32_1 = arith.constant 0 : i32
    return %c0_i32, %c0_i32_0 : i32, i32
  }
  func.func @transform_9(%arg0: i32) -> (i32, i32) {
    %c0_i32 = arith.constant 0 : i32
    %c0_i32_0 = arith.constant 0 : i32
    %c0_i32_1 = arith.constant 0 : i32
    return %c0_i32, %c0_i32_0 : i32, i32
  }
  func.func @transform_10(%arg0: i32) -> (i32, i32) {
    %c0_i32 = arith.constant 0 : i32
    %c0_i32_0 = arith.constant 0 : i32
    %c0_i32_1 = arith.constant 0 : i32
    return %c0_i32, %c0_i32_0 : i32, i32
  }
  func.func @transform_11(%arg0: i32) -> (i32, i32) {
    %c0_i32 = arith.constant 0 : i32
    %c0_i32_0 = arith.constant 0 : i32
    %c0_i32_1 = arith.constant 0 : i32
    return %c0_i32, %c0_i32_0 : i32, i32
  }
  func.func @transform_12(%arg0: i32) -> (i32, i32) {
    %c0_i32 = arith.constant 0 : i32
    %c0_i32_0 = arith.constant 0 : i32
    %c0_i32_1 = arith.constant 0 : i32
    return %c0_i32, %c0_i32_0 : i32, i32
  }
  func.func @transform_13(%arg0: i32) -> (i32, i32) {
    %c0_i32 = arith.constant 0 : i32
    %c0_i32_0 = arith.constant 0 : i32
    %c0_i32_1 = arith.constant 0 : i32
    return %c0_i32, %c0_i32_0 : i32, i32
  }
  func.func @transform_14(%arg0: i32) -> (i32, i32) {
    %c0_i32 = arith.constant 0 : i32
    %c0_i32_0 = arith.constant 0 : i32
    %c0_i32_1 = arith.constant 0 : i32
    return %c0_i32, %c0_i32_0 : i32, i32
  }
  func.func @transform_15(%arg0: i32) -> (i32, i32) {
    %c0_i32 = arith.constant 0 : i32
    %c0_i32_0 = arith.constant 0 : i32
    %c0_i32_1 = arith.constant 0 : i32
    return %c0_i32, %c0_i32_0 : i32, i32
  }
  func.func @transform_16(%arg0: i32) -> (i32, i32) {
    %c0_i32 = arith.constant 0 : i32
    %c0_i32_0 = arith.constant 0 : i32
    return %arg0, %c0_i32 : i32, i32
  }
}

module attributes {stable_mosaic.version = 11 : i64} {
  func.func @_encoder_kernel(%arg0: i32, %arg1: memref<2x8x4xf32, #tpu.memory_space<vmem>>, %arg2: memref<12x16xf32, #tpu.memory_space<vmem>>, %arg3: memref<1x16xf32, #tpu.memory_space<vmem>>, %arg4: memref<48x32xf32, #tpu.memory_space<vmem>>, %arg5: memref<1x32xf32, #tpu.memory_space<vmem>>, %arg6: memref<32x96xf32, #tpu.memory_space<vmem>>, %arg7: memref<1x96xf32, #tpu.memory_space<vmem>>, %arg8: memref<32x32xf32, #tpu.memory_space<vmem>>, %arg9: memref<1x32xf32, #tpu.memory_space<vmem>>, %arg10: memref<32x128xf32, #tpu.memory_space<vmem>>, %arg11: memref<32x128xf32, #tpu.memory_space<vmem>>, %arg12: memref<1x128xf32, #tpu.memory_space<vmem>>, %arg13: memref<256x64xf32, #tpu.memory_space<vmem>>, %arg14: memref<1x64xf32, #tpu.memory_space<vmem>>, %arg15: memref<64x32xf32, #tpu.memory_space<vmem>>, %arg16: memref<1x32xf32, #tpu.memory_space<vmem>>, %arg17: memref<2x32xf32, #tpu.memory_space<vmem>>) attributes {dimension_semantics = [#tpu.dimension_semantics<parallel>], iteration_bounds = array<i64: 1>, scalar_prefetch = 0 : i64, scratch_operands = 0 : i64, tpu.core_type = #tpu.core_type<tc>, window_params = [{transform_indices = @transform_0, window_bounds = array<i64: 2, 8, 4>}, {pipeline_mode = #tpu.pipeline_mode<synchronous>, transform_indices = @transform_1, window_bounds = array<i64: 12, 16>}, {pipeline_mode = #tpu.pipeline_mode<synchronous>, transform_indices = @transform_2, window_bounds = array<i64: 1, 16>}, {pipeline_mode = #tpu.pipeline_mode<synchronous>, transform_indices = @transform_3, window_bounds = array<i64: 48, 32>}, {pipeline_mode = #tpu.pipeline_mode<synchronous>, transform_indices = @transform_4, window_bounds = array<i64: 1, 32>}, {pipeline_mode = #tpu.pipeline_mode<synchronous>, transform_indices = @transform_5, window_bounds = array<i64: 32, 96>}, {pipeline_mode = #tpu.pipeline_mode<synchronous>, transform_indices = @transform_6, window_bounds = array<i64: 1, 96>}, {pipeline_mode = #tpu.pipeline_mode<synchronous>, transform_indices = @transform_7, window_bounds = array<i64: 32, 32>}, {pipeline_mode = #tpu.pipeline_mode<synchronous>, transform_indices = @transform_8, window_bounds = array<i64: 1, 32>}, {pipeline_mode = #tpu.pipeline_mode<synchronous>, transform_indices = @transform_9, window_bounds = array<i64: 32, 128>}, {pipeline_mode = #tpu.pipeline_mode<synchronous>, transform_indices = @transform_10, window_bounds = array<i64: 32, 128>}, {pipeline_mode = #tpu.pipeline_mode<synchronous>, transform_indices = @transform_11, window_bounds = array<i64: 1, 128>}, {pipeline_mode = #tpu.pipeline_mode<synchronous>, transform_indices = @transform_12, window_bounds = array<i64: 256, 64>}, {pipeline_mode = #tpu.pipeline_mode<synchronous>, transform_indices = @transform_13, window_bounds = array<i64: 1, 64>}, {pipeline_mode = #tpu.pipeline_mode<synchronous>, transform_indices = @transform_14, window_bounds = array<i64: 64, 32>}, {pipeline_mode = #tpu.pipeline_mode<synchronous>, transform_indices = @transform_15, window_bounds = array<i64: 1, 32>}, {transform_indices = @transform_16, window_bounds = array<i64: 2, 32>}]} {
    %c0 = arith.constant 0 : index
    %c0_0 = arith.constant 0 : index
    %c0_1 = arith.constant 0 : index
    %0 = vector.load %arg1[%c0, %c0_0, %c0_1] : memref<2x8x4xf32, #tpu.memory_space<vmem>>, vector<2x8x4xf32>
    %1 = vector.shape_cast %0 : vector<2x8x4xf32> to vector<16x4xf32>
    %2 = tpu.iota {dimensions = array<i32: 0>} : vector<16x1xi32>
    %c8_i32 = arith.constant 8 : i32
    %c0_i32 = arith.constant 0 : i32
    %3 = arith.cmpi eq, %c8_i32, %c0_i32 : i32
    %c1_i32 = arith.constant 1 : i32
    %4 = arith.select %3, %c1_i32, %c8_i32 : i32
    %5 = vector.broadcast %4 : i32 to vector<16x1xi32>
    %6 = arith.remsi %2, %5 : vector<16x1xi32>
    %c0_i32_2 = arith.constant 0 : i32
    %7 = vector.broadcast %c0_i32_2 : i32 to vector<16x1xi32>
    %8 = arith.cmpi ne, %6, %7 : vector<16x1xi32>
    %c0_i32_3 = arith.constant 0 : i32
    %9 = vector.broadcast %c0_i32_3 : i32 to vector<16x1xi32>
    %10 = arith.cmpi slt, %6, %9 : vector<16x1xi32>
    %c0_i32_4 = arith.constant 0 : i32
    %11 = arith.cmpi slt, %4, %c0_i32_4 : i32
    %12 = vector.broadcast %11 : i1 to vector<16x1xi1>
    %13 = vector.broadcast %12 : vector<16x1xi1> to vector<16x1xi1>
    %14 = arith.xori %10, %13 : vector<16x1xi1>
    %15 = arith.andi %14, %8 : vector<16x1xi1>
    %16 = vector.broadcast %4 : i32 to vector<16x1xi32>
    %17 = arith.addi %6, %16 : vector<16x1xi32>
    %18 = arith.select %15, %17, %6 : vector<16x1xi1>, vector<16x1xi32>
    %c1_i32_5 = arith.constant 1 : i32
    %19 = vector.broadcast %c1_i32_5 : i32 to vector<16x1xi32>
    %20 = arith.cmpi sge, %18, %19 : vector<16x1xi32>
    %c6_i32 = arith.constant 6 : i32
    %21 = vector.broadcast %c6_i32 : i32 to vector<16x1xi32>
    %22 = arith.cmpi sle, %18, %21 : vector<16x1xi32>
    %c1_i32_6 = arith.constant 1 : i32
    %23 = tpu.dynamic_rotate %1 by %c1_i32_6 dim 0 : vector<16x4xf32>, i32 -> vector<16x4xf32>
    %cst = arith.constant 0.000000e+00 : f32
    %24 = vector.shape_cast %20 : vector<16x1xi1> to vector<16x1xi1>
    %25 = vector.broadcast %24 : vector<16x1xi1> to vector<16x4xi1>
    %26 = vector.broadcast %cst : f32 to vector<16x4xf32>
    %27 = arith.select %25, %23, %26 : vector<16x4xi1>, vector<16x4xf32>
    %c15_i32 = arith.constant 15 : i32
    %28 = tpu.dynamic_rotate %1 by %c15_i32 dim 0 : vector<16x4xf32>, i32 -> vector<16x4xf32>
    %cst_7 = arith.constant 0.000000e+00 : f32
    %29 = vector.shape_cast %22 : vector<16x1xi1> to vector<16x1xi1>
    %30 = vector.broadcast %29 : vector<16x1xi1> to vector<16x4xi1>
    %31 = vector.broadcast %cst_7 : f32 to vector<16x4xf32>
    %32 = arith.select %30, %28, %31 : vector<16x4xi1>, vector<16x4xf32>
    %33 = tpu.concatenate %27, %1, %32 in 1 : vector<16x4xf32>, vector<16x4xf32>, vector<16x4xf32> -> vector<16x12xf32>
    %c0_8 = arith.constant 0 : index
    %c0_9 = arith.constant 0 : index
    %34 = vector.load %arg2[%c0_8, %c0_9] : memref<12x16xf32, #tpu.memory_space<vmem>>, vector<12x16xf32>
    %cst_10 = arith.constant dense<0.000000e+00> : vector<16x16xf32>
    %35 = tpu.matmul %33, %34, %cst_10 {dimension_numbers = #tpu.dot_dimension_numbers<[1], [0], [0], [1], [0, 0, 1, 1], [], []>} : vector<16x12xf32>, vector<12x16xf32>, vector<16x16xf32> -> vector<16x16xf32>
    %c0_11 = arith.constant 0 : index
    %c0_12 = arith.constant 0 : index
    %36 = vector.load %arg3[%c0_11, %c0_12] : memref<1x16xf32, #tpu.memory_space<vmem>>, vector<1x16xf32>
    %37 = vector.broadcast %36 : vector<1x16xf32> to vector<16x16xf32>
    %38 = arith.addf %35, %37 : vector<16x16xf32>
    %cst_13 = arith.constant 0.000000e+00 : f32
    %39 = vector.broadcast %cst_13 : f32 to vector<16x16xf32>
    %40 = arith.maximumf %38, %39 : vector<16x16xf32>
    %c1_i32_14 = arith.constant 1 : i32
    %41 = tpu.dynamic_rotate %40 by %c1_i32_14 dim 0 : vector<16x16xf32>, i32 -> vector<16x16xf32>
    %cst_15 = arith.constant 0.000000e+00 : f32
    %42 = vector.shape_cast %20 : vector<16x1xi1> to vector<16x1xi1>
    %43 = vector.broadcast %42 : vector<16x1xi1> to vector<16x16xi1>
    %44 = vector.broadcast %cst_15 : f32 to vector<16x16xf32>
    %45 = arith.select %43, %41, %44 : vector<16x16xi1>, vector<16x16xf32>
    %c15_i32_16 = arith.constant 15 : i32
    %46 = tpu.dynamic_rotate %40 by %c15_i32_16 dim 0 : vector<16x16xf32>, i32 -> vector<16x16xf32>
    %cst_17 = arith.constant 0.000000e+00 : f32
    %47 = vector.shape_cast %22 : vector<16x1xi1> to vector<16x1xi1>
    %48 = vector.broadcast %47 : vector<16x1xi1> to vector<16x16xi1>
    %49 = vector.broadcast %cst_17 : f32 to vector<16x16xf32>
    %50 = arith.select %48, %46, %49 : vector<16x16xi1>, vector<16x16xf32>
    %51 = tpu.concatenate %45, %40, %50 in 1 : vector<16x16xf32>, vector<16x16xf32>, vector<16x16xf32> -> vector<16x48xf32>
    %c0_18 = arith.constant 0 : index
    %c0_19 = arith.constant 0 : index
    %52 = vector.load %arg4[%c0_18, %c0_19] : memref<48x32xf32, #tpu.memory_space<vmem>>, vector<48x32xf32>
    %cst_20 = arith.constant dense<0.000000e+00> : vector<16x32xf32>
    %53 = tpu.matmul %51, %52, %cst_20 {dimension_numbers = #tpu.dot_dimension_numbers<[1], [0], [0], [1], [0, 0, 1, 1], [], []>} : vector<16x48xf32>, vector<48x32xf32>, vector<16x32xf32> -> vector<16x32xf32>
    %c0_21 = arith.constant 0 : index
    %c0_22 = arith.constant 0 : index
    %54 = vector.load %arg5[%c0_21, %c0_22] : memref<1x32xf32, #tpu.memory_space<vmem>>, vector<1x32xf32>
    %55 = vector.broadcast %54 : vector<1x32xf32> to vector<16x32xf32>
    %56 = arith.addf %53, %55 : vector<16x32xf32>
    %cst_23 = arith.constant 0.000000e+00 : f32
    %57 = vector.broadcast %cst_23 : f32 to vector<16x32xf32>
    %58 = arith.maximumf %56, %57 : vector<16x32xf32>
    %c0_24 = arith.constant 0 : index
    %c0_25 = arith.constant 0 : index
    %59 = vector.load %arg6[%c0_24, %c0_25] : memref<32x96xf32, #tpu.memory_space<vmem>>, vector<32x96xf32>
    %cst_26 = arith.constant dense<0.000000e+00> : vector<16x96xf32>
    %60 = tpu.matmul %58, %59, %cst_26 {dimension_numbers = #tpu.dot_dimension_numbers<[1], [0], [0], [1], [0, 0, 1, 1], [], []>} : vector<16x32xf32>, vector<32x96xf32>, vector<16x96xf32> -> vector<16x96xf32>
    %c0_27 = arith.constant 0 : index
    %c0_28 = arith.constant 0 : index
    %61 = vector.load %arg7[%c0_27, %c0_28] : memref<1x96xf32, #tpu.memory_space<vmem>>, vector<1x96xf32>
    %62 = vector.broadcast %61 : vector<1x96xf32> to vector<16x96xf32>
    %63 = arith.addf %60, %62 : vector<16x96xf32>
    %64 = vector.shape_cast %63 : vector<16x96xf32> to vector<2x8x96xf32>
    %65 = vector.extract_strided_slice %64 {offsets = [0, 0, 0], sizes = [2, 8, 16], strides = [1, 1, 1]} : vector<2x8x96xf32> to vector<2x8x16xf32>
    %66 = vector.extract_strided_slice %64 {offsets = [0, 0, 16], sizes = [2, 8, 16], strides = [1, 1, 1]} : vector<2x8x96xf32> to vector<2x8x16xf32>
    %67 = tpu.concatenate %65, %66 in 0 : vector<2x8x16xf32>, vector<2x8x16xf32> -> vector<4x8x16xf32>
    %cst_29 = arith.constant 2.500000e-01 : f32
    %68 = vector.broadcast %cst_29 : f32 to vector<4x8x16xf32>
    %69 = arith.mulf %67, %68 : vector<4x8x16xf32>
    %70 = vector.extract_strided_slice %64 {offsets = [0, 0, 32], sizes = [2, 8, 16], strides = [1, 1, 1]} : vector<2x8x96xf32> to vector<2x8x16xf32>
    %71 = vector.extract_strided_slice %64 {offsets = [0, 0, 48], sizes = [2, 8, 16], strides = [1, 1, 1]} : vector<2x8x96xf32> to vector<2x8x16xf32>
    %72 = tpu.concatenate %70, %71 in 0 : vector<2x8x16xf32>, vector<2x8x16xf32> -> vector<4x8x16xf32>
    %73 = vector.extract_strided_slice %64 {offsets = [0, 0, 64], sizes = [2, 8, 16], strides = [1, 1, 1]} : vector<2x8x96xf32> to vector<2x8x16xf32>
    %74 = vector.extract_strided_slice %64 {offsets = [0, 0, 80], sizes = [2, 8, 16], strides = [1, 1, 1]} : vector<2x8x96xf32> to vector<2x8x16xf32>
    %75 = tpu.concatenate %73, %74 in 0 : vector<2x8x16xf32>, vector<2x8x16xf32> -> vector<4x8x16xf32>
    "tpu.trace_start"() <{level = 10 : i32, message = "bqd,bkd->bqk"}> : () -> ()
    %cst_30 = arith.constant dense<0.000000e+00> : vector<4x8x8xf32>
    %76 = tpu.matmul %69, %72, %cst_30 {dimension_numbers = #tpu.dot_dimension_numbers<[2], [2], [1], [1], [0, 0, 0, 1, 1, 1], [0], [0]>} : vector<4x8x16xf32>, vector<4x8x16xf32>, vector<4x8x8xf32> -> vector<4x8x8xf32>
    "tpu.trace_stop"() : () -> ()
    %cst_31 = arith.constant dense<0xFF800000> : vector<4x8xf32>
    %77 = vector.multi_reduction <maximumf>, %76, %cst_31 [2] : vector<4x8x8xf32> to vector<4x8xf32>
    %78 = vector.shape_cast %77 : vector<4x8xf32> to vector<4x8x1xf32>
    %79 = vector.broadcast %78 : vector<4x8x1xf32> to vector<4x8x8xf32>
    %80 = arith.subf %76, %79 : vector<4x8x8xf32>
    %81 = math.exp %80 : vector<4x8x8xf32>
    %cst_32 = arith.constant dense<0.000000e+00> : vector<4x8xf32>
    %82 = vector.multi_reduction <add>, %81, %cst_32 [2] : vector<4x8x8xf32> to vector<4x8xf32>
    %83 = vector.shape_cast %82 : vector<4x8xf32> to vector<4x8x1xf32>
    %84 = tpu.reciprocal %83 {approx = true} : vector<4x8x1xf32> -> vector<4x8x1xf32>
    %85 = vector.broadcast %84 : vector<4x8x1xf32> to vector<4x8x8xf32>
    %86 = arith.mulf %81, %85 : vector<4x8x8xf32>
    "tpu.trace_start"() <{level = 10 : i32, message = "bqk,bkd->bqd"}> : () -> ()
    %cst_33 = arith.constant dense<0.000000e+00> : vector<4x8x16xf32>
    %87 = tpu.matmul %86, %75, %cst_33 {dimension_numbers = #tpu.dot_dimension_numbers<[2], [1], [1], [2], [0, 0, 0, 1, 1, 2], [0], [0]>} : vector<4x8x8xf32>, vector<4x8x16xf32>, vector<4x8x16xf32> -> vector<4x8x16xf32>
    "tpu.trace_stop"() : () -> ()
    %88 = vector.extract_strided_slice %87 {offsets = [0, 0, 0], sizes = [2, 8, 16], strides = [1, 1, 1]} : vector<4x8x16xf32> to vector<2x8x16xf32>
    %89 = vector.extract_strided_slice %87 {offsets = [2, 0, 0], sizes = [2, 8, 16], strides = [1, 1, 1]} : vector<4x8x16xf32> to vector<2x8x16xf32>
    %90 = tpu.concatenate %88, %89 in 2 : vector<2x8x16xf32>, vector<2x8x16xf32> -> vector<2x8x32xf32>
    %91 = vector.shape_cast %90 : vector<2x8x32xf32> to vector<16x32xf32>
    %c0_34 = arith.constant 0 : index
    %c0_35 = arith.constant 0 : index
    %92 = vector.load %arg8[%c0_34, %c0_35] : memref<32x32xf32, #tpu.memory_space<vmem>>, vector<32x32xf32>
    %cst_36 = arith.constant dense<0.000000e+00> : vector<16x32xf32>
    %93 = tpu.matmul %91, %92, %cst_36 {dimension_numbers = #tpu.dot_dimension_numbers<[1], [0], [0], [1], [0, 0, 1, 1], [], []>} : vector<16x32xf32>, vector<32x32xf32>, vector<16x32xf32> -> vector<16x32xf32>
    %c0_37 = arith.constant 0 : index
    %c0_38 = arith.constant 0 : index
    %94 = vector.load %arg9[%c0_37, %c0_38] : memref<1x32xf32, #tpu.memory_space<vmem>>, vector<1x32xf32>
    %95 = vector.broadcast %94 : vector<1x32xf32> to vector<16x32xf32>
    %96 = arith.addf %93, %95 : vector<16x32xf32>
    %c0_39 = arith.constant 0 : index
    %c0_40 = arith.constant 0 : index
    %97 = vector.load %arg10[%c0_39, %c0_40] : memref<32x128xf32, #tpu.memory_space<vmem>>, vector<32x128xf32>
    %cst_41 = arith.constant dense<0.000000e+00> : vector<16x128xf32>
    %98 = tpu.matmul %96, %97, %cst_41 {dimension_numbers = #tpu.dot_dimension_numbers<[1], [0], [0], [1], [0, 0, 1, 1], [], []>} : vector<16x32xf32>, vector<32x128xf32>, vector<16x128xf32> -> vector<16x128xf32>
    %c0_42 = arith.constant 0 : index
    %c0_43 = arith.constant 0 : index
    %99 = vector.load %arg12[%c0_42, %c0_43] : memref<1x128xf32, #tpu.memory_space<vmem>>, vector<1x128xf32>
    %100 = vector.broadcast %99 : vector<1x128xf32> to vector<16x128xf32>
    %101 = arith.addf %98, %100 : vector<16x128xf32>
    %102 = vector.shape_cast %101 : vector<16x128xf32> to vector<2x8x128xf32>
    %c0_44 = arith.constant 0 : index
    %c0_45 = arith.constant 0 : index
    %103 = vector.load %arg11[%c0_44, %c0_45] : memref<32x128xf32, #tpu.memory_space<vmem>>, vector<32x128xf32>
    %cst_46 = arith.constant 0.000000e+00 : f32
    %104 = vector.broadcast %cst_46 : f32 to vector<2x32xf32>
    %cst_47 = arith.constant 0.000000e+00 : f32
    %105 = vector.broadcast %cst_47 : f32 to vector<2x32xf32>
    %106 = vector.extract_strided_slice %102 {offsets = [0, 0, 0], sizes = [2, 1, 128], strides = [1, 1, 1]} : vector<2x8x128xf32> to vector<2x1x128xf32>
    %107 = vector.shape_cast %106 : vector<2x1x128xf32> to vector<2x128xf32>
    %cst_48 = arith.constant dense<0.000000e+00> : vector<2x128xf32>
    %108 = tpu.matmul %104, %103, %cst_48 {dimension_numbers = #tpu.dot_dimension_numbers<[1], [0], [0], [1], [0, 0, 1, 1], [], []>} : vector<2x32xf32>, vector<32x128xf32>, vector<2x128xf32> -> vector<2x128xf32>
    %109 = arith.addf %107, %108 : vector<2x128xf32>
    %110 = vector.extract_strided_slice %109 {offsets = [0, 0], sizes = [2, 32], strides = [1, 1]} : vector<2x128xf32> to vector<2x32xf32>
    %111 = arith.negf %110 : vector<2x32xf32>
    %112 = math.exp %111 : vector<2x32xf32>
    %cst_49 = arith.constant 1.000000e+00 : f32
    %113 = vector.broadcast %cst_49 : f32 to vector<2x32xf32>
    %114 = arith.addf %113, %112 : vector<2x32xf32>
    %115 = arith.divf %113, %114 : vector<2x32xf32>
    %116 = vector.extract_strided_slice %109 {offsets = [0, 32], sizes = [2, 32], strides = [1, 1]} : vector<2x128xf32> to vector<2x32xf32>
    %117 = arith.negf %116 : vector<2x32xf32>
    %118 = math.exp %117 : vector<2x32xf32>
    %cst_50 = arith.constant 1.000000e+00 : f32
    %119 = vector.broadcast %cst_50 : f32 to vector<2x32xf32>
    %120 = arith.addf %119, %118 : vector<2x32xf32>
    %121 = arith.divf %119, %120 : vector<2x32xf32>
    %122 = vector.extract_strided_slice %109 {offsets = [0, 64], sizes = [2, 32], strides = [1, 1]} : vector<2x128xf32> to vector<2x32xf32>
    %123 = math.tanh %122 : vector<2x32xf32>
    %124 = vector.extract_strided_slice %109 {offsets = [0, 96], sizes = [2, 32], strides = [1, 1]} : vector<2x128xf32> to vector<2x32xf32>
    %125 = arith.negf %124 : vector<2x32xf32>
    %126 = math.exp %125 : vector<2x32xf32>
    %cst_51 = arith.constant 1.000000e+00 : f32
    %127 = vector.broadcast %cst_51 : f32 to vector<2x32xf32>
    %128 = arith.addf %127, %126 : vector<2x32xf32>
    %129 = arith.divf %127, %128 : vector<2x32xf32>
    %130 = arith.mulf %121, %105 : vector<2x32xf32>
    %131 = arith.mulf %115, %123 : vector<2x32xf32>
    %132 = arith.addf %130, %131 : vector<2x32xf32>
    %133 = math.tanh %132 : vector<2x32xf32>
    %134 = arith.mulf %129, %133 : vector<2x32xf32>
    %135 = vector.extract_strided_slice %102 {offsets = [0, 1, 0], sizes = [2, 1, 128], strides = [1, 1, 1]} : vector<2x8x128xf32> to vector<2x1x128xf32>
    %136 = vector.shape_cast %135 : vector<2x1x128xf32> to vector<2x128xf32>
    %cst_52 = arith.constant dense<0.000000e+00> : vector<2x128xf32>
    %137 = tpu.matmul %134, %103, %cst_52 {dimension_numbers = #tpu.dot_dimension_numbers<[1], [0], [0], [1], [0, 0, 1, 1], [], []>} : vector<2x32xf32>, vector<32x128xf32>, vector<2x128xf32> -> vector<2x128xf32>
    %138 = arith.addf %136, %137 : vector<2x128xf32>
    %139 = vector.extract_strided_slice %138 {offsets = [0, 0], sizes = [2, 32], strides = [1, 1]} : vector<2x128xf32> to vector<2x32xf32>
    %140 = arith.negf %139 : vector<2x32xf32>
    %141 = math.exp %140 : vector<2x32xf32>
    %cst_53 = arith.constant 1.000000e+00 : f32
    %142 = vector.broadcast %cst_53 : f32 to vector<2x32xf32>
    %143 = arith.addf %142, %141 : vector<2x32xf32>
    %144 = arith.divf %142, %143 : vector<2x32xf32>
    %145 = vector.extract_strided_slice %138 {offsets = [0, 32], sizes = [2, 32], strides = [1, 1]} : vector<2x128xf32> to vector<2x32xf32>
    %146 = arith.negf %145 : vector<2x32xf32>
    %147 = math.exp %146 : vector<2x32xf32>
    %cst_54 = arith.constant 1.000000e+00 : f32
    %148 = vector.broadcast %cst_54 : f32 to vector<2x32xf32>
    %149 = arith.addf %148, %147 : vector<2x32xf32>
    %150 = arith.divf %148, %149 : vector<2x32xf32>
    %151 = vector.extract_strided_slice %138 {offsets = [0, 64], sizes = [2, 32], strides = [1, 1]} : vector<2x128xf32> to vector<2x32xf32>
    %152 = math.tanh %151 : vector<2x32xf32>
    %153 = vector.extract_strided_slice %138 {offsets = [0, 96], sizes = [2, 32], strides = [1, 1]} : vector<2x128xf32> to vector<2x32xf32>
    %154 = arith.negf %153 : vector<2x32xf32>
    %155 = math.exp %154 : vector<2x32xf32>
    %cst_55 = arith.constant 1.000000e+00 : f32
    %156 = vector.broadcast %cst_55 : f32 to vector<2x32xf32>
    %157 = arith.addf %156, %155 : vector<2x32xf32>
    %158 = arith.divf %156, %157 : vector<2x32xf32>
    %159 = arith.mulf %150, %132 : vector<2x32xf32>
    %160 = arith.mulf %144, %152 : vector<2x32xf32>
    %161 = arith.addf %159, %160 : vector<2x32xf32>
    %162 = math.tanh %161 : vector<2x32xf32>
    %163 = arith.mulf %158, %162 : vector<2x32xf32>
    %164 = vector.extract_strided_slice %102 {offsets = [0, 2, 0], sizes = [2, 1, 128], strides = [1, 1, 1]} : vector<2x8x128xf32> to vector<2x1x128xf32>
    %165 = vector.shape_cast %164 : vector<2x1x128xf32> to vector<2x128xf32>
    %cst_56 = arith.constant dense<0.000000e+00> : vector<2x128xf32>
    %166 = tpu.matmul %163, %103, %cst_56 {dimension_numbers = #tpu.dot_dimension_numbers<[1], [0], [0], [1], [0, 0, 1, 1], [], []>} : vector<2x32xf32>, vector<32x128xf32>, vector<2x128xf32> -> vector<2x128xf32>
    %167 = arith.addf %165, %166 : vector<2x128xf32>
    %168 = vector.extract_strided_slice %167 {offsets = [0, 0], sizes = [2, 32], strides = [1, 1]} : vector<2x128xf32> to vector<2x32xf32>
    %169 = arith.negf %168 : vector<2x32xf32>
    %170 = math.exp %169 : vector<2x32xf32>
    %cst_57 = arith.constant 1.000000e+00 : f32
    %171 = vector.broadcast %cst_57 : f32 to vector<2x32xf32>
    %172 = arith.addf %171, %170 : vector<2x32xf32>
    %173 = arith.divf %171, %172 : vector<2x32xf32>
    %174 = vector.extract_strided_slice %167 {offsets = [0, 32], sizes = [2, 32], strides = [1, 1]} : vector<2x128xf32> to vector<2x32xf32>
    %175 = arith.negf %174 : vector<2x32xf32>
    %176 = math.exp %175 : vector<2x32xf32>
    %cst_58 = arith.constant 1.000000e+00 : f32
    %177 = vector.broadcast %cst_58 : f32 to vector<2x32xf32>
    %178 = arith.addf %177, %176 : vector<2x32xf32>
    %179 = arith.divf %177, %178 : vector<2x32xf32>
    %180 = vector.extract_strided_slice %167 {offsets = [0, 64], sizes = [2, 32], strides = [1, 1]} : vector<2x128xf32> to vector<2x32xf32>
    %181 = math.tanh %180 : vector<2x32xf32>
    %182 = vector.extract_strided_slice %167 {offsets = [0, 96], sizes = [2, 32], strides = [1, 1]} : vector<2x128xf32> to vector<2x32xf32>
    %183 = arith.negf %182 : vector<2x32xf32>
    %184 = math.exp %183 : vector<2x32xf32>
    %cst_59 = arith.constant 1.000000e+00 : f32
    %185 = vector.broadcast %cst_59 : f32 to vector<2x32xf32>
    %186 = arith.addf %185, %184 : vector<2x32xf32>
    %187 = arith.divf %185, %186 : vector<2x32xf32>
    %188 = arith.mulf %179, %161 : vector<2x32xf32>
    %189 = arith.mulf %173, %181 : vector<2x32xf32>
    %190 = arith.addf %188, %189 : vector<2x32xf32>
    %191 = math.tanh %190 : vector<2x32xf32>
    %192 = arith.mulf %187, %191 : vector<2x32xf32>
    %193 = vector.extract_strided_slice %102 {offsets = [0, 3, 0], sizes = [2, 1, 128], strides = [1, 1, 1]} : vector<2x8x128xf32> to vector<2x1x128xf32>
    %194 = vector.shape_cast %193 : vector<2x1x128xf32> to vector<2x128xf32>
    %cst_60 = arith.constant dense<0.000000e+00> : vector<2x128xf32>
    %195 = tpu.matmul %192, %103, %cst_60 {dimension_numbers = #tpu.dot_dimension_numbers<[1], [0], [0], [1], [0, 0, 1, 1], [], []>} : vector<2x32xf32>, vector<32x128xf32>, vector<2x128xf32> -> vector<2x128xf32>
    %196 = arith.addf %194, %195 : vector<2x128xf32>
    %197 = vector.extract_strided_slice %196 {offsets = [0, 0], sizes = [2, 32], strides = [1, 1]} : vector<2x128xf32> to vector<2x32xf32>
    %198 = arith.negf %197 : vector<2x32xf32>
    %199 = math.exp %198 : vector<2x32xf32>
    %cst_61 = arith.constant 1.000000e+00 : f32
    %200 = vector.broadcast %cst_61 : f32 to vector<2x32xf32>
    %201 = arith.addf %200, %199 : vector<2x32xf32>
    %202 = arith.divf %200, %201 : vector<2x32xf32>
    %203 = vector.extract_strided_slice %196 {offsets = [0, 32], sizes = [2, 32], strides = [1, 1]} : vector<2x128xf32> to vector<2x32xf32>
    %204 = arith.negf %203 : vector<2x32xf32>
    %205 = math.exp %204 : vector<2x32xf32>
    %cst_62 = arith.constant 1.000000e+00 : f32
    %206 = vector.broadcast %cst_62 : f32 to vector<2x32xf32>
    %207 = arith.addf %206, %205 : vector<2x32xf32>
    %208 = arith.divf %206, %207 : vector<2x32xf32>
    %209 = vector.extract_strided_slice %196 {offsets = [0, 64], sizes = [2, 32], strides = [1, 1]} : vector<2x128xf32> to vector<2x32xf32>
    %210 = math.tanh %209 : vector<2x32xf32>
    %211 = vector.extract_strided_slice %196 {offsets = [0, 96], sizes = [2, 32], strides = [1, 1]} : vector<2x128xf32> to vector<2x32xf32>
    %212 = arith.negf %211 : vector<2x32xf32>
    %213 = math.exp %212 : vector<2x32xf32>
    %cst_63 = arith.constant 1.000000e+00 : f32
    %214 = vector.broadcast %cst_63 : f32 to vector<2x32xf32>
    %215 = arith.addf %214, %213 : vector<2x32xf32>
    %216 = arith.divf %214, %215 : vector<2x32xf32>
    %217 = arith.mulf %208, %190 : vector<2x32xf32>
    %218 = arith.mulf %202, %210 : vector<2x32xf32>
    %219 = arith.addf %217, %218 : vector<2x32xf32>
    %220 = math.tanh %219 : vector<2x32xf32>
    %221 = arith.mulf %216, %220 : vector<2x32xf32>
    %222 = vector.extract_strided_slice %102 {offsets = [0, 4, 0], sizes = [2, 1, 128], strides = [1, 1, 1]} : vector<2x8x128xf32> to vector<2x1x128xf32>
    %223 = vector.shape_cast %222 : vector<2x1x128xf32> to vector<2x128xf32>
    %cst_64 = arith.constant dense<0.000000e+00> : vector<2x128xf32>
    %224 = tpu.matmul %221, %103, %cst_64 {dimension_numbers = #tpu.dot_dimension_numbers<[1], [0], [0], [1], [0, 0, 1, 1], [], []>} : vector<2x32xf32>, vector<32x128xf32>, vector<2x128xf32> -> vector<2x128xf32>
    %225 = arith.addf %223, %224 : vector<2x128xf32>
    %226 = vector.extract_strided_slice %225 {offsets = [0, 0], sizes = [2, 32], strides = [1, 1]} : vector<2x128xf32> to vector<2x32xf32>
    %227 = arith.negf %226 : vector<2x32xf32>
    %228 = math.exp %227 : vector<2x32xf32>
    %cst_65 = arith.constant 1.000000e+00 : f32
    %229 = vector.broadcast %cst_65 : f32 to vector<2x32xf32>
    %230 = arith.addf %229, %228 : vector<2x32xf32>
    %231 = arith.divf %229, %230 : vector<2x32xf32>
    %232 = vector.extract_strided_slice %225 {offsets = [0, 32], sizes = [2, 32], strides = [1, 1]} : vector<2x128xf32> to vector<2x32xf32>
    %233 = arith.negf %232 : vector<2x32xf32>
    %234 = math.exp %233 : vector<2x32xf32>
    %cst_66 = arith.constant 1.000000e+00 : f32
    %235 = vector.broadcast %cst_66 : f32 to vector<2x32xf32>
    %236 = arith.addf %235, %234 : vector<2x32xf32>
    %237 = arith.divf %235, %236 : vector<2x32xf32>
    %238 = vector.extract_strided_slice %225 {offsets = [0, 64], sizes = [2, 32], strides = [1, 1]} : vector<2x128xf32> to vector<2x32xf32>
    %239 = math.tanh %238 : vector<2x32xf32>
    %240 = vector.extract_strided_slice %225 {offsets = [0, 96], sizes = [2, 32], strides = [1, 1]} : vector<2x128xf32> to vector<2x32xf32>
    %241 = arith.negf %240 : vector<2x32xf32>
    %242 = math.exp %241 : vector<2x32xf32>
    %cst_67 = arith.constant 1.000000e+00 : f32
    %243 = vector.broadcast %cst_67 : f32 to vector<2x32xf32>
    %244 = arith.addf %243, %242 : vector<2x32xf32>
    %245 = arith.divf %243, %244 : vector<2x32xf32>
    %246 = arith.mulf %237, %219 : vector<2x32xf32>
    %247 = arith.mulf %231, %239 : vector<2x32xf32>
    %248 = arith.addf %246, %247 : vector<2x32xf32>
    %249 = math.tanh %248 : vector<2x32xf32>
    %250 = arith.mulf %245, %249 : vector<2x32xf32>
    %251 = vector.extract_strided_slice %102 {offsets = [0, 5, 0], sizes = [2, 1, 128], strides = [1, 1, 1]} : vector<2x8x128xf32> to vector<2x1x128xf32>
    %252 = vector.shape_cast %251 : vector<2x1x128xf32> to vector<2x128xf32>
    %cst_68 = arith.constant dense<0.000000e+00> : vector<2x128xf32>
    %253 = tpu.matmul %250, %103, %cst_68 {dimension_numbers = #tpu.dot_dimension_numbers<[1], [0], [0], [1], [0, 0, 1, 1], [], []>} : vector<2x32xf32>, vector<32x128xf32>, vector<2x128xf32> -> vector<2x128xf32>
    %254 = arith.addf %252, %253 : vector<2x128xf32>
    %255 = vector.extract_strided_slice %254 {offsets = [0, 0], sizes = [2, 32], strides = [1, 1]} : vector<2x128xf32> to vector<2x32xf32>
    %256 = arith.negf %255 : vector<2x32xf32>
    %257 = math.exp %256 : vector<2x32xf32>
    %cst_69 = arith.constant 1.000000e+00 : f32
    %258 = vector.broadcast %cst_69 : f32 to vector<2x32xf32>
    %259 = arith.addf %258, %257 : vector<2x32xf32>
    %260 = arith.divf %258, %259 : vector<2x32xf32>
    %261 = vector.extract_strided_slice %254 {offsets = [0, 32], sizes = [2, 32], strides = [1, 1]} : vector<2x128xf32> to vector<2x32xf32>
    %262 = arith.negf %261 : vector<2x32xf32>
    %263 = math.exp %262 : vector<2x32xf32>
    %cst_70 = arith.constant 1.000000e+00 : f32
    %264 = vector.broadcast %cst_70 : f32 to vector<2x32xf32>
    %265 = arith.addf %264, %263 : vector<2x32xf32>
    %266 = arith.divf %264, %265 : vector<2x32xf32>
    %267 = vector.extract_strided_slice %254 {offsets = [0, 64], sizes = [2, 32], strides = [1, 1]} : vector<2x128xf32> to vector<2x32xf32>
    %268 = math.tanh %267 : vector<2x32xf32>
    %269 = vector.extract_strided_slice %254 {offsets = [0, 96], sizes = [2, 32], strides = [1, 1]} : vector<2x128xf32> to vector<2x32xf32>
    %270 = arith.negf %269 : vector<2x32xf32>
    %271 = math.exp %270 : vector<2x32xf32>
    %cst_71 = arith.constant 1.000000e+00 : f32
    %272 = vector.broadcast %cst_71 : f32 to vector<2x32xf32>
    %273 = arith.addf %272, %271 : vector<2x32xf32>
    %274 = arith.divf %272, %273 : vector<2x32xf32>
    %275 = arith.mulf %266, %248 : vector<2x32xf32>
    %276 = arith.mulf %260, %268 : vector<2x32xf32>
    %277 = arith.addf %275, %276 : vector<2x32xf32>
    %278 = math.tanh %277 : vector<2x32xf32>
    %279 = arith.mulf %274, %278 : vector<2x32xf32>
    %280 = vector.extract_strided_slice %102 {offsets = [0, 6, 0], sizes = [2, 1, 128], strides = [1, 1, 1]} : vector<2x8x128xf32> to vector<2x1x128xf32>
    %281 = vector.shape_cast %280 : vector<2x1x128xf32> to vector<2x128xf32>
    %cst_72 = arith.constant dense<0.000000e+00> : vector<2x128xf32>
    %282 = tpu.matmul %279, %103, %cst_72 {dimension_numbers = #tpu.dot_dimension_numbers<[1], [0], [0], [1], [0, 0, 1, 1], [], []>} : vector<2x32xf32>, vector<32x128xf32>, vector<2x128xf32> -> vector<2x128xf32>
    %283 = arith.addf %281, %282 : vector<2x128xf32>
    %284 = vector.extract_strided_slice %283 {offsets = [0, 0], sizes = [2, 32], strides = [1, 1]} : vector<2x128xf32> to vector<2x32xf32>
    %285 = arith.negf %284 : vector<2x32xf32>
    %286 = math.exp %285 : vector<2x32xf32>
    %cst_73 = arith.constant 1.000000e+00 : f32
    %287 = vector.broadcast %cst_73 : f32 to vector<2x32xf32>
    %288 = arith.addf %287, %286 : vector<2x32xf32>
    %289 = arith.divf %287, %288 : vector<2x32xf32>
    %290 = vector.extract_strided_slice %283 {offsets = [0, 32], sizes = [2, 32], strides = [1, 1]} : vector<2x128xf32> to vector<2x32xf32>
    %291 = arith.negf %290 : vector<2x32xf32>
    %292 = math.exp %291 : vector<2x32xf32>
    %cst_74 = arith.constant 1.000000e+00 : f32
    %293 = vector.broadcast %cst_74 : f32 to vector<2x32xf32>
    %294 = arith.addf %293, %292 : vector<2x32xf32>
    %295 = arith.divf %293, %294 : vector<2x32xf32>
    %296 = vector.extract_strided_slice %283 {offsets = [0, 64], sizes = [2, 32], strides = [1, 1]} : vector<2x128xf32> to vector<2x32xf32>
    %297 = math.tanh %296 : vector<2x32xf32>
    %298 = vector.extract_strided_slice %283 {offsets = [0, 96], sizes = [2, 32], strides = [1, 1]} : vector<2x128xf32> to vector<2x32xf32>
    %299 = arith.negf %298 : vector<2x32xf32>
    %300 = math.exp %299 : vector<2x32xf32>
    %cst_75 = arith.constant 1.000000e+00 : f32
    %301 = vector.broadcast %cst_75 : f32 to vector<2x32xf32>
    %302 = arith.addf %301, %300 : vector<2x32xf32>
    %303 = arith.divf %301, %302 : vector<2x32xf32>
    %304 = arith.mulf %295, %277 : vector<2x32xf32>
    %305 = arith.mulf %289, %297 : vector<2x32xf32>
    %306 = arith.addf %304, %305 : vector<2x32xf32>
    %307 = math.tanh %306 : vector<2x32xf32>
    %308 = arith.mulf %303, %307 : vector<2x32xf32>
    %309 = vector.extract_strided_slice %102 {offsets = [0, 7, 0], sizes = [2, 1, 128], strides = [1, 1, 1]} : vector<2x8x128xf32> to vector<2x1x128xf32>
    %310 = vector.shape_cast %309 : vector<2x1x128xf32> to vector<2x128xf32>
    %cst_76 = arith.constant dense<0.000000e+00> : vector<2x128xf32>
    %311 = tpu.matmul %308, %103, %cst_76 {dimension_numbers = #tpu.dot_dimension_numbers<[1], [0], [0], [1], [0, 0, 1, 1], [], []>} : vector<2x32xf32>, vector<32x128xf32>, vector<2x128xf32> -> vector<2x128xf32>
    %312 = arith.addf %310, %311 : vector<2x128xf32>
    %313 = vector.extract_strided_slice %312 {offsets = [0, 0], sizes = [2, 32], strides = [1, 1]} : vector<2x128xf32> to vector<2x32xf32>
    %314 = arith.negf %313 : vector<2x32xf32>
    %315 = math.exp %314 : vector<2x32xf32>
    %cst_77 = arith.constant 1.000000e+00 : f32
    %316 = vector.broadcast %cst_77 : f32 to vector<2x32xf32>
    %317 = arith.addf %316, %315 : vector<2x32xf32>
    %318 = arith.divf %316, %317 : vector<2x32xf32>
    %319 = vector.extract_strided_slice %312 {offsets = [0, 32], sizes = [2, 32], strides = [1, 1]} : vector<2x128xf32> to vector<2x32xf32>
    %320 = arith.negf %319 : vector<2x32xf32>
    %321 = math.exp %320 : vector<2x32xf32>
    %cst_78 = arith.constant 1.000000e+00 : f32
    %322 = vector.broadcast %cst_78 : f32 to vector<2x32xf32>
    %323 = arith.addf %322, %321 : vector<2x32xf32>
    %324 = arith.divf %322, %323 : vector<2x32xf32>
    %325 = vector.extract_strided_slice %312 {offsets = [0, 64], sizes = [2, 32], strides = [1, 1]} : vector<2x128xf32> to vector<2x32xf32>
    %326 = math.tanh %325 : vector<2x32xf32>
    %327 = vector.extract_strided_slice %312 {offsets = [0, 96], sizes = [2, 32], strides = [1, 1]} : vector<2x128xf32> to vector<2x32xf32>
    %328 = arith.negf %327 : vector<2x32xf32>
    %329 = math.exp %328 : vector<2x32xf32>
    %cst_79 = arith.constant 1.000000e+00 : f32
    %330 = vector.broadcast %cst_79 : f32 to vector<2x32xf32>
    %331 = arith.addf %330, %329 : vector<2x32xf32>
    %332 = arith.divf %330, %331 : vector<2x32xf32>
    %333 = arith.mulf %324, %306 : vector<2x32xf32>
    %334 = arith.mulf %318, %326 : vector<2x32xf32>
    %335 = arith.addf %333, %334 : vector<2x32xf32>
    %336 = math.tanh %335 : vector<2x32xf32>
    %337 = arith.mulf %332, %336 : vector<2x32xf32>
    %338 = tpu.concatenate %134, %163, %192, %221, %250, %279, %308, %337 in 1 : vector<2x32xf32>, vector<2x32xf32>, vector<2x32xf32>, vector<2x32xf32>, vector<2x32xf32>, vector<2x32xf32>, vector<2x32xf32>, vector<2x32xf32> -> vector<2x256xf32>
    %c0_80 = arith.constant 0 : index
    %c0_81 = arith.constant 0 : index
    %339 = vector.load %arg13[%c0_80, %c0_81] : memref<256x64xf32, #tpu.memory_space<vmem>>, vector<256x64xf32>
    %cst_82 = arith.constant dense<0.000000e+00> : vector<2x64xf32>
    %340 = tpu.matmul %338, %339, %cst_82 {dimension_numbers = #tpu.dot_dimension_numbers<[1], [0], [0], [1], [0, 0, 1, 1], [], []>} : vector<2x256xf32>, vector<256x64xf32>, vector<2x64xf32> -> vector<2x64xf32>
    %c0_83 = arith.constant 0 : index
    %c0_84 = arith.constant 0 : index
    %341 = vector.load %arg14[%c0_83, %c0_84] : memref<1x64xf32, #tpu.memory_space<vmem>>, vector<1x64xf32>
    %342 = vector.broadcast %341 : vector<1x64xf32> to vector<2x64xf32>
    %343 = arith.addf %340, %342 : vector<2x64xf32>
    %cst_85 = arith.constant 0.000000e+00 : f32
    %344 = vector.broadcast %cst_85 : f32 to vector<2x64xf32>
    %345 = arith.maximumf %343, %344 : vector<2x64xf32>
    %c0_86 = arith.constant 0 : index
    %c0_87 = arith.constant 0 : index
    %346 = vector.load %arg15[%c0_86, %c0_87] : memref<64x32xf32, #tpu.memory_space<vmem>>, vector<64x32xf32>
    %cst_88 = arith.constant dense<0.000000e+00> : vector<2x32xf32>
    %347 = tpu.matmul %345, %346, %cst_88 {dimension_numbers = #tpu.dot_dimension_numbers<[1], [0], [0], [1], [0, 0, 1, 1], [], []>} : vector<2x64xf32>, vector<64x32xf32>, vector<2x32xf32> -> vector<2x32xf32>
    %c0_89 = arith.constant 0 : index
    %c0_90 = arith.constant 0 : index
    %348 = vector.load %arg16[%c0_89, %c0_90] : memref<1x32xf32, #tpu.memory_space<vmem>>, vector<1x32xf32>
    %349 = vector.broadcast %348 : vector<1x32xf32> to vector<2x32xf32>
    %350 = arith.addf %347, %349 : vector<2x32xf32>
    %c0_91 = arith.constant 0 : index
    %c0_92 = arith.constant 0 : index
    %351 = vector.load %arg17[%c0_91, %c0_92] : memref<2x32xf32, #tpu.memory_space<vmem>>, vector<2x32xf32>
    tpu.vector_store %arg17[%c0_91, %c0_92], %350 {strides = array<i32>} : memref<2x32xf32, #tpu.memory_space<vmem>>, vector<2x32xf32>,
    return
  }
  func.func @transform_0(%arg0: i32) -> (i32, i32, i32) {
    %c0_i32 = arith.constant 0 : i32
    %c0_i32_0 = arith.constant 0 : i32
    %c0_i32_1 = arith.constant 0 : i32
    return %arg0, %c0_i32, %c0_i32_0 : i32, i32, i32
  }
  func.func @transform_1(%arg0: i32) -> (i32, i32) {
    %c0_i32 = arith.constant 0 : i32
    %c0_i32_0 = arith.constant 0 : i32
    %c0_i32_1 = arith.constant 0 : i32
    return %c0_i32, %c0_i32_0 : i32, i32
  }
  func.func @transform_2(%arg0: i32) -> (i32, i32) {
    %c0_i32 = arith.constant 0 : i32
    %c0_i32_0 = arith.constant 0 : i32
    %c0_i32_1 = arith.constant 0 : i32
    return %c0_i32, %c0_i32_0 : i32, i32
  }
  func.func @transform_3(%arg0: i32) -> (i32, i32) {
    %c0_i32 = arith.constant 0 : i32
    %c0_i32_0 = arith.constant 0 : i32
    %c0_i32_1 = arith.constant 0 : i32
    return %c0_i32, %c0_i32_0 : i32, i32
  }
  func.func @transform_4(%arg0: i32) -> (i32, i32) {
    %c0_i32 = arith.constant 0 : i32
    %c0_i32_0 = arith.constant 0 : i32
    %c0_i32_1 = arith.constant 0 : i32
    return %c0_i32, %c0_i32_0 : i32, i32
  }
  func.func @transform_5(%arg0: i32) -> (i32, i32) {
    %c0_i32 = arith.constant 0 : i32
    %c0_i32_0 = arith.constant 0 : i32
    %c0_i32_1 = arith.constant 0 : i32
    return %c0_i32, %c0_i32_0 : i32, i32
  }
  func.func @transform_6(%arg0: i32) -> (i32, i32) {
    %c0_i32 = arith.constant 0 : i32
    %c0_i32_0 = arith.constant 0 : i32
    %c0_i32_1 = arith.constant 0 : i32
    return %c0_i32, %c0_i32_0 : i32, i32
  }
  func.func @transform_7(%arg0: i32) -> (i32, i32) {
    %c0_i32 = arith.constant 0 : i32
    %c0_i32_0 = arith.constant 0 : i32
    %c0_i32_1 = arith.constant 0 : i32
    return %c0_i32, %c0_i32_0 : i32, i32
  }
  func.func @transform_8(%arg0: i32) -> (i32, i32) {
    %c0_i32 = arith.constant 0 : i32
    %c0_i32_0 = arith.constant 0 : i32
    %c0_i32_1 = arith.constant 0 : i32
    return %c0_i32, %c0_i32_0 : i32, i32
  }
  func.func @transform_9(%arg0: i32) -> (i32, i32) {
    %c0_i32 = arith.constant 0 : i32
    %c0_i32_0 = arith.constant 0 : i32
    %c0_i32_1 = arith.constant 0 : i32
    return %c0_i32, %c0_i32_0 : i32, i32
  }
  func.func @transform_10(%arg0: i32) -> (i32, i32) {
    %c0_i32 = arith.constant 0 : i32
    %c0_i32_0 = arith.constant 0 : i32
    %c0_i32_1 = arith.constant 0 : i32
    return %c0_i32, %c0_i32_0 : i32, i32
  }
  func.func @transform_11(%arg0: i32) -> (i32, i32) {
    %c0_i32 = arith.constant 0 : i32
    %c0_i32_0 = arith.constant 0 : i32
    %c0_i32_1 = arith.constant 0 : i32
    return %c0_i32, %c0_i32_0 : i32, i32
  }
  func.func @transform_12(%arg0: i32) -> (i32, i32) {
    %c0_i32 = arith.constant 0 : i32
    %c0_i32_0 = arith.constant 0 : i32
    %c0_i32_1 = arith.constant 0 : i32
    return %c0_i32, %c0_i32_0 : i32, i32
  }
  func.func @transform_13(%arg0: i32) -> (i32, i32) {
    %c0_i32 = arith.constant 0 : i32
    %c0_i32_0 = arith.constant 0 : i32
    %c0_i32_1 = arith.constant 0 : i32
    return %c0_i32, %c0_i32_0 : i32, i32
  }
  func.func @transform_14(%arg0: i32) -> (i32, i32) {
    %c0_i32 = arith.constant 0 : i32
    %c0_i32_0 = arith.constant 0 : i32
    %c0_i32_1 = arith.constant 0 : i32
    return %c0_i32, %c0_i32_0 : i32, i32
  }
  func.func @transform_15(%arg0: i32) -> (i32, i32) {
    %c0_i32 = arith.constant 0 : i32
    %c0_i32_0 = arith.constant 0 : i32
    %c0_i32_1 = arith.constant 0 : i32
    return %c0_i32, %c0_i32_0 : i32, i32
  }
  func.func @transform_16(%arg0: i32) -> (i32, i32) {
    %c0_i32 = arith.constant 0 : i32
    %c0_i32_0 = arith.constant 0 : i32
    return %arg0, %c0_i32 : i32, i32
  }
}

</mosaic_0001>

<bundles_post_ra>
// kernel: tpu_custom_call.1
= control target key start
LH: loop header
LB: loop body
LE: loop exit
PB: predicated region body
PF: predicated region fallthrough
CT: control target
= control target key end

     0   :  { %s2602_s0 = inlined_call_operand.vmem [shape: f32[2,8,4], index: 0, kind: input, shape index: {}]   ;;  %s2603_s1 = inlined_call_operand.vmem [shape: f32[12,16], index: 1, kind: input, shape index: {}]   ;;  %s2604_s2 = inlined_call_operand.vmem [shape: f32[1,16], index: 2, kind: input, shape index: {}]   ;;  %s2605_s3 = inlined_call_operand.vmem [shape: f32[48,32], index: 3, kind: input, shape index: {}]   ;;  %s2606_s4 = inlined_call_operand.vmem [shape: f32[1,32], index: 4, kind: input, shape index: {}]   ;;  %s2607_s5 = inlined_call_operand.vmem [shape: f32[32,96], index: 5, kind: input, shape index: {}]   ;;  %s2608_s6 = inlined_call_operand.vmem [shape: f32[1,96], index: 6, kind: input, shape index: {}]   ;;  %s2609_s7 = inlined_call_operand.vmem [shape: f32[32,32], index: 7, kind: input, shape index: {}]   ;;  %s2610_s8 = inlined_call_operand.vmem [shape: f32[1,32], index: 8, kind: input, shape index: {}]   ;;  %s2611_s9 = inlined_call_operand.vmem [shape: f32[32,128], index: 9, kind: input, shape index: {}]   ;;  %s2612_s10 = inlined_call_operand.vmem [shape: f32[32,128], index: 10, kind: input, shape index: {}]   ;;  %s2613_s11 = inlined_call_operand.vmem [shape: f32[1,128], index: 11, kind: input, shape index: {}]   ;;  %s2614_s12 = inlined_call_operand.vmem [shape: f32[256,64], index: 12, kind: input, shape index: {}]   ;;  %s2615_s13 = inlined_call_operand.vmem [shape: f32[1,64], index: 13, kind: input, shape index: {}]   ;;  %s2616_s14 = inlined_call_operand.vmem [shape: f32[64,32], index: 14, kind: input, shape index: {}]   ;;  %s2617_s15 = inlined_call_operand.vmem [shape: f32[1,32], index: 15, kind: input, shape index: {}]   ;;  %s2618_s16 = inlined_call_operand.hbm [shape: f32[2,32], index: 16, kind: output, shape index: {}]  }
   0x1   :  { %2620 = sst [smem:[#allocation5_spill]] %s2602_s0 }
   0x2   :  { %s2621_s23 = sld [smem:[#allocation5_spill]]  ;;  %v56_v2 = vlaneseq  ;;  %s1952_s26 = smov 4  }
   0x4   :  { %v57_v5 = vshrl.u32 %v56_v2, 7 }
   0x6   :  { %v63_v6 = vand.u32 7, %v57_v5  ;;  %vm100_vm0 = vcmp.lt.s32.totalorder %v57_v5, 7  ;;  %v58_v7 = vadd.s32 8, %v57_v5 }
   0x8   :  { %v54_v0 = vld [vmem:[%s2621_s23] sm:$0xff]  ;;  %v55_v1 = vld [vmem:[%s2621_s23 + $0x8] sm:$0xff] }
   0x9   :  { %111 = vrot.lane.b32.xlu0 %v54_v0, %s1952_s26  ;;  %v98_v3 = vrot.slane %v54_v0, 1  ;;  %113 = vrot.lane.b32.xlu1 %v55_v1, %s1952_s26  ;;  %v99_v4 = vrot.slane %v55_v1, 1 }
   0xb   :  { %v101_v8 = vsel %vm100_vm0, %v98_v3, %v99_v4 }
   0xc   :  { %21 = vsyncpa [#allocation3], 0  ;;  %vm2053_vm1 = vcmp.le.s32.totalorder %v63_v6, 6  ;;  %v70_v10 = vand.u32 7, %v58_v7  ;;  %v102_v11 = vsel %vm100_vm0, %v99_v4, %v98_v3  ;;  %s1953_s27 = smov 8   ;;  %v87_v15 = vrot.slane %v54_v0, 7 }
   0xd   :  { %v107_v12 = vsel %vm2053_vm1, %v101_v8, 0.0  ;;  %v88_v16 = vrot.slane %v55_v1, 7  ;;  %vm89_vm3 = vcmp.lt.s32.totalorder %v57_v5, 1  ;;  %v132_v19 = vld [vmem:[%s2603_s1 + $0x8] sm:$0xf]  ;;  %vm144_vm4 = vcmask 1043456  }
   0xe   :  { %vm2060_vm2 = vcmp.le.s32.totalorder %v70_v10, 6  ;;  %1714 = vmatpush.msk.msra.mxu3 %vm144_vm4, %v132_v19  ;;  %v131_v20 = vld [vmem:[%s2603_s1] sm:$0xff]  ;;  %vm2074_vm5 = vcmp.ge.s32.totalorder %v63_v6, 1  ;;  %vm125_vm6 = vcmask 31744   ;;  %vm128_vm7 = vcmask 64512   ;;  %s1954_s18 = smov 16  }
   0xf   :  { %v108_v14 = vsel %vm2060_vm2, %v102_v11, 0.0  ;;  %v91_v17 = vsel %vm89_vm3, %v88_v16, %v87_v15  ;;  %v90_v18 = vsel %vm89_vm3, %v87_v15, %v88_v16  ;;  %vm137_vm8 = vcmask 97280   ;;  %v1775_v33 = vld [vmem:[%s2604_s2] ss:$0 sm:$0xff]  ;;  %s1955_s2 = smov 32   ;;  %v212_v50 = vld [vmem:[%s2605_s3 + $0x28] sm:$0xff] }
  0x10   :  { %163 = vmatpush.msra.mxu3 %v131_v20  ;;  %v96_v24 = vsel %vm2074_vm5, %v91_v17, 0.0  ;;  %vm2080_vm9 = vcmp.ge.s32.totalorder %v70_v10, 1  ;;  %v211_v51 = vld [vmem:[%s2605_s3 + $0x20] sm:$0xff]  ;;  %234 = vmatpush.msra.mxu1 %v212_v50  ;;  %v210_v52 = vld [vmem:[%s2605_s3 + $0x18] sm:$0xff]  ;;  %v209_v53 = vld [vmem:[%s2605_s3 + $0x10] sm:$0xff]  ;;  %vm201_vm10 = vcmask 130048  }
  0x11   :  { %119 = vrot.lane.b32.xlu0 %v107_v12, %s1953_s27  ;;  %121 = vrot.lane.b32.xlu1 %v108_v14, %s1953_s27  ;;  %v97_v29 = vsel %vm2080_vm9, %v90_v18, 0.0  ;;  %v208_v54 = vld [vmem:[%s2605_s3 + $0x8] sm:$0xff]  ;;  %v207_v55 = vld [vmem:[%s2605_s3] sm:$0xff]  ;;  %vm204_vm11 = vcmask 261120   ;;  %vm217_vm12 = vcmask 392192   ;;  %s1960_s23 = smov [#allocation2]  }
  0x12   :  { %235 = vmatpush.msra.mxu1 %v211_v51  ;;  %v252_v57 = vld [vmem:[%s2607_s5 + $0x18] sm:$0xff]  ;;  %v251_v3 = vld [vmem:[%s2607_s5 + $0x10] sm:$0xff]  ;;  %v250_v4 = vld [vmem:[%s2607_s5 + $0x8] sm:$0xff]  ;;  %s1703_s24 = sshll.u32 %s1960_s23, 4  ;;  %s1704_s24 = int_to_ptr.vmem [resolvable:$true] %s1703_s24 }
  0x13   :  { %275 = vmatpush.msra.mxu2 %v252_v57  ;;  %v249_v5 = vld [vmem:[%s2607_s5] sm:$0xff]  ;;  %s1956_s5 = smov 96  }
  0x14   :  { %236 = vmatpush.msra.mxu1 %v210_v52  ;;  %v1776_v6 = vld [vmem:[%s2606_s4] ss:$0 sm:$0xff]  ;;  %s1957_s4 = smov 112  }
  0x15   :  { %276 = vmatpush.msra.mxu2 %v251_v3  ;;  %v1777_v13 = vld [vmem:[%s2608_s6] ss:$0 sm:$0xff]  ;;  %s1958_s6 = smov 64  }
  0x16   :  { %237 = vmatpush.msra.mxu1 %v209_v53 }
  0x17   :  { %277 = vmatpush.msra.mxu2 %v250_v4 }
  0x18   :  { %238 = vmatpush.msra.mxu1 %v208_v54 }
  0x19   :  { %278 = vmatpush.msra.mxu2 %v249_v5 }
  0x1a   :  { %239 = vmatpush.msra.mxu1 %v207_v55 }
  0x7b   :  { %v112_v21 = vpop.permute.xlu0 %111  ;;  %v114_v23 = vpop.permute.xlu1 %113 }
  0x7c   :  { %v126_v25 = vsel %vm125_vm6, %v96_v24, %v112_v21  ;;  %v127_v30 = vsel %vm125_vm6, %v97_v29, %v114_v23 }
  0x83   :  { %v120_v27 = vpop.permute.xlu0 %119  ;;  %v122_v31 = vpop.permute.xlu1 %121 }
  0x84   :  { %v129_v28 = vsel %vm128_vm7, %v126_v25, %v120_v27  ;;  %v130_v32 = vsel %vm128_vm7, %v127_v30, %v122_v31 }
  0x85   :  { %1715 = vmatmul.msk.f32.vlgmr.msra.gmra.mxu3 %vm137_vm8, %v129_v28 }
  0x8d   :  { %1716 = vmatmul.msk.f32.gmra.mxu3 %vm137_vm8, %v130_v32 }
 0x108   :  { %v165_v34 = vpop.f32.mrf.mxu3 }
 0x109   :  { %v166_v35 = vadd.f32 %v1775_v33, %v165_v34 }
 0x10b   :  { %v171_v36 = vmax.f32 %v166_v35, 0.0 }
 0x10d   :  { %187 = vrot.lane.b32.xlu2 %v171_v36, %s1954_s18  ;;  %v173_v40 = vrot.slane %v171_v36, 7  ;;  %v179_v41 = vrot.slane %v171_v36, 1 }
 0x110   :  { %v168_v37 = vpop.f32.mrf.mxu3 }
 0x111   :  { %v169_v38 = vadd.f32 %v1775_v33, %v168_v37 }
 0x113   :  { %v172_v39 = vmax.f32 %v169_v38, 0.0 }
 0x115   :  { %v174_v42 = vrot.slane %v172_v39, 7  ;;  %v180_v43 = vrot.slane %v172_v39, 1  ;;  %189 = vrot.lane.b32.xlu0 %v172_v39, %s1954_s18 }
 0x117   :  { %v182_v44 = vsel %vm100_vm0, %v180_v43, %v179_v41  ;;  %v181_v45 = vsel %vm100_vm0, %v179_v41, %v180_v43  ;;  %v176_v46 = vsel %vm89_vm3, %v174_v42, %v173_v40  ;;  %v175_v47 = vsel %vm89_vm3, %v173_v40, %v174_v42 }
 0x118   :  { %v184_v48 = vsel %vm2060_vm2, %v182_v44, 0.0  ;;  %v183_v49 = vsel %vm2053_vm1, %v181_v45, 0.0  ;;  %v177_v58 = vsel %vm2074_vm5, %v176_v46, 0.0  ;;  %v178_v63 = vsel %vm2080_vm9, %v175_v47, 0.0 }
 0x119   :  { %197 = vrot.lane.b32.xlu1 %v184_v48, %s1955_s2  ;;  %195 = vrot.lane.b32.xlu2 %v183_v49, %s1955_s2  ;;  %vm748_vm5 = vcmask 1041409  }
 0x167   :  { %v188_v56 = vpop.permute.xlu2 %187 }
 0x168   :  { %v202_v59 = vsel %vm201_vm10, %v177_v58, %v188_v56 }
 0x173   :  { %v196_v60 = vpop.permute.xlu2 %195 }
 0x174   :  { %v205_v61 = vsel %vm204_vm11, %v202_v59, %v196_v60 }
 0x175   :  { %1717 = vmatmul.msk.f32.vlgmr.msra.gmra.mxu1 %vm217_vm12, %v205_v61 }
 0x187   :  { %v190_v62 = vpop.permute.xlu0 %189 }
 0x188   :  { %v203_v0 = vsel %vm201_vm10, %v178_v63, %v190_v62 }
 0x18b   :  { %v198_v1 = vpop.permute.xlu1 %197 }
 0x18c   :  { %v206_v2 = vsel %vm204_vm11, %v203_v0, %v198_v1 }
 0x18d   :  { %1718 = vmatmul.msk.f32.gmra.mxu1 %vm217_vm12, %v206_v2 }
 0x1f2   :  { %v241_v7 = vpop.f32.mrf.mxu1 }
 0x1f3   :  { %v242_v8 = vadd.f32 %v1776_v6, %v241_v7 }
 0x1f5   :  { %v247_v9 = vmax.f32 %v242_v8, 0.0 }
 0x1f7   :  { %1719 = vmatmul.msk.f32.vlgmr.msra.gmra.mxu2 %vm204_vm11, %v247_v9 }
 0x20a   :  { %v244_v10 = vpop.f32.mrf.mxu1 }
 0x20b   :  { %v245_v11 = vadd.f32 %v1776_v6, %v244_v10  ;;  %v567_v10 = vld [vmem:[%s2609_s7 + $0x18] sm:$0xff] }
 0x20c   :  { %590 = vmatpush.msrb.mxu2 %v567_v10 }
 0x20d   :  { %v248_v12 = vmax.f32 %v245_v11, 0.0  ;;  %v566_v11 = vld [vmem:[%s2609_s7 + $0x10] sm:$0xff] }
 0x20e   :  { %591 = vmatpush.msrb.mxu2 %v566_v11 }
 0x20f   :  { %1720 = vmatmul.msk.f32.gmra.mxu2 %vm204_vm11, %v248_v12  ;;  %v565_v12 = vld [vmem:[%s2609_s7 + $0x8] sm:$0xff] }
 0x210   :  { %592 = vmatpush.msrb.mxu2 %v565_v12 }
 0x27a   :  { %v280_v14 = vpop.f32.mrf.mxu2 }
 0x27b   :  { %v2149_v15 = vadd.f32 %v1777_v13, %v280_v14 }
 0x27d   :  { %298 = vrot.lane.b32.xlu1 %v2149_v15, %s1956_s5  ;;  %288 = vrot.lane.b32.xlu0 %v2149_v15, %s1957_s4  ;;  %v294_v21 = vmul.f32 0.25, %v2149_v15 }
 0x292   :  { %v283_v16 = vpop.f32.mrf.mxu2 }
 0x293   :  { %v2154_v17 = vadd.f32 %v1777_v13, %v283_v16  ;;  %v604_v16 = vld [vmem:[%s2611_s9 + $0x18] sm:$0xff] }
 0x295   :  { %290 = vrot.lane.b32.xlu2 %v2154_v17, %s1957_s4  ;;  %v295_v23 = vmul.f32 0.25, %v2154_v17 }
 0x29d   :  { %325 = vrot.lane.b32.xlu2 %v2154_v17, %s1956_s5 }
 0x2ef   :  { %v299_v18 = vpop.permute.xlu1 %298  ;;  %v289_v19 = vpop.permute.xlu0 %288 }
 0x2f0   :  { %v291_v20 = vpop.permute.xlu2 %290  ;;  %1721 = vmatpush.xpose.msk.msrb.mxu3 %vm201_vm10, %v299_v18  ;;  %352 = vrot.lane.b32.xlu1 %v289_v19, %s1956_s5  ;;  %v296_v26 = vmul.f32 0.25, %v289_v19  ;;  %v2211_v18 = vld [vmem:[%s2612_s10 + $0x18] sm:$0xff] }
 0x2f1   :  { %379 = vrot.lane.b32.xlu0 %v291_v20, %s1956_s5  ;;  %v297_v27 = vmul.f32 0.25, %v291_v20  ;;  %v1770_v30 = vpack.i.bf16 %v291_v20, %v289_v19 }
 0x2f3   :  { %1722 = vmatmul.msk.f32.vlgmr.msrb.gmra.mxu3 %vm201_vm10, %v294_v21 }
 0x2f8   :  { %v326_v22 = vpop.permute.xlu2 %325 }
 0x2f9   :  { %1723 = vmatpush.xpose.msk.msra.mxu3 %vm201_vm10, %v326_v22 }
 0x2fc   :  { %1724 = vmatmul.msk.f32.vlgmr.msra.gmra.mxu3 %vm201_vm10, %v295_v23 }
 0x362   :  { %v353_v24 = vpop.permute.xlu1 %352 }
 0x363   :  { %v380_v25 = vpop.permute.xlu0 %379  ;;  %1725 = vmatpush.xpose.msk.msra.mxu0 %vm201_vm10, %v353_v24 }
 0x364   :  { %1727 = vmatpush.xpose.msk.msrb.mxu3 %vm201_vm10, %v380_v25  ;;  %v602_v25 = vld [vmem:[%s2611_s9 + $0x8] sm:$0xff] }
 0x366   :  { %1726 = vmatmul.msk.f32.vlgmr.msra.gmra.mxu0 %vm201_vm10, %v296_v26  ;;  %v2226_v26 = vld [vmem:[%s2612_s10 + $0x10] sm:$0xff] }
 0x367   :  { %1728 = vmatmul.msk.f32.vlgmr.msrb.gmra.mxu3 %vm201_vm10, %v297_v27  ;;  %v601_v27 = vld [vmem:[%s2611_s9] sm:$0xff] }
 0x376   :  { %v322_v28 = vpop.f32.mrf.mxu3 }
 0x377   :  { %v406_v29 = vsel %vm128_vm7, %v322_v28, -inf }
 0x378   :  { %407 = vmax.xlane.f32.xlu1 %v406_v29  ;;  %v2243_v29 = vld [vmem:[%s2612_s10] sm:$0xff] }
 0x37f   :  { %v349_v31 = vpop.f32.mrf.mxu3 }
 0x380   :  { %v409_v36 = vsel %vm128_vm7, %v349_v31, -inf }
 0x391   :  { %1771 = vrot.lane.b32.xlu1 %v1770_v30, %s1958_s6  ;;  %v1959_v30 = vmov 0.0  }
 0x3e3   :  { %v376_v32 = vpop.f32.mrf.mxu0 }
 0x3e4   :  { %v412_v33 = vsel %vm128_vm7, %v376_v32, -inf }
 0x3e5   :  { %413 = vmax.xlane.f32.xlu2 %v412_v33 }
 0x3ea   :  { %v403_v34 = vpop.f32.mrf.mxu3 }
 0x3eb   :  { %v415_v35 = vsel %vm128_vm7, %v403_v34, -inf  ;;  %v408_v37 = vpop.xlane.xlu1 %407 }
 0x3ec   :  { %416 = vmax.xlane.f32.xlu0 %v415_v35  ;;  %v418_v43 = vsub.f32 %v322_v28, %v408_v37  ;;  %v2235_v28 = vld [vmem:[%s2612_s10 + $0x8] sm:$0xff] }
 0x3ed   :  { %410 = vmax.xlane.f32.xlu2 %v409_v36  ;;  %v1779_v36 = vld [vmem:[%s2613_s11] ss:$0 sm:$0xff] }
 0x3ee   :  { %v422_v45 = vmul.f32 1.442695, %v418_v43 }
 0x403   :  { %v1772_v38 = vpop.permute.xlu1 %1771 }
 0x404   :  { %v1774_v39 = vunpack.i.h.bf16 %v1772_v38  ;;  %v1773_v40 = vunpack.i.l.bf16 %v1772_v38 }
 0x406   :  { %523 = vmatpush.msrb.mxu1 %v1773_v40  ;;  %549 = vmatpush.msra.mxu3 %v1774_v39 }
 0x408   :  { %657 = vmatpush.msra.mxu1 %v2211_v18  ;;  %766 = vmatpush.msrb.mxu3 %v2211_v18 }
 0x40a   :  { %658 = vmatpush.msra.mxu1 %v2226_v26  ;;  %767 = vmatpush.msrb.mxu3 %v2226_v26 }
 0x40c   :  { %659 = vmatpush.msra.mxu1 %v2235_v28  ;;  %768 = vmatpush.msrb.mxu3 %v2235_v28 }
 0x40e   :  { %660 = vmatpush.msra.mxu1 %v2243_v29  ;;  %769 = vmatpush.msrb.mxu3 %v2243_v29 }
 0x458   :  { %v414_v41 = vpop.xlane.xlu2 %413 }
 0x459   :  { %v420_v42 = vsub.f32 %v376_v32, %v414_v41 }
 0x45b   :  { %v426_v44 = vmul.f32 1.442695, %v420_v42 }
 0x45d   :  { %1782 = vpow2.f32 %v426_v44 }
 0x45e   :  { %1784 = vpow2.f32 %v422_v45 }
 0x45f   :  { %v417_v46 = vpop.xlane.xlu0 %416 }
 0x460   :  { %v421_v47 = vsub.f32 %v403_v34, %v417_v46  ;;  %v411_v48 = vpop.xlane.xlu2 %410 }
 0x461   :  { %v419_v50 = vsub.f32 %v349_v31, %v411_v48  ;;  %v1778_v31 = vld [vmem:[%s2610_s8] ss:$0 sm:$0xff] }
 0x462   :  { %v428_v49 = vmul.f32 1.442695, %v421_v47 }
 0x463   :  { %v1783_v51 = vpop.eup %1782  ;;  %v424_v53 = vmul.f32 1.442695, %v419_v50 }
 0x464   :  { %1786 = vpow2.f32 %v428_v49  ;;  %v436_v52 = vsel %vm128_vm7, %v1783_v51, 0.0  ;;  %v1785_v54 = vpop.eup %1784 }
 0x465   :  { %437 = vadd.xlane.f32.xlu2 %v436_v52  ;;  %1788 = vpow2.f32 %v424_v53  ;;  %v430_v57 = vsel %vm128_vm7, %v1785_v54, 0.0 }
 0x46a   :  { %v1787_v55 = vpop.eup %1786 }
 0x46b   :  { %v439_v56 = vsel %vm128_vm7, %v1787_v55, 0.0  ;;  %v1789_v58 = vpop.eup %1788 }
 0x46c   :  { %440 = vadd.xlane.f32.xlu0 %v439_v56  ;;  %v433_v59 = vsel %vm128_vm7, %v1789_v58, 0.0 }
 0x46d   :  { %431 = vadd.xlane.f32.xlu2 %v430_v57 }
 0x474   :  { %434 = vadd.xlane.f32.xlu0 %v433_v59 }
 0x485   :  { %450 = vrot.lane.b32.xlu2 %v2149_v15, %s1958_s6  ;;  %v564_v15 = vld [vmem:[%s2609_s7] sm:$0xff] }
 0x486   :  { %593 = vmatpush.msrb.mxu2 %v564_v15 }
 0x488   :  { %476 = vrot.lane.b32.xlu0 %v2154_v17, %s1958_s6  ;;  %v603_v17 = vld [vmem:[%s2611_s9 + $0x10] sm:$0xff]  ;;  %1112 = vmatpush.msra.mxu2 %v2211_v18 }
 0x48a   :  { %1113 = vmatpush.msra.mxu2 %v2226_v26 }
 0x48c   :  { %1114 = vmatpush.msra.mxu2 %v2235_v28 }
 0x48e   :  { %1115 = vmatpush.msra.mxu2 %v2243_v29 }
 0x4d8   :  { %v438_v60 = vpop.xlane.xlu2 %437 }
 0x4d9   :  { %1790 = vrcp.f32 %v438_v60 }
 0x4df   :  { %v1791_v61 = vpop.eup %1790  ;;  %v441_v62 = vpop.xlane.xlu0 %440 }
 0x4e0   :  { %1792 = vrcp.f32 %v441_v62  ;;  %v432_v63 = vpop.xlane.xlu2 %431  ;;  %v448_v0 = vmul.f32 %v1791_v61, %v1783_v51 }
 0x4e1   :  { %1794 = vrcp.f32 %v432_v63 }
 0x4e2   :  { %1731 = vmatmul.msk.f32.vlgmr.msrb.gmra.mxu1 %vm128_vm7, %v448_v0 }
 0x4e3   :  { %880 = vmatpush.msrb.mxu1 %v2211_v18 }
 0x4e5   :  { %881 = vmatpush.msrb.mxu1 %v2226_v26 }
 0x4e6   :  { %v1793_v1 = vpop.eup %1792 }
 0x4e7   :  { %v1795_v2 = vpop.eup %1794  ;;  %v449_v3 = vmul.f32 %v1793_v1, %v1787_v55  ;;  %v435_v6 = vpop.xlane.xlu0 %434  ;;  %882 = vmatpush.msrb.mxu1 %v2235_v28 }
 0x4e8   :  { %v451_v4 = vpop.permute.xlu2 %450  ;;  %v446_v5 = vmul.f32 %v1795_v2, %v1785_v54  ;;  %1796 = vrcp.f32 %v435_v6 }
 0x4e9   :  { %1732 = vmatmul.msk.f32.vlgmr.msra.gmra.mxu3 %vm128_vm7, %v449_v3  ;;  %471 = vmatpush.msrb.mxu0 %v451_v4 }
 0x4ea   :  { %1729 = vmatmul.msk.f32.vlgmr.msrb.gmra.mxu0 %vm128_vm7, %v446_v5  ;;  %661 = vmatmul.f32.vlgmr.msra.gmra.mxu1 %v1959_v30 }
 0x4eb   :  { %996 = vmatpush.msra.mxu3 %v2211_v18  ;;  %883 = vmatpush.msrb.mxu1 %v2243_v29 }
 0x4ed   :  { %997 = vmatpush.msra.mxu3 %v2226_v26  ;;  %1344 = vmatpush.msra.mxu1 %v2211_v18 }
 0x4ee   :  { %v1797_v7 = vpop.eup %1796 }
 0x4ef   :  { %v447_v8 = vmul.f32 %v1797_v7, %v1789_v58  ;;  %998 = vmatpush.msra.mxu3 %v2235_v28  ;;  %1345 = vmatpush.msra.mxu1 %v2226_v26 }
 0x4f1   :  { %999 = vmatpush.msra.mxu3 %v2243_v29  ;;  %1346 = vmatpush.msra.mxu1 %v2235_v28 }
 0x4f3   :  { %1347 = vmatpush.msra.mxu1 %v2243_v29 }
 0x4fa   :  { %v477_v9 = vpop.permute.xlu0 %476 }
 0x4fb   :  { %497 = vmatpush.msra.mxu0 %v477_v9 }
 0x4fc   :  { %1730 = vmatmul.msk.f32.vlgmr.msra.gmra.mxu0 %vm128_vm7, %v447_v8 }
 0x4fd   :  { %627 = vmatpush.msrb.mxu0 %v604_v16 }
 0x4ff   :  { %628 = vmatpush.msrb.mxu0 %v603_v17 }
 0x501   :  { %629 = vmatpush.msrb.mxu0 %v602_v25 }
 0x503   :  { %630 = vmatpush.msrb.mxu0 %v601_v27 }
 0x505   :  { %1228 = vmatpush.msra.mxu0 %v2211_v18 }
 0x507   :  { %1229 = vmatpush.msra.mxu0 %v2226_v26 }
 0x509   :  { %1230 = vmatpush.msra.mxu0 %v2235_v28 }
 0x50b   :  { %1231 = vmatpush.msra.mxu0 %v2243_v29 }
 0x55f   :  { %v525_v13 = vpop.f32.mrf.mxu1 }
 0x560   :  { %556 = vrot.lane.b32.xlu1 %v525_v13, %s1954_s18 }
 0x567   :  { %v473_v19 = vpop.f32.mrf.mxu0  ;;  %v662_v38 = vpop.f32.mrf.mxu1 }
 0x568   :  { %v666_v42 = vrot.slane %v662_v38, 1 }
 0x56c   :  { %v551_v14 = vpop.f32.mrf.mxu3 }
 0x56d   :  { %558 = vrot.lane.b32.xlu1 %v551_v14, %s1954_s18  ;;  %s1705_s18 = sshll.u32 %s2618_s16, 4  ;;  %s1706_s18 = int_to_ptr.hbm [resolvable:$true] %s1705_s18 }
 0x579   :  { %v499_v22 = vpop.f32.mrf.mxu0 }
 0x5d2   :  { %v557_v20 = vpop.permute.xlu1 %556 }
 0x5d3   :  { %v562_v21 = vsel %vm201_vm10, %v473_v19, %v557_v20 }
 0x5d4   :  { %1733 = vmatmul.msk.f32.vlgmr.msrb.gmra.mxu2 %vm204_vm11, %v562_v21 }
 0x5df   :  { %v559_v23 = vpop.permute.xlu1 %558 }
 0x5e0   :  { %v563_v24 = vsel %vm201_vm10, %v499_v22, %v559_v23 }
 0x5e1   :  { %1734 = vmatmul.msk.f32.gmra.mxu2 %vm204_vm11, %v563_v24 }
 0x657   :  { %v595_v32 = vpop.f32.mrf.mxu2 }
 0x658   :  { %v596_v33 = vadd.f32 %v1778_v31, %v595_v32 }
 0x65a   :  { %1735 = vmatmul.msk.f32.vlgmr.msrb.gmra.mxu0 %vm204_vm11, %v596_v33 }
 0x664   :  { %v598_v34 = vpop.f32.mrf.mxu2 }
 0x665   :  { %v599_v35 = vadd.f32 %v1778_v31, %v598_v34 }
 0x667   :  { %1736 = vmatmul.msk.f32.gmra.mxu0 %vm204_vm11, %v599_v35 }
 0x6d7   :  { %v632_v37 = vpop.f32.mrf.mxu0 }
 0x6d8   :  { %v2274_v39 = vadd.f32 %v1779_v36, %v632_v37 }
 0x6da   :  { %v669_v40 = vadd.f32 %v662_v38, %v2274_v39 }
 0x6dc   :  { %1798 = vtanh.f32 %v669_v40  ;;  %v1737_v47 = vmul.f32 -1.442695, %v669_v40 }
 0x6e2   :  { %v1799_v41 = vpop.eup %1798 }
 0x6e3   :  { %715 = vrot.lane.b32.xlu2 %v1799_v41, %s1958_s6 }
 0x6e4   :  { %v635_v43 = vpop.f32.mrf.mxu0 }
 0x6e5   :  { %v2278_v44 = vadd.f32 %v1779_v36, %v635_v43 }
 0x6e7   :  { %v670_v45 = vadd.f32 %v666_v42, %v2278_v44 }
 0x6e9   :  { %1800 = vtanh.f32 %v670_v45  ;;  %v1738_v54 = vmul.f32 -1.442695, %v670_v45 }
 0x6ea   :  { %1802 = vpow2.f32 %v1737_v47 }
 0x6ef   :  { %v1801_v46 = vpop.eup %1800 }
 0x6f0   :  { %717 = vrot.lane.b32.xlu0 %v1801_v46, %s1958_s6  ;;  %v1803_v48 = vpop.eup %1802 }
 0x6f1   :  { %v677_v49 = vadd.f32 1.0, %v1803_v48 }
 0x6f3   :  { %1804 = vrcp.f32 %v677_v49  ;;  %v690_v56 = vand.u32 2147483648, %v677_v49  ;;  %vm684_vm14 = vweird.f32 %v677_v49  ;;  %v688_v57 = vand.u32 2147483647, %v677_v49 }
 0x6f4   :  { %1806 = vpow2.f32 %v1738_v54 }
 0x6f5   :  { %v691_v59 = vor.u32 1.1754944e-38, %v690_v56  ;;  %vm689_vm0 = vcmp.eq.f32.partialorder %v688_v57, 8.507059e+37 }
 0x6f9   :  { %v1805_v50 = vpop.eup %1804 }
 0x6fa   :  { %v680_v51 = vmul.f32 %v1805_v50, %v677_v49  ;;  %vm685_vm13 = vweird.f32 %v1805_v50  ;;  %v1807_v63 = vpop.eup %1806 }
 0x6fb   :  { %vm686_vm15 = vmor %vm684_vm14, %vm685_vm13  ;;  %v678_v0 = vadd.f32 1.0, %v1807_v63 }
 0x6fc   :  { %v681_v52 = vsub.f32 1.0, %v680_v51 }
 0x6fd   :  { %1808 = vrcp.f32 %v678_v0  ;;  %v705_v6 = vand.u32 2147483648, %v678_v0  ;;  %vm699_vm2 = vweird.f32 %v678_v0  ;;  %v703_v7 = vand.u32 2147483647, %v678_v0 }
 0x6fe   :  { %v682_v53 = vmul.f32 %v1805_v50, %v681_v52 }
 0x6ff   :  { %v706_v9 = vor.u32 1.1754944e-38, %v705_v6  ;;  %vm704_vm4 = vcmp.eq.f32.partialorder %v703_v7, 8.507059e+37 }
 0x700   :  { %v683_v55 = vadd.f32 %v1805_v50, %v682_v53 }
 0x702   :  { %v687_v58 = vsel %vm686_vm15, %v1805_v50, %v683_v55 }
 0x703   :  { %v692_v61 = vsel %vm689_vm0, %v691_v59, %v687_v58  ;;  %v1809_v1 = vpop.eup %1808 }
 0x704   :  { %v695_v2 = vmul.f32 %v1809_v1, %v678_v0  ;;  %vm700_vm1 = vweird.f32 %v1809_v1  ;;  %v711_v13 = vmul.f32 0.0, %v692_v61 }
 0x705   :  { %vm701_vm3 = vmor %vm699_vm2, %vm700_vm1 }
 0x706   :  { %v696_v3 = vsub.f32 1.0, %v695_v2 }
 0x708   :  { %v697_v4 = vmul.f32 %v1809_v1, %v696_v3 }
 0x70a   :  { %v698_v5 = vadd.f32 %v1809_v1, %v697_v4 }
 0x70c   :  { %v702_v8 = vsel %vm701_vm3, %v1809_v1, %v698_v5 }
 0x70d   :  { %v707_v11 = vsel %vm704_vm4, %v706_v9, %v702_v8 }
 0x70e   :  { %v712_v17 = vmul.f32 0.0, %v707_v11 }
 0x73d   :  { %v716_v60 = vpop.permute.xlu2 %715 }
 0x73e   :  { %v721_v62 = vmul.f32 %v716_v60, %v692_v61 }
 0x740   :  { %725 = vrot.lane.b32.xlu0 %v721_v62, %s1955_s2 }
 0x762   :  { %v718_v10 = vpop.permute.xlu0 %717 }
 0x763   :  { %v722_v12 = vmul.f32 %v718_v10, %v707_v11 }
 0x765   :  { %727 = vrot.lane.b32.xlu1 %v722_v12, %s1955_s2 }
 0x7b2   :  { %v726_v14 = vpop.permute.xlu0 %725 }
 0x7b3   :  { %v2284_v15 = vadd.f32 %v726_v14, %v711_v13 }
 0x7b5   :  { %1810 = vtanh.f32 %v2284_v15  ;;  %v822_v4 = vrot.slane %v2284_v15, 7 }
 0x7bb   :  { %v1811_v16 = vpop.eup %1810 }
 0x7bc   :  { %737 = vrot.lane.b32.xlu1 %v1811_v16, %s1958_s6 }
 0x7d7   :  { %v728_v19 = vpop.permute.xlu1 %727 }
 0x7d8   :  { %v2288_v20 = vadd.f32 %v728_v19, %v712_v17 }
 0x7da   :  { %1812 = vtanh.f32 %v2288_v20  ;;  %v823_v2 = vrot.slane %v2288_v20, 7 }
 0x7e0   :  { %v1813_v21 = vpop.eup %1812 }
 0x7e1   :  { %739 = vrot.lane.b32.xlu2 %v1813_v21, %s1958_s6 }
 0x82e   :  { %v738_v22 = vpop.permute.xlu1 %737 }
 0x82f   :  { %v743_v25 = vmul.f32 %v738_v22, %v692_v61 }
 0x83b   :  { %v740_v23 = vpop.permute.xlu2 %739 }
 0x83c   :  { %v744_v24 = vmul.f32 %v740_v23, %v707_v11 }
 0x83e   :  { %v747_v27 = vrot.slane %v744_v24, 7 }
 0x840   :  { %v749_v30 = vsel %vm748_vm5, %v747_v27, %v743_v25 }
 0x841   :  { %750 = vrot.lane.b32.xlu0 %v749_v30, %s1955_s2 }
 0x8b3   :  { %v2294_v31 = vpop.permute.xlu0 %750 }
 0x8b4   :  { %1739 = vmatmul.msk.f32.vlgmr.msrb.gmra.mxu3 %vm204_vm11, %v2294_v31 }
 0x8b5   :  { %1460 = vmatpush.msrb.mxu3 %v2211_v18 }
 0x8b7   :  { %1461 = vmatpush.msrb.mxu3 %v2226_v26 }
 0x8b9   :  { %1462 = vmatpush.msrb.mxu3 %v2235_v28 }
 0x8bb   :  { %1463 = vmatpush.msrb.mxu3 %v2243_v29 }
 0x937   :  { %v771_v32 = vpop.f32.mrf.mxu3 }
 0x938   :  { %v775_v33 = vrot.slane %v771_v32, 7  ;;  %v779_v34 = vadd.f32 %v771_v32, %v2278_v44 }
 0x93a   :  { %v778_v35 = vadd.f32 %v775_v33, %v2274_v39  ;;  %1814 = vtanh.f32 %v779_v34  ;;  %v1741_v29 = vmul.f32 -1.442695, %v779_v34 }
 0x93c   :  { %1816 = vtanh.f32 %v778_v35  ;;  %v1740_v18 = vmul.f32 -1.442695, %v778_v35 }
 0x93e   :  { %1818 = vpow2.f32 %v1740_v18 }
 0x940   :  { %v1815_v36 = vpop.eup %1814 }
 0x941   :  { %832 = vrot.lane.b32.xlu1 %v1815_v36, %s1958_s6 }
 0x942   :  { %v1817_v37 = vpop.eup %1816 }
 0x943   :  { %830 = vrot.lane.b32.xlu2 %v1817_v37, %s1958_s6 }
 0x944   :  { %v1819_v26 = vpop.eup %1818 }
 0x945   :  { %v786_v28 = vadd.f32 1.0, %v1819_v26 }
 0x947   :  { %1820 = vrcp.f32 %v786_v28  ;;  %v799_v47 = vand.u32 2147483648, %v786_v28  ;;  %vm793_vm7 = vweird.f32 %v786_v28  ;;  %v797_v48 = vand.u32 2147483647, %v786_v28 }
 0x948   :  { %1822 = vpow2.f32 %v1741_v29 }
 0x949   :  { %v800_v50 = vor.u32 1.1754944e-38, %v799_v47  ;;  %vm798_vm9 = vcmp.eq.f32.partialorder %v797_v48, 8.507059e+37 }
 0x94d   :  { %v1821_v38 = vpop.eup %1820 }
 0x94e   :  { %v789_v40 = vmul.f32 %v1821_v38, %v786_v28  ;;  %v1823_v42 = vpop.eup %1822  ;;  %vm794_vm6 = vweird.f32 %v1821_v38 }
 0x94f   :  { %v787_v43 = vadd.f32 1.0, %v1823_v42  ;;  %vm795_vm8 = vmor %vm793_vm7, %vm794_vm6 }
 0x950   :  { %v790_v41 = vsub.f32 1.0, %v789_v40 }
 0x951   :  { %1824 = vrcp.f32 %v787_v43  ;;  %v814_v59 = vand.u32 2147483648, %v787_v43  ;;  %vm808_vm12 = vweird.f32 %v787_v43  ;;  %v812_v60 = vand.u32 2147483647, %v787_v43 }
 0x952   :  { %v791_v45 = vmul.f32 %v1821_v38, %v790_v41 }
 0x953   :  { %v815_v62 = vor.u32 1.1754944e-38, %v814_v59  ;;  %vm813_vm14 = vcmp.eq.f32.partialorder %v812_v60, 8.507059e+37 }
 0x954   :  { %v792_v46 = vadd.f32 %v1821_v38, %v791_v45 }
 0x956   :  { %v796_v49 = vsel %vm795_vm8, %v1821_v38, %v792_v46 }
 0x957   :  { %v1825_v51 = vpop.eup %1824  ;;  %v801_v53 = vsel %vm798_vm9, %v800_v50, %v796_v49 }
 0x958   :  { %v804_v55 = vmul.f32 %v1825_v51, %v787_v43  ;;  %vm809_vm10 = vweird.f32 %v1825_v51  ;;  %v826_v7 = vmul.f32 %v822_v4, %v801_v53 }
 0x959   :  { %vm810_vm13 = vmor %vm808_vm12, %vm809_vm10 }
 0x95a   :  { %v805_v56 = vsub.f32 1.0, %v804_v55 }
 0x95c   :  { %v806_v57 = vmul.f32 %v1825_v51, %v805_v56 }
 0x95e   :  { %v807_v58 = vadd.f32 %v1825_v51, %v806_v57 }
 0x960   :  { %v811_v61 = vsel %vm810_vm13, %v1825_v51, %v807_v58 }
 0x961   :  { %v816_v0 = vsel %vm813_vm14, %v815_v62, %v811_v61 }
 0x962   :  { %v827_v3 = vmul.f32 %v823_v2, %v816_v0 }
 0x99d   :  { %v831_v52 = vpop.permute.xlu2 %830 }
 0x99e   :  { %v836_v54 = vmul.f32 %v831_v52, %v801_v53 }
 0x9a0   :  { %840 = vrot.lane.b32.xlu0 %v836_v54, %s1955_s2 }
 0x9b3   :  { %v833_v63 = vpop.permute.xlu1 %832 }
 0x9b4   :  { %v837_v1 = vmul.f32 %v833_v63, %v816_v0 }
 0x9b6   :  { %842 = vrot.lane.b32.xlu2 %v837_v1, %s1955_s2 }
 0xa10   :  { %v843_v5 = vpop.permute.xlu2 %842 }
 0xa11   :  { %v2310_v6 = vadd.f32 %v843_v5, %v827_v3 }
 0xa12   :  { %v841_v8 = vpop.permute.xlu0 %840 }
 0xa13   :  { %1826 = vtanh.f32 %v2310_v6  ;;  %v2313_v9 = vadd.f32 %v841_v8, %v826_v7 }
 0xa15   :  { %1828 = vtanh.f32 %v2313_v9  ;;  %v937_v59 = vrot.slane %v2313_v9, 7 }
 0xa19   :  { %v1827_v10 = vpop.eup %1826 }
 0xa1a   :  { %854 = vrot.lane.b32.xlu0 %v1827_v10, %s1958_s6 }
 0xa1b   :  { %v1829_v11 = vpop.eup %1828 }
 0xa1c   :  { %852 = vrot.lane.b32.xlu1 %v1829_v11, %s1958_s6 }
 0xa8c   :  { %v855_v12 = vpop.permute.xlu0 %854 }
 0xa8d   :  { %v859_v15 = vmul.f32 %v855_v12, %v816_v0  ;;  %v938_v0 = vrot.slane %v2310_v6, 7 }
 0xa8e   :  { %v853_v13 = vpop.permute.xlu1 %852 }
 0xa8f   :  { %v858_v14 = vmul.f32 %v853_v13, %v801_v53 }
 0xa91   :  { %v862_v16 = vrot.slane %v858_v14, 1 }
 0xa93   :  { %v2319_v17 = vsel %vm748_vm5, %v859_v15, %v862_v16 }
 0xa94   :  { %864 = vrot.lane.b32.xlu2 %v2319_v17, %s1955_s2 }
 0xaee   :  { %v865_v19 = vpop.permute.xlu2 %864 }
 0xaef   :  { %1742 = vmatmul.msk.f32.vlgmr.msrb.gmra.mxu1 %vm204_vm11, %v865_v19 }
 0xb6c   :  { %v885_v20 = vpop.f32.mrf.mxu1 }
 0xb6d   :  { %v889_v21 = vrot.slane %v885_v20, 6  ;;  %v890_v22 = vrot.slane %v885_v20, 7 }
 0xb6f   :  { %v893_v23 = vadd.f32 %v889_v21, %v2274_v39  ;;  %v894_v24 = vadd.f32 %v890_v22, %v2278_v44 }
 0xb71   :  { %1830 = vtanh.f32 %v893_v23  ;;  %v1743_v30 = vmul.f32 -1.442695, %v893_v23  ;;  %v1744_v32 = vmul.f32 -1.442695, %v894_v24 }
 0xb72   :  { %1832 = vtanh.f32 %v894_v24 }
 0xb73   :  { %1834 = vpow2.f32 %v1743_v30 }
 0xb74   :  { %1836 = vpow2.f32 %v1744_v32 }
 0xb77   :  { %v1831_v25 = vpop.eup %1830 }
 0xb78   :  { %v1833_v27 = vpop.eup %1832  ;;  %945 = vrot.lane.b32.xlu1 %v1831_v25, %s1958_s6 }
 0xb79   :  { %947 = vrot.lane.b32.xlu0 %v1833_v27, %s1958_s6  ;;  %v1835_v33 = vpop.eup %1834 }
 0xb7a   :  { %v1837_v34 = vpop.eup %1836  ;;  %v901_v35 = vadd.f32 1.0, %v1835_v33 }
 0xb7b   :  { %v902_v36 = vadd.f32 1.0, %v1837_v34 }
 0xb7c   :  { %1838 = vrcp.f32 %v901_v35  ;;  %v914_v45 = vand.u32 2147483648, %v901_v35  ;;  %vm908_vm1 = vweird.f32 %v901_v35  ;;  %v912_v47 = vand.u32 2147483647, %v901_v35 }
 0xb7d   :  { %1840 = vrcp.f32 %v902_v36  ;;  %v929_v46 = vand.u32 2147483648, %v902_v36  ;;  %vm923_vm2 = vweird.f32 %v902_v36  ;;  %v927_v48 = vand.u32 2147483647, %v902_v36 }
 0xb7e   :  { %v915_v51 = vor.u32 1.1754944e-38, %v914_v45  ;;  %vm913_vm6 = vcmp.eq.f32.partialorder %v912_v47, 8.507059e+37 }
 0xb7f   :  { %v930_v52 = vor.u32 1.1754944e-38, %v929_v46  ;;  %vm928_vm7 = vcmp.eq.f32.partialorder %v927_v48, 8.507059e+37 }
 0xb82   :  { %v1839_v37 = vpop.eup %1838 }
 0xb83   :  { %v1841_v18 = vpop.eup %1840  ;;  %v904_v26 = vmul.f32 %v1839_v37, %v901_v35  ;;  %vm909_vm15 = vweird.f32 %v1839_v37 }
 0xb84   :  { %v919_v28 = vmul.f32 %v1841_v18, %v902_v36  ;;  %vm924_vm0 = vweird.f32 %v1841_v18  ;;  %vm910_vm3 = vmor %vm908_vm1, %vm909_vm15 }
 0xb85   :  { %v905_v29 = vsub.f32 1.0, %v904_v26  ;;  %vm925_vm4 = vmor %vm923_vm2, %vm924_vm0 }
 0xb86   :  { %v920_v38 = vsub.f32 1.0, %v919_v28 }
 0xb87   :  { %v906_v40 = vmul.f32 %v1839_v37, %v905_v29 }
 0xb88   :  { %v921_v41 = vmul.f32 %v1841_v18, %v920_v38 }
 0xb89   :  { %v907_v42 = vadd.f32 %v1839_v37, %v906_v40 }
 0xb8a   :  { %v922_v43 = vadd.f32 %v1841_v18, %v921_v41 }
 0xb8b   :  { %v911_v49 = vsel %vm910_vm3, %v1839_v37, %v907_v42 }
 0xb8c   :  { %v926_v50 = vsel %vm925_vm4, %v1841_v18, %v922_v43  ;;  %v916_v54 = vsel %vm913_vm6, %v915_v51, %v911_v49 }
 0xb8d   :  { %v931_v56 = vsel %vm928_vm7, %v930_v52, %v926_v50  ;;  %v941_v60 = vmul.f32 %v937_v59, %v916_v54 }
 0xb8e   :  { %v942_v1 = vmul.f32 %v938_v0, %v931_v56 }
 0xbea   :  { %v946_v53 = vpop.permute.xlu1 %945 }
 0xbeb   :  { %v948_v55 = vpop.permute.xlu0 %947  ;;  %v951_v57 = vmul.f32 %v946_v53, %v916_v54 }
 0xbec   :  { %v952_v58 = vmul.f32 %v948_v55, %v931_v56 }
 0xbed   :  { %955 = vrot.lane.b32.xlu2 %v951_v57, %s1955_s2 }
 0xbee   :  { %957 = vrot.lane.b32.xlu1 %v952_v58, %s1955_s2 }
 0xc47   :  { %v956_v61 = vpop.permute.xlu2 %955 }
 0xc48   :  { %v2331_v62 = vadd.f32 %v956_v61, %v941_v60 }
 0xc4a   :  { %1842 = vtanh.f32 %v2331_v62  ;;  %v1053_v59 = vrot.slane %v2331_v62, 7 }
 0xc50   :  { %v1843_v63 = vpop.eup %1842 }
 0xc51   :  { %967 = vrot.lane.b32.xlu0 %v1843_v63, %s1958_s6 }
 0xc60   :  { %v958_v2 = vpop.permute.xlu1 %957 }
 0xc61   :  { %v2336_v3 = vadd.f32 %v958_v2, %v942_v1 }
 0xc63   :  { %1844 = vtanh.f32 %v2336_v3 }
 0xc69   :  { %v1845_v4 = vpop.eup %1844 }
 0xc6a   :  { %969 = vrot.lane.b32.xlu2 %v1845_v4, %s1958_s6 }
 0xcc3   :  { %v968_v5 = vpop.permute.xlu0 %967 }
 0xcc4   :  { %v970_v7 = vpop.permute.xlu2 %969  ;;  %v973_v8 = vmul.f32 %v968_v5, %v916_v54  ;;  %v1054_v54 = vrot.slane %v2336_v3, 7 }
 0xcc5   :  { %v974_v9 = vmul.f32 %v970_v7, %v931_v56 }
 0xcc6   :  { %v977_v10 = vrot.slane %v973_v8, 2 }
 0xcc7   :  { %v978_v11 = vrot.slane %v974_v9, 1 }
 0xcc9   :  { %v2341_v12 = vsel %vm748_vm5, %v978_v11, %v977_v10 }
 0xcca   :  { %980 = vrot.lane.b32.xlu1 %v2341_v12, %s1955_s2 }
 0xd3c   :  { %v981_v6 = vpop.permute.xlu1 %980 }
 0xd3d   :  { %1745 = vmatmul.msk.f32.vlgmr.msra.gmra.mxu3 %vm204_vm11, %v981_v6 }
 0xdc0   :  { %v1001_v13 = vpop.f32.mrf.mxu3 }
 0xdc1   :  { %v1005_v14 = vrot.slane %v1001_v13, 5  ;;  %v1006_v15 = vrot.slane %v1001_v13, 6 }
 0xdc3   :  { %v1009_v16 = vadd.f32 %v1005_v14, %v2274_v39  ;;  %v1010_v19 = vadd.f32 %v1006_v15, %v2278_v44 }
 0xdc5   :  { %1846 = vtanh.f32 %v1009_v16  ;;  %v1747_v22 = vmul.f32 -1.442695, %v1010_v19  ;;  %v1746_v27 = vmul.f32 -1.442695, %v1009_v16 }
 0xdc6   :  { %1848 = vtanh.f32 %v1010_v19 }
 0xdc7   :  { %1850 = vpow2.f32 %v1747_v22 }
 0xdcb   :  { %v1847_v20 = vpop.eup %1846 }
 0xdcc   :  { %v1849_v21 = vpop.eup %1848  ;;  %1061 = vrot.lane.b32.xlu0 %v1847_v20, %s1958_s6 }
 0xdcd   :  { %1063 = vrot.lane.b32.xlu2 %v1849_v21, %s1958_s6  ;;  %v1851_v23 = vpop.eup %1850 }
 0xdce   :  { %v1018_v24 = vadd.f32 1.0, %v1851_v23 }
 0xdd0   :  { %1852 = vrcp.f32 %v1018_v24  ;;  %v1045_v37 = vand.u32 2147483648, %v1018_v24  ;;  %vm1039_vm9 = vweird.f32 %v1018_v24  ;;  %v1043_v18 = vand.u32 2147483647, %v1018_v24 }
 0xdd1   :  { %1854 = vpow2.f32 %v1746_v27 }
 0xdd2   :  { %v1046_v28 = vor.u32 1.1754944e-38, %v1045_v37  ;;  %vm1044_vm12 = vcmp.eq.f32.partialorder %v1043_v18, 8.507059e+37 }
 0xdd6   :  { %v1853_v25 = vpop.eup %1852 }
 0xdd7   :  { %v1035_v30 = vmul.f32 %v1853_v25, %v1018_v24  ;;  %v1855_v33 = vpop.eup %1854  ;;  %vm1040_vm8 = vweird.f32 %v1853_v25 }
 0xdd8   :  { %v1017_v35 = vadd.f32 1.0, %v1855_v33  ;;  %vm1041_vm10 = vmor %vm1039_vm9, %vm1040_vm8 }
 0xdd9   :  { %v1036_v32 = vsub.f32 1.0, %v1035_v30 }
 0xdda   :  { %1856 = vrcp.f32 %v1017_v35  ;;  %v1030_v47 = vand.u32 2147483648, %v1017_v35  ;;  %vm1024_vm14 = vweird.f32 %v1017_v35  ;;  %v1028_v48 = vand.u32 2147483647, %v1017_v35 }
 0xddb   :  { %v1037_v34 = vmul.f32 %v1853_v25, %v1036_v32 }
 0xddc   :  { %v1031_v50 = vor.u32 1.1754944e-38, %v1030_v47  ;;  %vm1029_vm0 = vcmp.eq.f32.partialorder %v1028_v48, 8.507059e+37 }
 0xddd   :  { %v1038_v36 = vadd.f32 %v1853_v25, %v1037_v34 }
 0xddf   :  { %v1042_v26 = vsel %vm1041_vm10, %v1853_v25, %v1038_v36 }
 0xde0   :  { %v1047_v38 = vsel %vm1044_vm12, %v1046_v28, %v1042_v26  ;;  %v1857_v40 = vpop.eup %1856 }
 0xde1   :  { %v1020_v42 = vmul.f32 %v1857_v40, %v1017_v35  ;;  %vm1025_vm13 = vweird.f32 %v1857_v40  ;;  %v1058_v55 = vmul.f32 %v1054_v54, %v1047_v38 }
 0xde2   :  { %vm1026_vm15 = vmor %vm1024_vm14, %vm1025_vm13 }
 0xde3   :  { %v1021_v43 = vsub.f32 1.0, %v1020_v42 }
 0xde5   :  { %v1022_v45 = vmul.f32 %v1857_v40, %v1021_v43 }
 0xde7   :  { %v1023_v46 = vadd.f32 %v1857_v40, %v1022_v45 }
 0xde9   :  { %v1027_v49 = vsel %vm1026_vm15, %v1857_v40, %v1023_v46 }
 0xdea   :  { %v1032_v52 = vsel %vm1029_vm0, %v1031_v50, %v1027_v49 }
 0xdeb   :  { %v1057_v60 = vmul.f32 %v1053_v59, %v1032_v52 }
 0xe27   :  { %v1064_v29 = vpop.permute.xlu2 %1063 }
 0xe28   :  { %v1068_v41 = vmul.f32 %v1064_v29, %v1047_v38 }
 0xe2a   :  { %1073 = vrot.lane.b32.xlu0 %v1068_v41, %s1955_s2 }
 0xe3e   :  { %v1062_v51 = vpop.permute.xlu0 %1061 }
 0xe3f   :  { %v1067_v53 = vmul.f32 %v1062_v51, %v1032_v52 }
 0xe41   :  { %1071 = vrot.lane.b32.xlu1 %v1067_v53, %s1955_s2 }
 0xe9c   :  { %v1074_v56 = vpop.permute.xlu0 %1073 }
 0xe9d   :  { %v2353_v57 = vadd.f32 %v1074_v56, %v1058_v55 }
 0xe9f   :  { %1858 = vtanh.f32 %v2353_v57  ;;  %v1170_v51 = vrot.slane %v2353_v57, 7 }
 0xea5   :  { %v1859_v58 = vpop.eup %1858 }
 0xea6   :  { %1085 = vrot.lane.b32.xlu1 %v1859_v58, %s1958_s6 }
 0xeb3   :  { %v1072_v61 = vpop.permute.xlu1 %1071 }
 0xeb4   :  { %v2358_v63 = vadd.f32 %v1072_v61, %v1057_v60 }
 0xeb6   :  { %1860 = vtanh.f32 %v2358_v63  ;;  %v1169_v50 = vrot.slane %v2358_v63, 7 }
 0xebc   :  { %v1861_v0 = vpop.eup %1860 }
 0xebd   :  { %1083 = vrot.lane.b32.xlu2 %v1861_v0, %s1958_s6 }
 0xf17   :  { %v1084_v1 = vpop.permute.xlu2 %1083 }
 0xf18   :  { %v1086_v2 = vpop.permute.xlu1 %1085  ;;  %v1089_v3 = vmul.f32 %v1084_v1, %v1032_v52 }
 0xf19   :  { %v1090_v4 = vmul.f32 %v1086_v2, %v1047_v38 }
 0xf1a   :  { %v1093_v5 = vrot.slane %v1089_v3, 3 }
 0xf1b   :  { %v1094_v7 = vrot.slane %v1090_v4, 2 }
 0xf1d   :  { %v2363_v8 = vsel %vm748_vm5, %v1094_v7, %v1093_v5 }
 0xf1e   :  { %1096 = vrot.lane.b32.xlu0 %v2363_v8, %s1955_s2 }
 0xf90   :  { %v1097_v62 = vpop.permute.xlu0 %1096 }
 0xf91   :  { %1748 = vmatmul.msk.f32.vlgmr.msra.gmra.mxu2 %vm204_vm11, %v1097_v62 }
0x1014   :  { %v1117_v9 = vpop.f32.mrf.mxu2 }
0x1015   :  { %v1121_v10 = vrot.slane %v1117_v9, 4  ;;  %v1122_v11 = vrot.slane %v1117_v9, 5 }
0x1017   :  { %v1125_v6 = vadd.f32 %v1121_v10, %v2274_v39  ;;  %v1126_v13 = vadd.f32 %v1122_v11, %v2278_v44 }
0x1019   :  { %1862 = vtanh.f32 %v1125_v6  ;;  %v1749_v16 = vmul.f32 -1.442695, %v1125_v6  ;;  %v1750_v22 = vmul.f32 -1.442695, %v1126_v13 }
0x101a   :  { %1864 = vtanh.f32 %v1126_v13 }
0x101b   :  { %1866 = vpow2.f32 %v1749_v16 }
0x101f   :  { %v1863_v14 = vpop.eup %1862 }
0x1020   :  { %v1865_v15 = vpop.eup %1864  ;;  %1177 = vrot.lane.b32.xlu2 %v1863_v14, %s1958_s6 }
0x1021   :  { %1179 = vrot.lane.b32.xlu1 %v1865_v15, %s1958_s6  ;;  %v1867_v19 = vpop.eup %1866 }
0x1022   :  { %v1133_v20 = vadd.f32 1.0, %v1867_v19 }
0x1024   :  { %1868 = vrcp.f32 %v1133_v20  ;;  %v1146_v33 = vand.u32 2147483648, %v1133_v20  ;;  %vm1140_vm2 = vweird.f32 %v1133_v20  ;;  %v1144_v34 = vand.u32 2147483647, %v1133_v20 }
0x1025   :  { %1870 = vpow2.f32 %v1750_v22 }
0x1026   :  { %v1147_v36 = vor.u32 1.1754944e-38, %v1146_v33  ;;  %vm1145_vm4 = vcmp.eq.f32.partialorder %v1144_v34, 8.507059e+37 }
0x102a   :  { %v1869_v21 = vpop.eup %1868 }
0x102b   :  { %v1136_v23 = vmul.f32 %v1869_v21, %v1133_v20  ;;  %v1871_v27 = vpop.eup %1870  ;;  %vm1141_vm1 = vweird.f32 %v1869_v21 }
0x102c   :  { %v1134_v30 = vadd.f32 1.0, %v1871_v27  ;;  %vm1142_vm3 = vmor %vm1140_vm2, %vm1141_vm1 }
0x102d   :  { %v1137_v24 = vsub.f32 1.0, %v1136_v23 }
0x102e   :  { %1872 = vrcp.f32 %v1134_v30  ;;  %v1161_v42 = vand.u32 2147483648, %v1134_v30  ;;  %vm1155_vm7 = vweird.f32 %v1134_v30  ;;  %v1159_v43 = vand.u32 2147483647, %v1134_v30 }
0x102f   :  { %v1138_v25 = vmul.f32 %v1869_v21, %v1137_v24 }
0x1030   :  { %v1162_v46 = vor.u32 1.1754944e-38, %v1161_v42  ;;  %vm1160_vm9 = vcmp.eq.f32.partialorder %v1159_v43, 8.507059e+37 }
0x1031   :  { %v1139_v32 = vadd.f32 %v1869_v21, %v1138_v25 }
0x1033   :  { %v1143_v35 = vsel %vm1142_vm3, %v1869_v21, %v1139_v32 }
0x1034   :  { %v1148_v18 = vsel %vm1145_vm4, %v1147_v36, %v1143_v35  ;;  %v1873_v28 = vpop.eup %1872 }
0x1035   :  { %v1151_v29 = vmul.f32 %v1873_v28, %v1134_v30  ;;  %vm1156_vm6 = vweird.f32 %v1873_v28  ;;  %v1173_v52 = vmul.f32 %v1169_v50, %v1148_v18 }
0x1036   :  { %vm1157_vm8 = vmor %vm1155_vm7, %vm1156_vm6 }
0x1037   :  { %v1152_v38 = vsub.f32 1.0, %v1151_v29 }
0x1039   :  { %v1153_v40 = vmul.f32 %v1873_v28, %v1152_v38 }
0x103b   :  { %v1154_v41 = vadd.f32 %v1873_v28, %v1153_v40 }
0x103d   :  { %v1158_v45 = vsel %vm1157_vm8, %v1873_v28, %v1154_v41 }
0x103e   :  { %v1163_v48 = vsel %vm1160_vm9, %v1162_v46, %v1158_v45 }
0x103f   :  { %v1174_v53 = vmul.f32 %v1170_v51, %v1163_v48 }
0x107a   :  { %v1178_v37 = vpop.permute.xlu2 %1177 }
0x107b   :  { %v1183_v26 = vmul.f32 %v1178_v37, %v1148_v18 }
0x107d   :  { %1187 = vrot.lane.b32.xlu0 %v1183_v26, %s1955_s2 }
0x1093   :  { %v1180_v47 = vpop.permute.xlu1 %1179 }
0x1094   :  { %v1184_v49 = vmul.f32 %v1180_v47, %v1163_v48 }
0x1096   :  { %1189 = vrot.lane.b32.xlu2 %v1184_v49, %s1955_s2 }
0x10ef   :  { %v1188_v54 = vpop.permute.xlu0 %1187 }
0x10f0   :  { %v1190_v55 = vpop.permute.xlu2 %1189  ;;  %v2376_v56 = vadd.f32 %v1188_v54, %v1173_v52 }
0x10f1   :  { %v2378_v58 = vadd.f32 %v1190_v55, %v1174_v53 }
0x10f2   :  { %1874 = vtanh.f32 %v2376_v56  ;;  %v1285_v47 = vrot.slane %v2376_v56, 7 }
0x10f3   :  { %1876 = vtanh.f32 %v2378_v58  ;;  %v1286_v52 = vrot.slane %v2378_v58, 7 }
0x10f8   :  { %v1875_v59 = vpop.eup %1874 }
0x10f9   :  { %v1877_v60 = vpop.eup %1876  ;;  %1199 = vrot.lane.b32.xlu1 %v1875_v59, %s1958_s6 }
0x10fa   :  { %1201 = vrot.lane.b32.xlu0 %v1877_v60, %s1958_s6 }
0x116b   :  { %v1200_v61 = vpop.permute.xlu1 %1199 }
0x116c   :  { %v1202_v57 = vpop.permute.xlu0 %1201  ;;  %v1205_v63 = vmul.f32 %v1200_v61, %v1148_v18 }
0x116d   :  { %v1206_v0 = vmul.f32 %v1202_v57, %v1163_v48 }
0x116e   :  { %v1209_v1 = vrot.slane %v1205_v63, 4 }
0x116f   :  { %v1210_v2 = vrot.slane %v1206_v0, 3 }
0x1171   :  { %v1211_v3 = vsel %vm748_vm5, %v1210_v2, %v1209_v1 }
0x1172   :  { %1212 = vrot.lane.b32.xlu2 %v1211_v3, %s1955_s2 }
0x11cc   :  { %v2386_v4 = vpop.permute.xlu2 %1212 }
0x11cd   :  { %1751 = vmatmul.msk.f32.vlgmr.msra.gmra.mxu0 %vm204_vm11, %v2386_v4 }
0x124a   :  { %v1233_v5 = vpop.f32.mrf.mxu0 }
0x124b   :  { %v1237_v7 = vrot.slane %v1233_v5, 3  ;;  %v1238_v62 = vrot.slane %v1233_v5, 4 }
0x124d   :  { %v1241_v9 = vadd.f32 %v1237_v7, %v2274_v39  ;;  %v1242_v10 = vadd.f32 %v1238_v62, %v2278_v44 }
0x124f   :  { %1878 = vtanh.f32 %v1241_v9  ;;  %v1752_v13 = vmul.f32 -1.442695, %v1241_v9  ;;  %v1753_v14 = vmul.f32 -1.442695, %v1242_v10 }
0x1250   :  { %1880 = vtanh.f32 %v1242_v10 }
0x1251   :  { %1882 = vpow2.f32 %v1752_v13 }
0x1252   :  { %1884 = vpow2.f32 %v1753_v14 }
0x1255   :  { %v1879_v11 = vpop.eup %1878 }
0x1256   :  { %v1881_v6 = vpop.eup %1880  ;;  %1293 = vrot.lane.b32.xlu1 %v1879_v11, %s1958_s6 }
0x1257   :  { %1295 = vrot.lane.b32.xlu0 %v1881_v6, %s1958_s6  ;;  %v1883_v15 = vpop.eup %1882 }
0x1258   :  { %v1885_v16 = vpop.eup %1884  ;;  %v1249_v19 = vadd.f32 1.0, %v1883_v15 }
0x1259   :  { %v1250_v20 = vadd.f32 1.0, %v1885_v16 }
0x125a   :  { %1886 = vrcp.f32 %v1249_v19  ;;  %v1262_v35 = vand.u32 2147483648, %v1249_v19  ;;  %vm1256_vm13 = vweird.f32 %v1249_v19  ;;  %v1260_v37 = vand.u32 2147483647, %v1249_v19 }
0x125b   :  { %1888 = vrcp.f32 %v1250_v20  ;;  %v1277_v36 = vand.u32 2147483648, %v1250_v20  ;;  %vm1271_vm14 = vweird.f32 %v1250_v20  ;;  %v1275_v18 = vand.u32 2147483647, %v1250_v20 }
0x125c   :  { %v1263_v29 = vor.u32 1.1754944e-38, %v1262_v35  ;;  %vm1261_vm1 = vcmp.eq.f32.partialorder %v1260_v37, 8.507059e+37 }
0x125d   :  { %v1278_v38 = vor.u32 1.1754944e-38, %v1277_v36  ;;  %vm1276_vm2 = vcmp.eq.f32.partialorder %v1275_v18, 8.507059e+37 }
0x1260   :  { %v1887_v21 = vpop.eup %1886 }
0x1261   :  { %v1889_v22 = vpop.eup %1888  ;;  %v1252_v23 = vmul.f32 %v1887_v21, %v1249_v19  ;;  %vm1257_vm10 = vweird.f32 %v1887_v21 }
0x1262   :  { %v1267_v24 = vmul.f32 %v1889_v22, %v1250_v20  ;;  %vm1272_vm12 = vweird.f32 %v1889_v22  ;;  %vm1258_vm15 = vmor %vm1256_vm13, %vm1257_vm10 }
0x1263   :  { %v1253_v25 = vsub.f32 1.0, %v1252_v23  ;;  %vm1273_vm0 = vmor %vm1271_vm14, %vm1272_vm12 }
0x1264   :  { %v1268_v27 = vsub.f32 1.0, %v1267_v24 }
0x1265   :  { %v1254_v30 = vmul.f32 %v1887_v21, %v1253_v25 }
0x1266   :  { %v1269_v32 = vmul.f32 %v1889_v22, %v1268_v27 }
0x1267   :  { %v1255_v33 = vadd.f32 %v1887_v21, %v1254_v30 }
0x1268   :  { %v1270_v34 = vadd.f32 %v1889_v22, %v1269_v32 }
0x1269   :  { %v1259_v26 = vsel %vm1258_vm15, %v1887_v21, %v1255_v33 }
0x126a   :  { %v1274_v28 = vsel %vm1273_vm0, %v1889_v22, %v1270_v34  ;;  %v1264_v41 = vsel %vm1261_vm1, %v1263_v29, %v1259_v26 }
0x126b   :  { %v1279_v43 = vsel %vm1276_vm2, %v1278_v38, %v1274_v28  ;;  %v1289_v48 = vmul.f32 %v1285_v47, %v1264_v41 }
0x126c   :  { %v1290_v53 = vmul.f32 %v1286_v52, %v1279_v43 }
0x12c8   :  { %v1294_v40 = vpop.permute.xlu1 %1293 }
0x12c9   :  { %v1296_v42 = vpop.permute.xlu0 %1295  ;;  %v1299_v45 = vmul.f32 %v1294_v40, %v1264_v41 }
0x12ca   :  { %v1300_v46 = vmul.f32 %v1296_v42, %v1279_v43 }
0x12cb   :  { %1303 = vrot.lane.b32.xlu2 %v1299_v45, %s1955_s2 }
0x12cc   :  { %1305 = vrot.lane.b32.xlu1 %v1300_v46, %s1955_s2 }
0x1325   :  { %v1304_v49 = vpop.permute.xlu2 %1303 }
0x1326   :  { %v2397_v50 = vadd.f32 %v1304_v49, %v1289_v48 }
0x1328   :  { %1890 = vtanh.f32 %v2397_v50 }
0x132e   :  { %v1891_v51 = vpop.eup %1890 }
0x132f   :  { %1315 = vrot.lane.b32.xlu0 %v1891_v51, %s1958_s6  ;;  %v1401_v51 = vrot.slane %v2397_v50, 7 }
0x133e   :  { %v1306_v54 = vpop.permute.xlu1 %1305 }
0x133f   :  { %v2402_v55 = vadd.f32 %v1306_v54, %v1290_v53 }
0x1341   :  { %1892 = vtanh.f32 %v2402_v55  ;;  %v1402_v45 = vrot.slane %v2402_v55, 7 }
0x1347   :  { %v1893_v59 = vpop.eup %1892 }
0x1348   :  { %1317 = vrot.lane.b32.xlu2 %v1893_v59, %s1958_s6 }
0x13a1   :  { %v1316_v56 = vpop.permute.xlu0 %1315 }
0x13a2   :  { %v1318_v60 = vpop.permute.xlu2 %1317  ;;  %v1321_v61 = vmul.f32 %v1316_v56, %v1264_v41 }
0x13a3   :  { %v1322_v57 = vmul.f32 %v1318_v60, %v1279_v43 }
0x13a4   :  { %v1325_v63 = vrot.slane %v1321_v61, 5 }
0x13a5   :  { %v1326_v0 = vrot.slane %v1322_v57, 4 }
0x13a7   :  { %v2407_v1 = vsel %vm748_vm5, %v1326_v0, %v1325_v63 }
0x13a8   :  { %1328 = vrot.lane.b32.xlu1 %v2407_v1, %s1955_s2 }
0x141a   :  { %v1329_v58 = vpop.permute.xlu1 %1328 }
0x141b   :  { %1754 = vmatmul.msk.f32.vlgmr.msra.gmra.mxu1 %vm204_vm11, %v1329_v58 }
0x1498   :  { %v1349_v2 = vpop.f32.mrf.mxu1 }
0x1499   :  { %v1353_v3 = vrot.slane %v1349_v2, 2  ;;  %v1354_v5 = vrot.slane %v1349_v2, 3 }
0x149b   :  { %v1357_v7 = vadd.f32 %v1353_v3, %v2274_v39  ;;  %v1358_v62 = vadd.f32 %v1354_v5, %v2278_v44 }
0x149d   :  { %1894 = vtanh.f32 %v1357_v7  ;;  %v1756_v11 = vmul.f32 -1.442695, %v1358_v62  ;;  %v1755_v15 = vmul.f32 -1.442695, %v1357_v7 }
0x149e   :  { %1896 = vtanh.f32 %v1358_v62 }
0x149f   :  { %1898 = vpow2.f32 %v1756_v11 }
0x14a3   :  { %v1895_v9 = vpop.eup %1894 }
0x14a4   :  { %v1897_v10 = vpop.eup %1896  ;;  %1409 = vrot.lane.b32.xlu0 %v1895_v9, %s1958_s6 }
0x14a5   :  { %1411 = vrot.lane.b32.xlu2 %v1897_v10, %s1958_s6  ;;  %v1899_v6 = vpop.eup %1898 }
0x14a6   :  { %v1366_v13 = vadd.f32 1.0, %v1899_v6 }
0x14a8   :  { %1900 = vrcp.f32 %v1366_v13  ;;  %v1393_v24 = vand.u32 2147483648, %v1366_v13  ;;  %vm1387_vm4 = vweird.f32 %v1366_v13  ;;  %v1391_v25 = vand.u32 2147483647, %v1366_v13 }
0x14a9   :  { %1902 = vpow2.f32 %v1755_v15 }
0x14aa   :  { %v1394_v30 = vor.u32 1.1754944e-38, %v1393_v24  ;;  %vm1392_vm7 = vcmp.eq.f32.partialorder %v1391_v25, 8.507059e+37 }
0x14ae   :  { %v1901_v14 = vpop.eup %1900 }
0x14af   :  { %v1383_v16 = vmul.f32 %v1901_v14, %v1366_v13  ;;  %v1903_v20 = vpop.eup %1902  ;;  %vm1388_vm3 = vweird.f32 %v1901_v14 }
0x14b0   :  { %v1365_v22 = vadd.f32 1.0, %v1903_v20  ;;  %vm1389_vm6 = vmor %vm1387_vm4, %vm1388_vm3 }
0x14b1   :  { %v1384_v19 = vsub.f32 1.0, %v1383_v16 }
0x14b2   :  { %1904 = vrcp.f32 %v1365_v22  ;;  %v1378_v28 = vand.u32 2147483648, %v1365_v22  ;;  %vm1372_vm9 = vweird.f32 %v1365_v22  ;;  %v1376_v29 = vand.u32 2147483647, %v1365_v22 }
0x14b3   :  { %v1385_v21 = vmul.f32 %v1901_v14, %v1384_v19 }
0x14b4   :  { %v1379_v40 = vor.u32 1.1754944e-38, %v1378_v28  ;;  %vm1377_vm12 = vcmp.eq.f32.partialorder %v1376_v29, 8.507059e+37  ;;  %v1593_v28 = vld [vmem:[%s2614_s12 + $0x48] sm:$0xff] }
0x14b5   :  { %v1386_v23 = vadd.f32 %v1901_v14, %v1385_v21 }
0x14b7   :  { %v1390_v27 = vsel %vm1389_vm6, %v1901_v14, %v1386_v23  ;;  %vm1577_vm6 = vcmask 523264  }
0x14b8   :  { %v1395_v33 = vsel %vm1392_vm7, %v1394_v30, %v1390_v27  ;;  %v1905_v34 = vpop.eup %1904  ;;  %v1599_v30 = vld [vmem:[%s2614_s12 + $0x78] sm:$0xff]  ;;  %vm1579_vm7 = vcmask 785408  }
0x14b9   :  { %v1368_v36 = vmul.f32 %v1905_v34, %v1365_v22  ;;  %vm1373_vm8 = vweird.f32 %v1905_v34  ;;  %v1406_v46 = vmul.f32 %v1402_v45, %v1395_v33  ;;  %1620 = vmatpush.msrb.mxu2 %v1599_v30  ;;  %v1589_v45 = vld [vmem:[%s2614_s12 + $0x28] sm:$0xff]  ;;  %v1665_v30 = vld [vmem:[%s2616_s14 + $0x20] sm:$0xff] }
0x14ba   :  { %vm1374_vm10 = vmor %vm1372_vm9, %vm1373_vm8 }
0x14bb   :  { %v1369_v37 = vsub.f32 1.0, %v1368_v36  ;;  %v1596_v36 = vld [vmem:[%s2614_s12 + $0x60] sm:$0xff] }
0x14bd   :  { %v1370_v18 = vmul.f32 %v1905_v34, %v1369_v37  ;;  %v1595_v37 = vld [vmem:[%s2614_s12 + $0x58] sm:$0xff] }
0x14bf   :  { %v1371_v26 = vadd.f32 %v1905_v34, %v1370_v18 }
0x14c1   :  { %v1375_v38 = vsel %vm1374_vm10, %v1905_v34, %v1371_v26  ;;  %v1597_v34 = vld [vmem:[%s2614_s12 + $0x68] sm:$0xff]  ;;  %v1594_v26 = vld [vmem:[%s2614_s12 + $0x50] sm:$0xff] }
0x14c2   :  { %v1380_v42 = vsel %vm1377_vm12, %v1379_v40, %v1375_v38  ;;  %v1592_v38 = vld [vmem:[%s2614_s12 + $0x40] sm:$0xff]  ;;  %v1591_v40 = vld [vmem:[%s2614_s12 + $0x38] sm:$0xff] }
0x14c3   :  { %v1405_v52 = vmul.f32 %v1401_v51, %v1380_v42 }
0x14ff   :  { %v1412_v32 = vpop.permute.xlu2 %1411 }
0x1500   :  { %v1416_v35 = vmul.f32 %v1412_v32, %v1395_v33  ;;  %v1598_v32 = vld [vmem:[%s2614_s12 + $0x70] sm:$0xff] }
0x1501   :  { %1621 = vmatpush.msrb.mxu2 %v1598_v32 }
0x1502   :  { %1421 = vrot.lane.b32.xlu0 %v1416_v35, %s1955_s2 }
0x1503   :  { %1622 = vmatpush.msrb.mxu2 %v1597_v34 }
0x1505   :  { %1623 = vmatpush.msrb.mxu2 %v1596_v36 }
0x1507   :  { %1624 = vmatpush.msrb.mxu2 %v1595_v37 }
0x1509   :  { %1625 = vmatpush.msrb.mxu2 %v1594_v26 }
0x150b   :  { %1626 = vmatpush.msrb.mxu2 %v1593_v28 }
0x150d   :  { %1627 = vmatpush.msrb.mxu2 %v1592_v38 }
0x150f   :  { %1628 = vmatpush.msrb.mxu2 %v1591_v40 }
0x1516   :  { %v1410_v41 = vpop.permute.xlu0 %1409 }
0x1517   :  { %v1415_v43 = vmul.f32 %v1410_v41, %v1380_v42 }
0x1519   :  { %1419 = vrot.lane.b32.xlu1 %v1415_v43, %s1955_s2 }
0x1574   :  { %v1422_v47 = vpop.permute.xlu0 %1421 }
0x1575   :  { %v2419_v48 = vadd.f32 %v1422_v47, %v1406_v46 }
0x1577   :  { %1906 = vtanh.f32 %v2419_v48 }
0x157d   :  { %v1907_v49 = vpop.eup %1906 }
0x157e   :  { %1433 = vrot.lane.b32.xlu1 %v1907_v49, %s1958_s6 }
0x158b   :  { %v1420_v53 = vpop.permute.xlu1 %1419 }
0x158c   :  { %v2424_v54 = vadd.f32 %v1420_v53, %v1405_v52  ;;  %v1587_v53 = vld [vmem:[%s2614_s12 + $0x18] sm:$0xff] }
0x158e   :  { %1908 = vtanh.f32 %v2424_v54 }
0x1594   :  { %v1909_v59 = vpop.eup %1908 }
0x1595   :  { %1431 = vrot.lane.b32.xlu2 %v1909_v59, %s1958_s6  ;;  %v1586_v59 = vld [vmem:[%s2614_s12 + $0x10] sm:$0xff] }
0x15ef   :  { %v1432_v55 = vpop.permute.xlu2 %1431 }
0x15f0   :  { %v1434_v56 = vpop.permute.xlu1 %1433  ;;  %v1437_v60 = vmul.f32 %v1432_v55, %v1380_v42  ;;  %v1585_v55 = vld [vmem:[%s2614_s12 + $0x8] sm:$0xff] }
0x15f1   :  { %v1438_v61 = vmul.f32 %v1434_v56, %v1395_v33  ;;  %v1584_v56 = vld [vmem:[%s2614_s12] sm:$0xff] }
0x15f2   :  { %v1441_v57 = vrot.slane %v1437_v60, 6  ;;  %v1615_v60 = vld [vmem:[%s2614_s12 + $0xf8] sm:$0xff] }
0x15f3   :  { %v1442_v63 = vrot.slane %v1438_v61, 5  ;;  %1640 = vmatpush.msrb.mxu0 %v1615_v60  ;;  %v1517_v61 = vrot.slane %v2424_v54, 7 }
0x15f5   :  { %v2429_v0 = vsel %vm748_vm5, %v1442_v63, %v1441_v57  ;;  %v1518_v57 = vrot.slane %v2419_v48, 7 }
0x15f6   :  { %1444 = vrot.lane.b32.xlu0 %v2429_v0, %s1955_s2 }
0x1668   :  { %v1445_v50 = vpop.permute.xlu0 %1444 }
0x1669   :  { %1757 = vmatmul.msk.f32.vlgmr.msrb.gmra.mxu3 %vm204_vm11, %v1445_v50 }
0x16ec   :  { %v1465_v58 = vpop.f32.mrf.mxu3 }
0x16ed   :  { %v1469_v2 = vrot.slane %v1465_v58, 1  ;;  %v1470_v3 = vrot.slane %v1465_v58, 2 }
0x16ef   :  { %v1473_v5 = vadd.f32 %v1469_v2, %v2274_v39  ;;  %v1474_v7 = vadd.f32 %v1470_v3, %v2278_v44 }
0x16f1   :  { %1910 = vtanh.f32 %v1473_v5  ;;  %v1758_v10 = vmul.f32 -1.442695, %v1473_v5  ;;  %v1759_v39 = vmul.f32 -1.442695, %v1474_v7 }
0x16f2   :  { %1912 = vtanh.f32 %v1474_v7 }
0x16f3   :  { %1914 = vpow2.f32 %v1758_v10 }
0x16f7   :  { %v1911_v62 = vpop.eup %1910 }
0x16f8   :  { %v1913_v9 = vpop.eup %1912  ;;  %1525 = vrot.lane.b32.xlu2 %v1911_v62, %s1958_s6 }
0x16f9   :  { %1527 = vrot.lane.b32.xlu1 %v1913_v9, %s1958_s6  ;;  %v1915_v11 = vpop.eup %1914 }
0x16fa   :  { %v1481_v6 = vadd.f32 1.0, %v1915_v11 }
0x16fc   :  { %1916 = vrcp.f32 %v1481_v6  ;;  %v1494_v21 = vand.u32 2147483648, %v1481_v6  ;;  %vm1488_vm14 = vweird.f32 %v1481_v6  ;;  %v1492_v22 = vand.u32 2147483647, %v1481_v6 }
0x16fd   :  { %1918 = vpow2.f32 %v1759_v39  ;;  %v1609_v39 = vld [vmem:[%s2614_s12 + $0xc8] sm:$0xff] }
0x16fe   :  { %v1495_v23 = vor.u32 1.1754944e-38, %v1494_v21  ;;  %vm1493_vm0 = vcmp.eq.f32.partialorder %v1492_v22, 8.507059e+37  ;;  %v1602_v21 = vld [vmem:[%s2614_s12 + $0x90] sm:$0xff]  ;;  %v1601_v22 = vld [vmem:[%s2614_s12 + $0x88] sm:$0xff] }
0x1701   :  { %1556 = vrot.lane.b32.xlu1 %v2319_v17, %s1958_s6 }
0x1702   :  { %v1917_v13 = vpop.eup %1916 }
0x1703   :  { %v1484_v14 = vmul.f32 %v1917_v13, %v1481_v6  ;;  %v1919_v16 = vpop.eup %1918  ;;  %vm1489_vm13 = vweird.f32 %v1917_v13  ;;  %v1613_v6 = vld [vmem:[%s2614_s12 + $0xe8] sm:$0xff] }
0x1704   :  { %v1482_v19 = vadd.f32 1.0, %v1919_v16  ;;  %vm1490_vm15 = vmor %vm1488_vm14, %vm1489_vm13  ;;  %v1605_v16 = vld [vmem:[%s2614_s12 + $0xa8] sm:$0xff] }
0x1705   :  { %v1485_v44 = vsub.f32 1.0, %v1484_v14  ;;  %v1608_v14 = vld [vmem:[%s2614_s12 + $0xc0] sm:$0xff] }
0x1706   :  { %1920 = vrcp.f32 %v1482_v19  ;;  %v1509_v42 = vand.u32 2147483648, %v1482_v19  ;;  %vm1503_vm2 = vweird.f32 %v1482_v19  ;;  %v1507_v43 = vand.u32 2147483647, %v1482_v19 }
0x1707   :  { %v1486_v15 = vmul.f32 %v1917_v13, %v1485_v44  ;;  %v1607_v44 = vld [vmem:[%s2614_s12 + $0xb8] sm:$0xff] }
0x1708   :  { %v1510_v47 = vor.u32 1.1754944e-38, %v1509_v42  ;;  %vm1508_vm4 = vcmp.eq.f32.partialorder %v1507_v43, 8.507059e+37  ;;  %v1780_v42 = vld [vmem:[%s2615_s13] ss:$0 sm:$0xff] }
0x1709   :  { %v1487_v20 = vadd.f32 %v1917_v13, %v1486_v15  ;;  %v1606_v15 = vld [vmem:[%s2614_s12 + $0xb0] sm:$0xff] }
0x170b   :  { %v1491_v17 = vsel %vm1490_vm15, %v1917_v13, %v1487_v20  ;;  %v1612_v13 = vld [vmem:[%s2614_s12 + $0xe0] sm:$0xff]  ;;  %v1603_v20 = vld [vmem:[%s2614_s12 + $0x98] sm:$0xff] }
0x170c   :  { %v2440_v25 = vsel %vm1493_vm0, %v1495_v23, %v1491_v17  ;;  %v1921_v33 = vpop.eup %1920  ;;  %v1600_v17 = vld [vmem:[%s2614_s12 + $0x80] sm:$0xff]  ;;  %v1668_v23 = vld [vmem:[%s2616_s14 + $0x38] sm:$0xff] }
0x170d   :  { %v1499_v35 = vmul.f32 %v1921_v33, %v1482_v19  ;;  %vm1504_vm1 = vweird.f32 %v1921_v33  ;;  %v1521_v63 = vmul.f32 %v1517_v61, %v2440_v25  ;;  %v1604_v19 = vld [vmem:[%s2614_s12 + $0xa0] sm:$0xff]  ;;  %1684 = vmatpush.msrb.mxu1 %v1668_v23 }
0x170e   :  { %vm1505_vm3 = vmor %vm1503_vm2, %vm1504_vm1 }
0x170f   :  { %v1500_v18 = vsub.f32 1.0, %v1499_v35 }
0x1711   :  { %v1501_v29 = vmul.f32 %v1921_v33, %v1500_v18 }
0x1713   :  { %v1502_v41 = vadd.f32 %v1921_v33, %v1501_v29 }
0x1715   :  { %v1506_v46 = vsel %vm1505_vm3, %v1921_v33, %v1502_v41  ;;  %v1664_v33 = vld [vmem:[%s2616_s14 + $0x18] sm:$0xff] }
0x1716   :  { %v2481_v51 = vsel %vm1508_vm4, %v1510_v47, %v1506_v46 }
0x1717   :  { %v1522_v50 = vmul.f32 %v1518_v57, %v2481_v51 }
0x1752   :  { %v1526_v24 = vpop.permute.xlu2 %1525 }
0x1753   :  { %v1531_v27 = vmul.f32 %v1526_v24, %v2440_v25  ;;  %v1667_v24 = vld [vmem:[%s2616_s14 + $0x30] sm:$0xff] }
0x1754   :  { %1685 = vmatpush.msrb.mxu1 %v1667_v24 }
0x1755   :  { %1535 = vrot.lane.b32.xlu0 %v1531_v27, %s1955_s2  ;;  %v1666_v27 = vld [vmem:[%s2616_s14 + $0x28] sm:$0xff] }
0x1756   :  { %1686 = vmatpush.msrb.mxu1 %v1666_v27 }
0x1758   :  { %1687 = vmatpush.msrb.mxu1 %v1665_v30 }
0x175a   :  { %1688 = vmatpush.msrb.mxu1 %v1664_v33 }
0x175d   :  { %1559 = vrot.lane.b32.xlu0 %v2341_v12, %s1956_s5  ;;  %v1590_v12 = vld [vmem:[%s2614_s12 + $0x30] sm:$0xff] }
0x175e   :  { %1629 = vmatpush.msrb.mxu2 %v1590_v12  ;;  %v1662_v12 = vld [vmem:[%s2616_s14 + $0x8] sm:$0xff] }
0x1760   :  { %1630 = vmatpush.msrb.mxu2 %v1589_v45 }
0x1765   :  { %1564 = vrot.lane.b32.xlu0 %v2407_v1, %s1958_s6  ;;  %v1588_v1 = vld [vmem:[%s2614_s12 + $0x20] sm:$0xff] }
0x1766   :  { %1631 = vmatpush.msrb.mxu2 %v1588_v1 }
0x1768   :  { %1632 = vmatpush.msrb.mxu2 %v1587_v53 }
0x176a   :  { %1633 = vmatpush.msrb.mxu2 %v1586_v59 }
0x176b   :  { %v1528_v49 = vpop.permute.xlu1 %1527 }
0x176c   :  { %v1532_v52 = vmul.f32 %v1528_v49, %v2481_v51  ;;  %1634 = vmatpush.msrb.mxu2 %v1585_v55 }
0x176e   :  { %1537 = vrot.lane.b32.xlu2 %v1532_v52, %s1955_s2  ;;  %1635 = vmatpush.msrb.mxu2 %v1584_v56 }
0x1773   :  { %v1557_v7 = vpop.permute.xlu1 %1556 }
0x1774   :  { %v1576_v62 = vsel %vm204_vm11, %v2294_v31, %v1557_v7  ;;  %v1614_v31 = vld [vmem:[%s2614_s12 + $0xf0] sm:$0xff] }
0x1775   :  { %1641 = vmatpush.msrb.mxu0 %v1614_v31 }
0x1777   :  { %1642 = vmatpush.msrb.mxu0 %v1613_v6 }
0x1779   :  { %1643 = vmatpush.msrb.mxu0 %v1612_v13 }
0x17c7   :  { %v1536_v58 = vpop.permute.xlu0 %1535 }
0x17c8   :  { %v1538_v2 = vpop.permute.xlu2 %1537  ;;  %v1541_v3 = vadd.f32 %v1536_v58, %v1521_v63 }
0x17c9   :  { %v1542_v5 = vadd.f32 %v1538_v2, %v1522_v50 }
0x17ca   :  { %1922 = vtanh.f32 %v1541_v3 }
0x17cb   :  { %1924 = vtanh.f32 %v1542_v5 }
0x17cf   :  { %v1560_v9 = vpop.permute.xlu0 %1559 }
0x17d0   :  { %v1923_v54 = vpop.eup %1922  ;;  %v1578_v48 = vsel %vm1577_vm6, %v1576_v62, %v1560_v9 }
0x17d1   :  { %v1925_v10 = vpop.eup %1924  ;;  %1547 = vrot.lane.b32.xlu2 %v1923_v54, %s1958_s6  ;;  %v1580_v11 = vsel %vm1579_vm7, %v1578_v48, %v2363_v8  ;;  %v1611_v8 = vld [vmem:[%s2614_s12 + $0xd8] sm:$0xff] }
0x17d2   :  { %1549 = vrot.lane.b32.xlu1 %v1925_v10, %s1958_s6  ;;  %1636 = vmatmul.f32.vlgmr.msrb.gmra.mxu2 %v1580_v11 }
0x17d3   :  { %1644 = vmatpush.msrb.mxu0 %v1611_v8 }
0x17d7   :  { %v1565_v36 = vpop.permute.xlu0 %1564 }
0x17d8   :  { %v1581_v29 = vsel %vm204_vm11, %v2386_v4, %v1565_v36  ;;  %v1661_v4 = vld [vmem:[%s2616_s14] sm:$0xff]  ;;  %vm1696_vm11 = vcmask 254976  }
0x17d9   :  { %1567 = vrot.lane.b32.xlu2 %v2429_v0, %s1956_s5  ;;  %v1610_v0 = vld [vmem:[%s2614_s12 + $0xd0] sm:$0xff] }
0x17da   :  { %1645 = vmatpush.msrb.mxu0 %v1610_v0 }
0x17dc   :  { %1646 = vmatpush.msrb.mxu0 %v1609_v39 }
0x17de   :  { %1647 = vmatpush.msrb.mxu0 %v1608_v14 }
0x17e0   :  { %1648 = vmatpush.msrb.mxu0 %v1607_v44 }
0x17e2   :  { %1649 = vmatpush.msrb.mxu0 %v1606_v15 }
0x17e4   :  { %1650 = vmatpush.msrb.mxu0 %v1605_v16 }
0x17e6   :  { %1651 = vmatpush.msrb.mxu0 %v1604_v19 }
0x17e8   :  { %1652 = vmatpush.msrb.mxu0 %v1603_v20 }
0x17ea   :  { %1653 = vmatpush.msrb.mxu0 %v1602_v21 }
0x17ec   :  { %1654 = vmatpush.msrb.mxu0 %v1601_v22 }
0x17ee   :  { %1655 = vmatpush.msrb.mxu0 %v1600_v17 }
0x182b   :  { %v1548_v32 = vpop.permute.xlu2 %1547 }
0x182c   :  { %v1553_v34 = vmul.f32 %v1548_v32, %v2440_v25  ;;  %v1663_v25 = vld [vmem:[%s2616_s14 + $0x10] sm:$0xff] }
0x182d   :  { %1689 = vmatpush.msrb.mxu1 %v1663_v25 }
0x182e   :  { %v1572_v26 = vrot.slane %v1553_v34, 7 }
0x182f   :  { %1690 = vmatpush.msrb.mxu1 %v1662_v12 }
0x1831   :  { %1691 = vmatpush.msrb.mxu1 %v1661_v4 }
0x1833   :  { %v1568_v18 = vpop.permute.xlu2 %1567 }
0x1834   :  { %v1582_v38 = vsel %vm1577_vm6, %v1581_v29, %v1568_v18 }
0x1844   :  { %v1550_v35 = vpop.permute.xlu1 %1549 }
0x1845   :  { %v1554_v37 = vmul.f32 %v1550_v35, %v2481_v51  ;;  %v1781_v51 = vld [vmem:[%s2617_s15] ss:$0 sm:$0xff] }
0x1847   :  { %v1573_v28 = vrot.slane %v1554_v37, 6 }
0x1849   :  { %v1574_v40 = vsel %vm748_vm5, %v1573_v28, %v1572_v26 }
0x184a   :  { %v1583_v41 = vsel %vm1579_vm7, %v1582_v38, %v1574_v40 }
0x184b   :  { %1656 = vmatmul.f32.vlgmr.msrb.gmra.mxu0 %v1583_v41 }
0x1855   :  { %v1637_v43 = vpop.f32.mrf.mxu2 }
0x1856   :  { %v1638_v45 = vadd.f32 %v1780_v42, %v1637_v43 }
0x18c8   :  { %v1657_v46 = vpop.f32.mrf.mxu0 }
0x18c9   :  { %v1658_v47 = vadd.f32 %v1657_v46, %v1638_v45 }
0x18cb   :  { %v1660_v49 = vmax.f32 %v1658_v47, 0.0 }
0x18cd   :  { %1760 = vmatmul.msk.f32.vlgmr.msrb.gmra.mxu1 %vm1577_vm6, %v1660_v49 }
0x194a   :  { %v1693_v52 = vpop.f32.mrf.mxu1 }
0x194b   :  { %v1694_v1 = vadd.f32 %v1781_v51, %v1693_v52 }
0x194d   :  { %1697 = vst.msk [vmem:[#allocation2] sm:$0x3] %vm1696_vm11, %v1694_v1 }
0x194e   :  { %1708 = dma.vmem_to_hbm [thread:$0]  %s1704_s24, 32, %s1706_s18, [#allocation3]  }
0x194f   :  { %1950 = dma.done.wait [#allocation3], 32  }
0x1950   :  { %1951 = vsyncadd [#allocation3], 4294967264 }
0x1951   :  { %1713 = vsyncpa [#allocation3], 1 }

// kernel: tpu_custom_call.1
= control target key start
LH: loop header
LB: loop body
LE: loop exit
PB: predicated region body
PF: predicated region fallthrough
CT: control target
= control target key end

     0   :  { %s2602_s0 = inlined_call_operand.vmem [shape: f32[2,8,4], index: 0, kind: input, shape index: {}]   ;;  %s2603_s1 = inlined_call_operand.vmem [shape: f32[12,16], index: 1, kind: input, shape index: {}]   ;;  %s2604_s2 = inlined_call_operand.vmem [shape: f32[1,16], index: 2, kind: input, shape index: {}]   ;;  %s2605_s3 = inlined_call_operand.vmem [shape: f32[48,32], index: 3, kind: input, shape index: {}]   ;;  %s2606_s4 = inlined_call_operand.vmem [shape: f32[1,32], index: 4, kind: input, shape index: {}]   ;;  %s2607_s5 = inlined_call_operand.vmem [shape: f32[32,96], index: 5, kind: input, shape index: {}]   ;;  %s2608_s6 = inlined_call_operand.vmem [shape: f32[1,96], index: 6, kind: input, shape index: {}]   ;;  %s2609_s7 = inlined_call_operand.vmem [shape: f32[32,32], index: 7, kind: input, shape index: {}]   ;;  %s2610_s8 = inlined_call_operand.vmem [shape: f32[1,32], index: 8, kind: input, shape index: {}]   ;;  %s2611_s9 = inlined_call_operand.vmem [shape: f32[32,128], index: 9, kind: input, shape index: {}]   ;;  %s2612_s10 = inlined_call_operand.vmem [shape: f32[32,128], index: 10, kind: input, shape index: {}]   ;;  %s2613_s11 = inlined_call_operand.vmem [shape: f32[1,128], index: 11, kind: input, shape index: {}]   ;;  %s2614_s12 = inlined_call_operand.vmem [shape: f32[256,64], index: 12, kind: input, shape index: {}]   ;;  %s2615_s13 = inlined_call_operand.vmem [shape: f32[1,64], index: 13, kind: input, shape index: {}]   ;;  %s2616_s14 = inlined_call_operand.vmem [shape: f32[64,32], index: 14, kind: input, shape index: {}]   ;;  %s2617_s15 = inlined_call_operand.vmem [shape: f32[1,32], index: 15, kind: input, shape index: {}]   ;;  %s2618_s16 = inlined_call_operand.hbm [shape: f32[2,32], index: 16, kind: output, shape index: {}]  }
   0x1   :  { %2620 = sst [smem:[#allocation5_spill]] %s2602_s0 }
   0x2   :  { %s2621_s23 = sld [smem:[#allocation5_spill]]  ;;  %v56_v2 = vlaneseq  ;;  %s1952_s26 = smov 4  }
   0x4   :  { %v57_v5 = vshrl.u32 %v56_v2, 7 }
   0x6   :  { %v63_v6 = vand.u32 7, %v57_v5  ;;  %vm100_vm0 = vcmp.lt.s32.totalorder %v57_v5, 7  ;;  %v58_v7 = vadd.s32 8, %v57_v5 }
   0x8   :  { %v54_v0 = vld [vmem:[%s2621_s23] sm:$0xff]  ;;  %v55_v1 = vld [vmem:[%s2621_s23 + $0x8] sm:$0xff] }
   0x9   :  { %111 = vrot.lane.b32.xlu0 %v54_v0, %s1952_s26  ;;  %v98_v3 = vrot.slane %v54_v0, 1  ;;  %113 = vrot.lane.b32.xlu1 %v55_v1, %s1952_s26  ;;  %v99_v4 = vrot.slane %v55_v1, 1 }
   0xb   :  { %v101_v8 = vsel %vm100_vm0, %v98_v3, %v99_v4 }
   0xc   :  { %21 = vsyncpa [#allocation3], 0  ;;  %vm2053_vm1 = vcmp.le.s32.totalorder %v63_v6, 6  ;;  %v70_v10 = vand.u32 7, %v58_v7  ;;  %v102_v11 = vsel %vm100_vm0, %v99_v4, %v98_v3  ;;  %s1953_s27 = smov 8   ;;  %v87_v15 = vrot.slane %v54_v0, 7 }
   0xd   :  { %v107_v12 = vsel %vm2053_vm1, %v101_v8, 0.0  ;;  %v88_v16 = vrot.slane %v55_v1, 7  ;;  %vm89_vm3 = vcmp.lt.s32.totalorder %v57_v5, 1  ;;  %v132_v19 = vld [vmem:[%s2603_s1 + $0x8] sm:$0xf]  ;;  %vm144_vm4 = vcmask 1043456  }
   0xe   :  { %vm2060_vm2 = vcmp.le.s32.totalorder %v70_v10, 6  ;;  %1714 = vmatpush.msk.msra.mxu3 %vm144_vm4, %v132_v19  ;;  %v131_v20 = vld [vmem:[%s2603_s1] sm:$0xff]  ;;  %vm2074_vm5 = vcmp.ge.s32.totalorder %v63_v6, 1  ;;  %vm125_vm6 = vcmask 31744   ;;  %vm128_vm7 = vcmask 64512   ;;  %s1954_s18 = smov 16  }
   0xf   :  { %v108_v14 = vsel %vm2060_vm2, %v102_v11, 0.0  ;;  %v91_v17 = vsel %vm89_vm3, %v88_v16, %v87_v15  ;;  %v90_v18 = vsel %vm89_vm3, %v87_v15, %v88_v16  ;;  %vm137_vm8 = vcmask 97280   ;;  %v1775_v33 = vld [vmem:[%s2604_s2] ss:$0 sm:$0xff]  ;;  %s1955_s2 = smov 32   ;;  %v212_v50 = vld [vmem:[%s2605_s3 + $0x28] sm:$0xff] }
  0x10   :  { %163 = vmatpush.msra.mxu3 %v131_v20  ;;  %v96_v24 = vsel %vm2074_vm5, %v91_v17, 0.0  ;;  %vm2080_vm9 = vcmp.ge.s32.totalorder %v70_v10, 1  ;;  %v211_v51 = vld [vmem:[%s2605_s3 + $0x20] sm:$0xff]  ;;  %234 = vmatpush.msra.mxu1 %v212_v50  ;;  %v210_v52 = vld [vmem:[%s2605_s3 + $0x18] sm:$0xff]  ;;  %v209_v53 = vld [vmem:[%s2605_s3 + $0x10] sm:$0xff]  ;;  %vm201_vm10 = vcmask 130048  }
  0x11   :  { %119 = vrot.lane.b32.xlu0 %v107_v12, %s1953_s27  ;;  %121 = vrot.lane.b32.xlu1 %v108_v14, %s1953_s27  ;;  %v97_v29 = vsel %vm2080_vm9, %v90_v18, 0.0  ;;  %v208_v54 = vld [vmem:[%s2605_s3 + $0x8] sm:$0xff]  ;;  %v207_v55 = vld [vmem:[%s2605_s3] sm:$0xff]  ;;  %vm204_vm11 = vcmask 261120   ;;  %vm217_vm12 = vcmask 392192   ;;  %s1960_s23 = smov [#allocation2]  }
  0x12   :  { %235 = vmatpush.msra.mxu1 %v211_v51  ;;  %v252_v57 = vld [vmem:[%s2607_s5 + $0x18] sm:$0xff]  ;;  %v251_v3 = vld [vmem:[%s2607_s5 + $0x10] sm:$0xff]  ;;  %v250_v4 = vld [vmem:[%s2607_s5 + $0x8] sm:$0xff]  ;;  %s1703_s24 = sshll.u32 %s1960_s23, 4  ;;  %s1704_s24 = int_to_ptr.vmem [resolvable:$true] %s1703_s24 }
  0x13   :  { %275 = vmatpush.msra.mxu2 %v252_v57  ;;  %v249_v5 = vld [vmem:[%s2607_s5] sm:$0xff]  ;;  %s1956_s5 = smov 96  }
  0x14   :  { %236 = vmatpush.msra.mxu1 %v210_v52  ;;  %v1776_v6 = vld [vmem:[%s2606_s4] ss:$0 sm:$0xff]  ;;  %s1957_s4 = smov 112  }
  0x15   :  { %276 = vmatpush.msra.mxu2 %v251_v3  ;;  %v1777_v13 = vld [vmem:[%s2608_s6] ss:$0 sm:$0xff]  ;;  %s1958_s6 = smov 64  }
  0x16   :  { %237 = vmatpush.msra.mxu1 %v209_v53 }
  0x17   :  { %277 = vmatpush.msra.mxu2 %v250_v4 }
  0x18   :  { %238 = vmatpush.msra.mxu1 %v208_v54 }
  0x19   :  { %278 = vmatpush.msra.mxu2 %v249_v5 }
  0x1a   :  { %239 = vmatpush.msra.mxu1 %v207_v55 }
  0x7b   :  { %v112_v21 = vpop.permute.xlu0 %111  ;;  %v114_v23 = vpop.permute.xlu1 %113 }
  0x7c   :  { %v126_v25 = vsel %vm125_vm6, %v96_v24, %v112_v21  ;;  %v127_v30 = vsel %vm125_vm6, %v97_v29, %v114_v23 }
  0x83   :  { %v120_v27 = vpop.permute.xlu0 %119  ;;  %v122_v31 = vpop.permute.xlu1 %121 }
  0x84   :  { %v129_v28 = vsel %vm128_vm7, %v126_v25, %v120_v27  ;;  %v130_v32 = vsel %vm128_vm7, %v127_v30, %v122_v31 }
  0x85   :  { %1715 = vmatmul.msk.f32.vlgmr.msra.gmra.mxu3 %vm137_vm8, %v129_v28 }
  0x8d   :  { %1716 = vmatmul.msk.f32.gmra.mxu3 %vm137_vm8, %v130_v32 }
 0x108   :  { %v165_v34 = vpop.f32.mrf.mxu3 }
 0x109   :  { %v166_v35 = vadd.f32 %v1775_v33, %v165_v34 }
 0x10b   :  { %v171_v36 = vmax.f32 %v166_v35, 0.0 }
 0x10d   :  { %187 = vrot.lane.b32.xlu2 %v171_v36, %s1954_s18  ;;  %v173_v40 = vrot.slane %v171_v36, 7  ;;  %v179_v41 = vrot.slane %v171_v36, 1 }
 0x110   :  { %v168_v37 = vpop.f32.mrf.mxu3 }
 0x111   :  { %v169_v38 = vadd.f32 %v1775_v33, %v168_v37 }
 0x113   :  { %v172_v39 = vmax.f32 %v169_v38, 0.0 }
 0x115   :  { %v174_v42 = vrot.slane %v172_v39, 7  ;;  %v180_v43 = vrot.slane %v172_v39, 1  ;;  %189 = vrot.lane.b32.xlu0 %v172_v39, %s1954_s18 }
 0x117   :  { %v182_v44 = vsel %vm100_vm0, %v180_v43, %v179_v41  ;;  %v181_v45 = vsel %vm100_vm0, %v179_v41, %v180_v43  ;;  %v176_v46 = vsel %vm89_vm3, %v174_v42, %v173_v40  ;;  %v175_v47 = vsel %vm89_vm3, %v173_v40, %v174_v42 }
 0x118   :  { %v184_v48 = vsel %vm2060_vm2, %v182_v44, 0.0  ;;  %v183_v49 = vsel %vm2053_vm1, %v181_v45, 0.0  ;;  %v177_v58 = vsel %vm2074_vm5, %v176_v46, 0.0  ;;  %v178_v63 = vsel %vm2080_vm9, %v175_v47, 0.0 }
 0x119   :  { %197 = vrot.lane.b32.xlu1 %v184_v48, %s1955_s2  ;;  %195 = vrot.lane.b32.xlu2 %v183_v49, %s1955_s2  ;;  %vm748_vm5 = vcmask 1041409  }
 0x167   :  { %v188_v56 = vpop.permute.xlu2 %187 }
 0x168   :  { %v202_v59 = vsel %vm201_vm10, %v177_v58, %v188_v56 }
 0x173   :  { %v196_v60 = vpop.permute.xlu2 %195 }
 0x174   :  { %v205_v61 = vsel %vm204_vm11, %v202_v59, %v196_v60 }
 0x175   :  { %1717 = vmatmul.msk.f32.vlgmr.msra.gmra.mxu1 %vm217_vm12, %v205_v61 }
 0x187   :  { %v190_v62 = vpop.permute.xlu0 %189 }
 0x188   :  { %v203_v0 = vsel %vm201_vm10, %v178_v63, %v190_v62 }
 0x18b   :  { %v198_v1 = vpop.permute.xlu1 %197 }
 0x18c   :  { %v206_v2 = vsel %vm204_vm11, %v203_v0, %v198_v1 }
 0x18d   :  { %1718 = vmatmul.msk.f32.gmra.mxu1 %vm217_vm12, %v206_v2 }
 0x1f2   :  { %v241_v7 = vpop.f32.mrf.mxu1 }
 0x1f3   :  { %v242_v8 = vadd.f32 %v1776_v6, %v241_v7 }
 0x1f5   :  { %v247_v9 = vmax.f32 %v242_v8, 0.0 }
 0x1f7   :  { %1719 = vmatmul.msk.f32.vlgmr.msra.gmra.mxu2 %vm204_vm11, %v247_v9 }
 0x20a   :  { %v244_v10 = vpop.f32.mrf.mxu1 }
 0x20b   :  { %v245_v11 = vadd.f32 %v1776_v6, %v244_v10  ;;  %v567_v10 = vld [vmem:[%s2609_s7 + $0x18] sm:$0xff] }
 0x20c   :  { %590 = vmatpush.msrb.mxu2 %v567_v10 }
 0x20d   :  { %v248_v12 = vmax.f32 %v245_v11, 0.0  ;;  %v566_v11 = vld [vmem:[%s2609_s7 + $0x10] sm:$0xff] }
 0x20e   :  { %591 = vmatpush.msrb.mxu2 %v566_v11 }
 0x20f   :  { %1720 = vmatmul.msk.f32.gmra.mxu2 %vm204_vm11, %v248_v12  ;;  %v565_v12 = vld [vmem:[%s2609_s7 + $0x8] sm:$0xff] }
 0x210   :  { %592 = vmatpush.msrb.mxu2 %v565_v12 }
 0x27a   :  { %v280_v14 = vpop.f32.mrf.mxu2 }
 0x27b   :  { %v2149_v15 = vadd.f32 %v1777_v13, %v280_v14 }
 0x27d   :  { %298 = vrot.lane.b32.xlu1 %v2149_v15, %s1956_s5  ;;  %288 = vrot.lane.b32.xlu0 %v2149_v15, %s1957_s4  ;;  %v294_v21 = vmul.f32 0.25, %v2149_v15 }
 0x292   :  { %v283_v16 = vpop.f32.mrf.mxu2 }
 0x293   :  { %v2154_v17 = vadd.f32 %v1777_v13, %v283_v16  ;;  %v604_v16 = vld [vmem:[%s2611_s9 + $0x18] sm:$0xff] }
 0x295   :  { %290 = vrot.lane.b32.xlu2 %v2154_v17, %s1957_s4  ;;  %v295_v23 = vmul.f32 0.25, %v2154_v17 }
 0x29d   :  { %325 = vrot.lane.b32.xlu2 %v2154_v17, %s1956_s5 }
 0x2ef   :  { %v299_v18 = vpop.permute.xlu1 %298  ;;  %v289_v19 = vpop.permute.xlu0 %288 }
 0x2f0   :  { %v291_v20 = vpop.permute.xlu2 %290  ;;  %1721 = vmatpush.xpose.msk.msrb.mxu3 %vm201_vm10, %v299_v18  ;;  %352 = vrot.lane.b32.xlu1 %v289_v19, %s1956_s5  ;;  %v296_v26 = vmul.f32 0.25, %v289_v19  ;;  %v2211_v18 = vld [vmem:[%s2612_s10 + $0x18] sm:$0xff] }
 0x2f1   :  { %379 = vrot.lane.b32.xlu0 %v291_v20, %s1956_s5  ;;  %v297_v27 = vmul.f32 0.25, %v291_v20  ;;  %v1770_v30 = vpack.i.bf16 %v291_v20, %v289_v19 }
 0x2f3   :  { %1722 = vmatmul.msk.f32.vlgmr.msrb.gmra.mxu3 %vm201_vm10, %v294_v21 }
 0x2f8   :  { %v326_v22 = vpop.permute.xlu2 %325 }
 0x2f9   :  { %1723 = vmatpush.xpose.msk.msra.mxu3 %vm201_vm10, %v326_v22 }
 0x2fc   :  { %1724 = vmatmul.msk.f32.vlgmr.msra.gmra.mxu3 %vm201_vm10, %v295_v23 }
 0x362   :  { %v353_v24 = vpop.permute.xlu1 %352 }
 0x363   :  { %v380_v25 = vpop.permute.xlu0 %379  ;;  %1725 = vmatpush.xpose.msk.msra.mxu0 %vm201_vm10, %v353_v24 }
 0x364   :  { %1727 = vmatpush.xpose.msk.msrb.mxu3 %vm201_vm10, %v380_v25  ;;  %v602_v25 = vld [vmem:[%s2611_s9 + $0x8] sm:$0xff] }
 0x366   :  { %1726 = vmatmul.msk.f32.vlgmr.msra.gmra.mxu0 %vm201_vm10, %v296_v26  ;;  %v2226_v26 = vld [vmem:[%s2612_s10 + $0x10] sm:$0xff] }
 0x367   :  { %1728 = vmatmul.msk.f32.vlgmr.msrb.gmra.mxu3 %vm201_vm10, %v297_v27  ;;  %v601_v27 = vld [vmem:[%s2611_s9] sm:$0xff] }
 0x376   :  { %v322_v28 = vpop.f32.mrf.mxu3 }
 0x377   :  { %v406_v29 = vsel %vm128_vm7, %v322_v28, -inf }
 0x378   :  { %407 = vmax.xlane.f32.xlu1 %v406_v29  ;;  %v2243_v29 = vld [vmem:[%s2612_s10] sm:$0xff] }
 0x37f   :  { %v349_v31 = vpop.f32.mrf.mxu3 }
 0x380   :  { %v409_v36 = vsel %vm128_vm7, %v349_v31, -inf }
 0x391   :  { %1771 = vrot.lane.b32.xlu1 %v1770_v30, %s1958_s6  ;;  %v1959_v30 = vmov 0.0  }
 0x3e3   :  { %v376_v32 = vpop.f32.mrf.mxu0 }
 0x3e4   :  { %v412_v33 = vsel %vm128_vm7, %v376_v32, -inf }
 0x3e5   :  { %413 = vmax.xlane.f32.xlu2 %v412_v33 }
 0x3ea   :  { %v403_v34 = vpop.f32.mrf.mxu3 }
 0x3eb   :  { %v415_v35 = vsel %vm128_vm7, %v403_v34, -inf  ;;  %v408_v37 = vpop.xlane.xlu1 %407 }
 0x3ec   :  { %416 = vmax.xlane.f32.xlu0 %v415_v35  ;;  %v418_v43 = vsub.f32 %v322_v28, %v408_v37  ;;  %v2235_v28 = vld [vmem:[%s2612_s10 + $0x8] sm:$0xff] }
 0x3ed   :  { %410 = vmax.xlane.f32.xlu2 %v409_v36  ;;  %v1779_v36 = vld [vmem:[%s2613_s11] ss:$0 sm:$0xff] }
 0x3ee   :  { %v422_v45 = vmul.f32 1.442695, %v418_v43 }
 0x403   :  { %v1772_v38 = vpop.permute.xlu1 %1771 }
 0x404   :  { %v1774_v39 = vunpack.i.h.bf16 %v1772_v38  ;;  %v1773_v40 = vunpack.i.l.bf16 %v1772_v38 }
 0x406   :  { %523 = vmatpush.msrb.mxu1 %v1773_v40  ;;  %549 = vmatpush.msra.mxu3 %v1774_v39 }
 0x408   :  { %657 = vmatpush.msra.mxu1 %v2211_v18  ;;  %766 = vmatpush.msrb.mxu3 %v2211_v18 }
 0x40a   :  { %658 = vmatpush.msra.mxu1 %v2226_v26  ;;  %767 = vmatpush.msrb.mxu3 %v2226_v26 }
 0x40c   :  { %659 = vmatpush.msra.mxu1 %v2235_v28  ;;  %768 = vmatpush.msrb.mxu3 %v2235_v28 }
 0x40e   :  { %660 = vmatpush.msra.mxu1 %v2243_v29  ;;  %769 = vmatpush.msrb.mxu3 %v2243_v29 }
 0x458   :  { %v414_v41 = vpop.xlane.xlu2 %413 }
 0x459   :  { %v420_v42 = vsub.f32 %v376_v32, %v414_v41 }
 0x45b   :  { %v426_v44 = vmul.f32 1.442695, %v420_v42 }
 0x45d   :  { %1782 = vpow2.f32 %v426_v44 }
 0x45e   :  { %1784 = vpow2.f32 %v422_v45 }
 0x45f   :  { %v417_v46 = vpop.xlane.xlu0 %416 }
 0x460   :  { %v421_v47 = vsub.f32 %v403_v34, %v417_v46  ;;  %v411_v48 = vpop.xlane.xlu2 %410 }
 0x461   :  { %v419_v50 = vsub.f32 %v349_v31, %v411_v48  ;;  %v1778_v31 = vld [vmem:[%s2610_s8] ss:$0 sm:$0xff] }
 0x462   :  { %v428_v49 = vmul.f32 1.442695, %v421_v47 }
 0x463   :  { %v1783_v51 = vpop.eup %1782  ;;  %v424_v53 = vmul.f32 1.442695, %v419_v50 }
 0x464   :  { %1786 = vpow2.f32 %v428_v49  ;;  %v436_v52 = vsel %vm128_vm7, %v1783_v51, 0.0  ;;  %v1785_v54 = vpop.eup %1784 }
 0x465   :  { %437 = vadd.xlane.f32.xlu2 %v436_v52  ;;  %1788 = vpow2.f32 %v424_v53  ;;  %v430_v57 = vsel %vm128_vm7, %v1785_v54, 0.0 }
 0x46a   :  { %v1787_v55 = vpop.eup %1786 }
 0x46b   :  { %v439_v56 = vsel %vm128_vm7, %v1787_v55, 0.0  ;;  %v1789_v58 = vpop.eup %1788 }
 0x46c   :  { %440 = vadd.xlane.f32.xlu0 %v439_v56  ;;  %v433_v59 = vsel %vm128_vm7, %v1789_v58, 0.0 }
 0x46d   :  { %431 = vadd.xlane.f32.xlu2 %v430_v57 }
 0x474   :  { %434 = vadd.xlane.f32.xlu0 %v433_v59 }
 0x485   :  { %450 = vrot.lane.b32.xlu2 %v2149_v15, %s1958_s6  ;;  %v564_v15 = vld [vmem:[%s2609_s7] sm:$0xff] }
 0x486   :  { %593 = vmatpush.msrb.mxu2 %v564_v15 }
 0x488   :  { %476 = vrot.lane.b32.xlu0 %v2154_v17, %s1958_s6  ;;  %v603_v17 = vld [vmem:[%s2611_s9 + $0x10] sm:$0xff]  ;;  %1112 = vmatpush.msra.mxu2 %v2211_v18 }
 0x48a   :  { %1113 = vmatpush.msra.mxu2 %v2226_v26 }
 0x48c   :  { %1114 = vmatpush.msra.mxu2 %v2235_v28 }
 0x48e   :  { %1115 = vmatpush.msra.mxu2 %v2243_v29 }
 0x4d8   :  { %v438_v60 = vpop.xlane.xlu2 %437 }
 0x4d9   :  { %1790 = vrcp.f32 %v438_v60 }
 0x4df   :  { %v1791_v61 = vpop.eup %1790  ;;  %v441_v62 = vpop.xlane.xlu0 %440 }
 0x4e0   :  { %1792 = vrcp.f32 %v441_v62  ;;  %v432_v63 = vpop.xlane.xlu2 %431  ;;  %v448_v0 = vmul.f32 %v1791_v61, %v1783_v51 }
 0x4e1   :  { %1794 = vrcp.f32 %v432_v63 }
 0x4e2   :  { %1731 = vmatmul.msk.f32.vlgmr.msrb.gmra.mxu1 %vm128_vm7, %v448_v0 }
 0x4e3   :  { %880 = vmatpush.msrb.mxu1 %v2211_v18 }
 0x4e5   :  { %881 = vmatpush.msrb.mxu1 %v2226_v26 }
 0x4e6   :  { %v1793_v1 = vpop.eup %1792 }
 0x4e7   :  { %v1795_v2 = vpop.eup %1794  ;;  %v449_v3 = vmul.f32 %v1793_v1, %v1787_v55  ;;  %v435_v6 = vpop.xlane.xlu0 %434  ;;  %882 = vmatpush.msrb.mxu1 %v2235_v28 }
 0x4e8   :  { %v451_v4 = vpop.permute.xlu2 %450  ;;  %v446_v5 = vmul.f32 %v1795_v2, %v1785_v54  ;;  %1796 = vrcp.f32 %v435_v6 }
 0x4e9   :  { %1732 = vmatmul.msk.f32.vlgmr.msra.gmra.mxu3 %vm128_vm7, %v449_v3  ;;  %471 = vmatpush.msrb.mxu0 %v451_v4 }
 0x4ea   :  { %1729 = vmatmul.msk.f32.vlgmr.msrb.gmra.mxu0 %vm128_vm7, %v446_v5  ;;  %661 = vmatmul.f32.vlgmr.msra.gmra.mxu1 %v1959_v30 }
 0x4eb   :  { %996 = vmatpush.msra.mxu3 %v2211_v18  ;;  %883 = vmatpush.msrb.mxu1 %v2243_v29 }
 0x4ed   :  { %997 = vmatpush.msra.mxu3 %v2226_v26  ;;  %1344 = vmatpush.msra.mxu1 %v2211_v18 }
 0x4ee   :  { %v1797_v7 = vpop.eup %1796 }
 0x4ef   :  { %v447_v8 = vmul.f32 %v1797_v7, %v1789_v58  ;;  %998 = vmatpush.msra.mxu3 %v2235_v28  ;;  %1345 = vmatpush.msra.mxu1 %v2226_v26 }
 0x4f1   :  { %999 = vmatpush.msra.mxu3 %v2243_v29  ;;  %1346 = vmatpush.msra.mxu1 %v2235_v28 }
 0x4f3   :  { %1347 = vmatpush.msra.mxu1 %v2243_v29 }
 0x4fa   :  { %v477_v9 = vpop.permute.xlu0 %476 }
 0x4fb   :  { %497 = vmatpush.msra.mxu0 %v477_v9 }
 0x4fc   :  { %1730 = vmatmul.msk.f32.vlgmr.msra.gmra.mxu0 %vm128_vm7, %v447_v8 }
 0x4fd   :  { %627 = vmatpush.msrb.mxu0 %v604_v16 }
 0x4ff   :  { %628 = vmatpush.msrb.mxu0 %v603_v17 }
 0x501   :  { %629 = vmatpush.msrb.mxu0 %v602_v25 }
 0x503   :  { %630 = vmatpush.msrb.mxu0 %v601_v27 }
 0x505   :  { %1228 = vmatpush.msra.mxu0 %v2211_v18 }
 0x507   :  { %1229 = vmatpush.msra.mxu0 %v2226_v26 }
 0x509   :  { %1230 = vmatpush.msra.mxu0 %v2235_v28 }
 0x50b   :  { %1231 = vmatpush.msra.mxu0 %v2243_v29 }
 0x55f   :  { %v525_v13 = vpop.f32.mrf.mxu1 }
 0x560   :  { %556 = vrot.lane.b32.xlu1 %v525_v13, %s1954_s18 }
 0x567   :  { %v473_v19 = vpop.f32.mrf.mxu0  ;;  %v662_v38 = vpop.f32.mrf.mxu1 }
 0x568   :  { %v666_v42 = vrot.slane %v662_v38, 1 }
 0x56c   :  { %v551_v14 = vpop.f32.mrf.mxu3 }
 0x56d   :  { %558 = vrot.lane.b32.xlu1 %v551_v14, %s1954_s18  ;;  %s1705_s18 = sshll.u32 %s2618_s16, 4  ;;  %s1706_s18 = int_to_ptr.hbm [resolvable:$true] %s1705_s18 }
 0x579   :  { %v499_v22 = vpop.f32.mrf.mxu0 }
 0x5d2   :  { %v557_v20 = vpop.permute.xlu1 %556 }
 0x5d3   :  { %v562_v21 = vsel %vm201_vm10, %v473_v19, %v557_v20 }
 0x5d4   :  { %1733 = vmatmul.msk.f32.vlgmr.msrb.gmra.mxu2 %vm204_vm11, %v562_v21 }
 0x5df   :  { %v559_v23 = vpop.permute.xlu1 %558 }
 0x5e0   :  { %v563_v24 = vsel %vm201_vm10, %v499_v22, %v559_v23 }
 0x5e1   :  { %1734 = vmatmul.msk.f32.gmra.mxu2 %vm204_vm11, %v563_v24 }
 0x657   :  { %v595_v32 = vpop.f32.mrf.mxu2 }
 0x658   :  { %v596_v33 = vadd.f32 %v1778_v31, %v595_v32 }
 0x65a   :  { %1735 = vmatmul.msk.f32.vlgmr.msrb.gmra.mxu0 %vm204_vm11, %v596_v33 }
 0x664   :  { %v598_v34 = vpop.f32.mrf.mxu2 }
 0x665   :  { %v599_v35 = vadd.f32 %v1778_v31, %v598_v34 }
 0x667   :  { %1736 = vmatmul.msk.f32.gmra.mxu0 %vm204_vm11, %v599_v35 }
 0x6d7   :  { %v632_v37 = vpop.f32.mrf.mxu0 }
 0x6d8   :  { %v2274_v39 = vadd.f32 %v1779_v36, %v632_v37 }
 0x6da   :  { %v669_v40 = vadd.f32 %v662_v38, %v2274_v39 }
 0x6dc   :  { %1798 = vtanh.f32 %v669_v40  ;;  %v1737_v47 = vmul.f32 -1.442695, %v669_v40 }
 0x6e2   :  { %v1799_v41 = vpop.eup %1798 }
 0x6e3   :  { %715 = vrot.lane.b32.xlu2 %v1799_v41, %s1958_s6 }
 0x6e4   :  { %v635_v43 = vpop.f32.mrf.mxu0 }
 0x6e5   :  { %v2278_v44 = vadd.f32 %v1779_v36, %v635_v43 }
 0x6e7   :  { %v670_v45 = vadd.f32 %v666_v42, %v2278_v44 }
 0x6e9   :  { %1800 = vtanh.f32 %v670_v45  ;;  %v1738_v54 = vmul.f32 -1.442695, %v670_v45 }
 0x6ea   :  { %1802 = vpow2.f32 %v1737_v47 }
 0x6ef   :  { %v1801_v46 = vpop.eup %1800 }
 0x6f0   :  { %717 = vrot.lane.b32.xlu0 %v1801_v46, %s1958_s6  ;;  %v1803_v48 = vpop.eup %1802 }
 0x6f1   :  { %v677_v49 = vadd.f32 1.0, %v1803_v48 }
 0x6f3   :  { %1804 = vrcp.f32 %v677_v49  ;;  %v690_v56 = vand.u32 2147483648, %v677_v49  ;;  %vm684_vm14 = vweird.f32 %v677_v49  ;;  %v688_v57 = vand.u32 2147483647, %v677_v49 }
 0x6f4   :  { %1806 = vpow2.f32 %v1738_v54 }
 0x6f5   :  { %v691_v59 = vor.u32 1.1754944e-38, %v690_v56  ;;  %vm689_vm0 = vcmp.eq.f32.partialorder %v688_v57, 8.507059e+37 }
 0x6f9   :  { %v1805_v50 = vpop.eup %1804 }
 0x6fa   :  { %v680_v51 = vmul.f32 %v1805_v50, %v677_v49  ;;  %vm685_vm13 = vweird.f32 %v1805_v50  ;;  %v1807_v63 = vpop.eup %1806 }
 0x6fb   :  { %vm686_vm15 = vmor %vm684_vm14, %vm685_vm13  ;;  %v678_v0 = vadd.f32 1.0, %v1807_v63 }
 0x6fc   :  { %v681_v52 = vsub.f32 1.0, %v680_v51 }
 0x6fd   :  { %1808 = vrcp.f32 %v678_v0  ;;  %v705_v6 = vand.u32 2147483648, %v678_v0  ;;  %vm699_vm2 = vweird.f32 %v678_v0  ;;  %v703_v7 = vand.u32 2147483647, %v678_v0 }
 0x6fe   :  { %v682_v53 = vmul.f32 %v1805_v50, %v681_v52 }
 0x6ff   :  { %v706_v9 = vor.u32 1.1754944e-38, %v705_v6  ;;  %vm704_vm4 = vcmp.eq.f32.partialorder %v703_v7, 8.507059e+37 }
 0x700   :  { %v683_v55 = vadd.f32 %v1805_v50, %v682_v53 }
 0x702   :  { %v687_v58 = vsel %vm686_vm15, %v1805_v50, %v683_v55 }
 0x703   :  { %v692_v61 = vsel %vm689_vm0, %v691_v59, %v687_v58  ;;  %v1809_v1 = vpop.eup %1808 }
 0x704   :  { %v695_v2 = vmul.f32 %v1809_v1, %v678_v0  ;;  %vm700_vm1 = vweird.f32 %v1809_v1  ;;  %v711_v13 = vmul.f32 0.0, %v692_v61 }
 0x705   :  { %vm701_vm3 = vmor %vm699_vm2, %vm700_vm1 }
 0x706   :  { %v696_v3 = vsub.f32 1.0, %v695_v2 }
 0x708   :  { %v697_v4 = vmul.f32 %v1809_v1, %v696_v3 }
 0x70a   :  { %v698_v5 = vadd.f32 %v1809_v1, %v697_v4 }
 0x70c   :  { %v702_v8 = vsel %vm701_vm3, %v1809_v1, %v698_v5 }
 0x70d   :  { %v707_v11 = vsel %vm704_vm4, %v706_v9, %v702_v8 }
 0x70e   :  { %v712_v17 = vmul.f32 0.0, %v707_v11 }
 0x73d   :  { %v716_v60 = vpop.permute.xlu2 %715 }
 0x73e   :  { %v721_v62 = vmul.f32 %v716_v60, %v692_v61 }
 0x740   :  { %725 = vrot.lane.b32.xlu0 %v721_v62, %s1955_s2 }
 0x762   :  { %v718_v10 = vpop.permute.xlu0 %717 }
 0x763   :  { %v722_v12 = vmul.f32 %v718_v10, %v707_v11 }
 0x765   :  { %727 = vrot.lane.b32.xlu1 %v722_v12, %s1955_s2 }
 0x7b2   :  { %v726_v14 = vpop.permute.xlu0 %725 }
 0x7b3   :  { %v2284_v15 = vadd.f32 %v726_v14, %v711_v13 }
 0x7b5   :  { %1810 = vtanh.f32 %v2284_v15  ;;  %v822_v4 = vrot.slane %v2284_v15, 7 }
 0x7bb   :  { %v1811_v16 = vpop.eup %1810 }
 0x7bc   :  { %737 = vrot.lane.b32.xlu1 %v1811_v16, %s1958_s6 }
 0x7d7   :  { %v728_v19 = vpop.permute.xlu1 %727 }
 0x7d8   :  { %v2288_v20 = vadd.f32 %v728_v19, %v712_v17 }
 0x7da   :  { %1812 = vtanh.f32 %v2288_v20  ;;  %v823_v2 = vrot.slane %v2288_v20, 7 }
 0x7e0   :  { %v1813_v21 = vpop.eup %1812 }
 0x7e1   :  { %739 = vrot.lane.b32.xlu2 %v1813_v21, %s1958_s6 }
 0x82e   :  { %v738_v22 = vpop.permute.xlu1 %737 }
 0x82f   :  { %v743_v25 = vmul.f32 %v738_v22, %v692_v61 }
 0x83b   :  { %v740_v23 = vpop.permute.xlu2 %739 }
 0x83c   :  { %v744_v24 = vmul.f32 %v740_v23, %v707_v11 }
 0x83e   :  { %v747_v27 = vrot.slane %v744_v24, 7 }
 0x840   :  { %v749_v30 = vsel %vm748_vm5, %v747_v27, %v743_v25 }
 0x841   :  { %750 = vrot.lane.b32.xlu0 %v749_v30, %s1955_s2 }
 0x8b3   :  { %v2294_v31 = vpop.permute.xlu0 %750 }
 0x8b4   :  { %1739 = vmatmul.msk.f32.vlgmr.msrb.gmra.mxu3 %vm204_vm11, %v2294_v31 }
 0x8b5   :  { %1460 = vmatpush.msrb.mxu3 %v2211_v18 }
 0x8b7   :  { %1461 = vmatpush.msrb.mxu3 %v2226_v26 }
 0x8b9   :  { %1462 = vmatpush.msrb.mxu3 %v2235_v28 }
 0x8bb   :  { %1463 = vmatpush.msrb.mxu3 %v2243_v29 }
 0x937   :  { %v771_v32 = vpop.f32.mrf.mxu3 }
 0x938   :  { %v775_v33 = vrot.slane %v771_v32, 7  ;;  %v779_v34 = vadd.f32 %v771_v32, %v2278_v44 }
 0x93a   :  { %v778_v35 = vadd.f32 %v775_v33, %v2274_v39  ;;  %1814 = vtanh.f32 %v779_v34  ;;  %v1741_v29 = vmul.f32 -1.442695, %v779_v34 }
 0x93c   :  { %1816 = vtanh.f32 %v778_v35  ;;  %v1740_v18 = vmul.f32 -1.442695, %v778_v35 }
 0x93e   :  { %1818 = vpow2.f32 %v1740_v18 }
 0x940   :  { %v1815_v36 = vpop.eup %1814 }
 0x941   :  { %832 = vrot.lane.b32.xlu1 %v1815_v36, %s1958_s6 }
 0x942   :  { %v1817_v37 = vpop.eup %1816 }
 0x943   :  { %830 = vrot.lane.b32.xlu2 %v1817_v37, %s1958_s6 }
 0x944   :  { %v1819_v26 = vpop.eup %1818 }
 0x945   :  { %v786_v28 = vadd.f32 1.0, %v1819_v26 }
 0x947   :  { %1820 = vrcp.f32 %v786_v28  ;;  %v799_v47 = vand.u32 2147483648, %v786_v28  ;;  %vm793_vm7 = vweird.f32 %v786_v28  ;;  %v797_v48 = vand.u32 2147483647, %v786_v28 }
 0x948   :  { %1822 = vpow2.f32 %v1741_v29 }
 0x949   :  { %v800_v50 = vor.u32 1.1754944e-38, %v799_v47  ;;  %vm798_vm9 = vcmp.eq.f32.partialorder %v797_v48, 8.507059e+37 }
 0x94d   :  { %v1821_v38 = vpop.eup %1820 }
 0x94e   :  { %v789_v40 = vmul.f32 %v1821_v38, %v786_v28  ;;  %v1823_v42 = vpop.eup %1822  ;;  %vm794_vm6 = vweird.f32 %v1821_v38 }
 0x94f   :  { %v787_v43 = vadd.f32 1.0, %v1823_v42  ;;  %vm795_vm8 = vmor %vm793_vm7, %vm794_vm6 }
 0x950   :  { %v790_v41 = vsub.f32 1.0, %v789_v40 }
 0x951   :  { %1824 = vrcp.f32 %v787_v43  ;;  %v814_v59 = vand.u32 2147483648, %v787_v43  ;;  %vm808_vm12 = vweird.f32 %v787_v43  ;;  %v812_v60 = vand.u32 2147483647, %v787_v43 }
 0x952   :  { %v791_v45 = vmul.f32 %v1821_v38, %v790_v41 }
 0x953   :  { %v815_v62 = vor.u32 1.1754944e-38, %v814_v59  ;;  %vm813_vm14 = vcmp.eq.f32.partialorder %v812_v60, 8.507059e+37 }
 0x954   :  { %v792_v46 = vadd.f32 %v1821_v38, %v791_v45 }
 0x956   :  { %v796_v49 = vsel %vm795_vm8, %v1821_v38, %v792_v46 }
 0x957   :  { %v1825_v51 = vpop.eup %1824  ;;  %v801_v53 = vsel %vm798_vm9, %v800_v50, %v796_v49 }
 0x958   :  { %v804_v55 = vmul.f32 %v1825_v51, %v787_v43  ;;  %vm809_vm10 = vweird.f32 %v1825_v51  ;;  %v826_v7 = vmul.f32 %v822_v4, %v801_v53 }
 0x959   :  { %vm810_vm13 = vmor %vm808_vm12, %vm809_vm10 }
 0x95a   :  { %v805_v56 = vsub.f32 1.0, %v804_v55 }
 0x95c   :  { %v806_v57 = vmul.f32 %v1825_v51, %v805_v56 }
 0x95e   :  { %v807_v58 = vadd.f32 %v1825_v51, %v806_v57 }
 0x960   :  { %v811_v61 = vsel %vm810_vm13, %v1825_v51, %v807_v58 }
 0x961   :  { %v816_v0 = vsel %vm813_vm14, %v815_v62, %v811_v61 }
 0x962   :  { %v827_v3 = vmul.f32 %v823_v2, %v816_v0 }
 0x99d   :  { %v831_v52 = vpop.permute.xlu2 %830 }
 0x99e   :  { %v836_v54 = vmul.f32 %v831_v52, %v801_v53 }
 0x9a0   :  { %840 = vrot.lane.b32.xlu0 %v836_v54, %s1955_s2 }
 0x9b3   :  { %v833_v63 = vpop.permute.xlu1 %832 }
 0x9b4   :  { %v837_v1 = vmul.f32 %v833_v63, %v816_v0 }
 0x9b6   :  { %842 = vrot.lane.b32.xlu2 %v837_v1, %s1955_s2 }
 0xa10   :  { %v843_v5 = vpop.permute.xlu2 %842 }
 0xa11   :  { %v2310_v6 = vadd.f32 %v843_v5, %v827_v3 }
 0xa12   :  { %v841_v8 = vpop.permute.xlu0 %840 }
 0xa13   :  { %1826 = vtanh.f32 %v2310_v6  ;;  %v2313_v9 = vadd.f32 %v841_v8, %v826_v7 }
 0xa15   :  { %1828 = vtanh.f32 %v2313_v9  ;;  %v937_v59 = vrot.slane %v2313_v9, 7 }
 0xa19   :  { %v1827_v10 = vpop.eup %1826 }
 0xa1a   :  { %854 = vrot.lane.b32.xlu0 %v1827_v10, %s1958_s6 }
 0xa1b   :  { %v1829_v11 = vpop.eup %1828 }
 0xa1c   :  { %852 = vrot.lane.b32.xlu1 %v1829_v11, %s1958_s6 }
 0xa8c   :  { %v855_v12 = vpop.permute.xlu0 %854 }
 0xa8d   :  { %v859_v15 = vmul.f32 %v855_v12, %v816_v0  ;;  %v938_v0 = vrot.slane %v2310_v6, 7 }
 0xa8e   :  { %v853_v13 = vpop.permute.xlu1 %852 }
 0xa8f   :  { %v858_v14 = vmul.f32 %v853_v13, %v801_v53 }
 0xa91   :  { %v862_v16 = vrot.slane %v858_v14, 1 }
 0xa93   :  { %v2319_v17 = vsel %vm748_vm5, %v859_v15, %v862_v16 }
 0xa94   :  { %864 = vrot.lane.b32.xlu2 %v2319_v17, %s1955_s2 }
 0xaee   :  { %v865_v19 = vpop.permute.xlu2 %864 }
 0xaef   :  { %1742 = vmatmul.msk.f32.vlgmr.msrb.gmra.mxu1 %vm204_vm11, %v865_v19 }
 0xb6c   :  { %v885_v20 = vpop.f32.mrf.mxu1 }
 0xb6d   :  { %v889_v21 = vrot.slane %v885_v20, 6  ;;  %v890_v22 = vrot.slane %v885_v20, 7 }
 0xb6f   :  { %v893_v23 = vadd.f32 %v889_v21, %v2274_v39  ;;  %v894_v24 = vadd.f32 %v890_v22, %v2278_v44 }
 0xb71   :  { %1830 = vtanh.f32 %v893_v23  ;;  %v1743_v30 = vmul.f32 -1.442695, %v893_v23  ;;  %v1744_v32 = vmul.f32 -1.442695, %v894_v24 }
 0xb72   :  { %1832 = vtanh.f32 %v894_v24 }
 0xb73   :  { %1834 = vpow2.f32 %v1743_v30 }
 0xb74   :  { %1836 = vpow2.f32 %v1744_v32 }
 0xb77   :  { %v1831_v25 = vpop.eup %1830 }
 0xb78   :  { %v1833_v27 = vpop.eup %1832  ;;  %945 = vrot.lane.b32.xlu1 %v1831_v25, %s1958_s6 }
 0xb79   :  { %947 = vrot.lane.b32.xlu0 %v1833_v27, %s1958_s6  ;;  %v1835_v33 = vpop.eup %1834 }
 0xb7a   :  { %v1837_v34 = vpop.eup %1836  ;;  %v901_v35 = vadd.f32 1.0, %v1835_v33 }
 0xb7b   :  { %v902_v36 = vadd.f32 1.0, %v1837_v34 }
 0xb7c   :  { %1838 = vrcp.f32 %v901_v35  ;;  %v914_v45 = vand.u32 2147483648, %v901_v35  ;;  %vm908_vm1 = vweird.f32 %v901_v35  ;;  %v912_v47 = vand.u32 2147483647, %v901_v35 }
 0xb7d   :  { %1840 = vrcp.f32 %v902_v36  ;;  %v929_v46 = vand.u32 2147483648, %v902_v36  ;;  %vm923_vm2 = vweird.f32 %v902_v36  ;;  %v927_v48 = vand.u32 2147483647, %v902_v36 }
 0xb7e   :  { %v915_v51 = vor.u32 1.1754944e-38, %v914_v45  ;;  %vm913_vm6 = vcmp.eq.f32.partialorder %v912_v47, 8.507059e+37 }
 0xb7f   :  { %v930_v52 = vor.u32 1.1754944e-38, %v929_v46  ;;  %vm928_vm7 = vcmp.eq.f32.partialorder %v927_v48, 8.507059e+37 }
 0xb82   :  { %v1839_v37 = vpop.eup %1838 }
 0xb83   :  { %v1841_v18 = vpop.eup %1840  ;;  %v904_v26 = vmul.f32 %v1839_v37, %v901_v35  ;;  %vm909_vm15 = vweird.f32 %v1839_v37 }
 0xb84   :  { %v919_v28 = vmul.f32 %v1841_v18, %v902_v36  ;;  %vm924_vm0 = vweird.f32 %v1841_v18  ;;  %vm910_vm3 = vmor %vm908_vm1, %vm909_vm15 }
 0xb85   :  { %v905_v29 = vsub.f32 1.0, %v904_v26  ;;  %vm925_vm4 = vmor %vm923_vm2, %vm924_vm0 }
 0xb86   :  { %v920_v38 = vsub.f32 1.0, %v919_v28 }
 0xb87   :  { %v906_v40 = vmul.f32 %v1839_v37, %v905_v29 }
 0xb88   :  { %v921_v41 = vmul.f32 %v1841_v18, %v920_v38 }
 0xb89   :  { %v907_v42 = vadd.f32 %v1839_v37, %v906_v40 }
 0xb8a   :  { %v922_v43 = vadd.f32 %v1841_v18, %v921_v41 }
 0xb8b   :  { %v911_v49 = vsel %vm910_vm3, %v1839_v37, %v907_v42 }
 0xb8c   :  { %v926_v50 = vsel %vm925_vm4, %v1841_v18, %v922_v43  ;;  %v916_v54 = vsel %vm913_vm6, %v915_v51, %v911_v49 }
 0xb8d   :  { %v931_v56 = vsel %vm928_vm7, %v930_v52, %v926_v50  ;;  %v941_v60 = vmul.f32 %v937_v59, %v916_v54 }
 0xb8e   :  { %v942_v1 = vmul.f32 %v938_v0, %v931_v56 }
 0xbea   :  { %v946_v53 = vpop.permute.xlu1 %945 }
 0xbeb   :  { %v948_v55 = vpop.permute.xlu0 %947  ;;  %v951_v57 = vmul.f32 %v946_v53, %v916_v54 }
 0xbec   :  { %v952_v58 = vmul.f32 %v948_v55, %v931_v56 }
 0xbed   :  { %955 = vrot.lane.b32.xlu2 %v951_v57, %s1955_s2 }
 0xbee   :  { %957 = vrot.lane.b32.xlu1 %v952_v58, %s1955_s2 }
 0xc47   :  { %v956_v61 = vpop.permute.xlu2 %955 }
 0xc48   :  { %v2331_v62 = vadd.f32 %v956_v61, %v941_v60 }
 0xc4a   :  { %1842 = vtanh.f32 %v2331_v62  ;;  %v1053_v59 = vrot.slane %v2331_v62, 7 }
 0xc50   :  { %v1843_v63 = vpop.eup %1842 }
 0xc51   :  { %967 = vrot.lane.b32.xlu0 %v1843_v63, %s1958_s6 }
 0xc60   :  { %v958_v2 = vpop.permute.xlu1 %957 }
 0xc61   :  { %v2336_v3 = vadd.f32 %v958_v2, %v942_v1 }
 0xc63   :  { %1844 = vtanh.f32 %v2336_v3 }
 0xc69   :  { %v1845_v4 = vpop.eup %1844 }
 0xc6a   :  { %969 = vrot.lane.b32.xlu2 %v1845_v4, %s1958_s6 }
 0xcc3   :  { %v968_v5 = vpop.permute.xlu0 %967 }
 0xcc4   :  { %v970_v7 = vpop.permute.xlu2 %969  ;;  %v973_v8 = vmul.f32 %v968_v5, %v916_v54  ;;  %v1054_v54 = vrot.slane %v2336_v3, 7 }
 0xcc5   :  { %v974_v9 = vmul.f32 %v970_v7, %v931_v56 }
 0xcc6   :  { %v977_v10 = vrot.slane %v973_v8, 2 }
 0xcc7   :  { %v978_v11 = vrot.slane %v974_v9, 1 }
 0xcc9   :  { %v2341_v12 = vsel %vm748_vm5, %v978_v11, %v977_v10 }
 0xcca   :  { %980 = vrot.lane.b32.xlu1 %v2341_v12, %s1955_s2 }
 0xd3c   :  { %v981_v6 = vpop.permute.xlu1 %980 }
 0xd3d   :  { %1745 = vmatmul.msk.f32.vlgmr.msra.gmra.mxu3 %vm204_vm11, %v981_v6 }
 0xdc0   :  { %v1001_v13 = vpop.f32.mrf.mxu3 }
 0xdc1   :  { %v1005_v14 = vrot.slane %v1001_v13, 5  ;;  %v1006_v15 = vrot.slane %v1001_v13, 6 }
 0xdc3   :  { %v1009_v16 = vadd.f32 %v1005_v14, %v2274_v39  ;;  %v1010_v19 = vadd.f32 %v1006_v15, %v2278_v44 }
 0xdc5   :  { %1846 = vtanh.f32 %v1009_v16  ;;  %v1747_v22 = vmul.f32 -1.442695, %v1010_v19  ;;  %v1746_v27 = vmul.f32 -1.442695, %v1009_v16 }
 0xdc6   :  { %1848 = vtanh.f32 %v1010_v19 }
 0xdc7   :  { %1850 = vpow2.f32 %v1747_v22 }
 0xdcb   :  { %v1847_v20 = vpop.eup %1846 }
 0xdcc   :  { %v1849_v21 = vpop.eup %1848  ;;  %1061 = vrot.lane.b32.xlu0 %v1847_v20, %s1958_s6 }
 0xdcd   :  { %1063 = vrot.lane.b32.xlu2 %v1849_v21, %s1958_s6  ;;  %v1851_v23 = vpop.eup %1850 }
 0xdce   :  { %v1018_v24 = vadd.f32 1.0, %v1851_v23 }
 0xdd0   :  { %1852 = vrcp.f32 %v1018_v24  ;;  %v1045_v37 = vand.u32 2147483648, %v1018_v24  ;;  %vm1039_vm9 = vweird.f32 %v1018_v24  ;;  %v1043_v18 = vand.u32 2147483647, %v1018_v24 }
 0xdd1   :  { %1854 = vpow2.f32 %v1746_v27 }
 0xdd2   :  { %v1046_v28 = vor.u32 1.1754944e-38, %v1045_v37  ;;  %vm1044_vm12 = vcmp.eq.f32.partialorder %v1043_v18, 8.507059e+37 }
 0xdd6   :  { %v1853_v25 = vpop.eup %1852 }
 0xdd7   :  { %v1035_v30 = vmul.f32 %v1853_v25, %v1018_v24  ;;  %v1855_v33 = vpop.eup %1854  ;;  %vm1040_vm8 = vweird.f32 %v1853_v25 }
 0xdd8   :  { %v1017_v35 = vadd.f32 1.0, %v1855_v33  ;;  %vm1041_vm10 = vmor %vm1039_vm9, %vm1040_vm8 }
 0xdd9   :  { %v1036_v32 = vsub.f32 1.0, %v1035_v30 }
 0xdda   :  { %1856 = vrcp.f32 %v1017_v35  ;;  %v1030_v47 = vand.u32 2147483648, %v1017_v35  ;;  %vm1024_vm14 = vweird.f32 %v1017_v35  ;;  %v1028_v48 = vand.u32 2147483647, %v1017_v35 }
 0xddb   :  { %v1037_v34 = vmul.f32 %v1853_v25, %v1036_v32 }
 0xddc   :  { %v1031_v50 = vor.u32 1.1754944e-38, %v1030_v47  ;;  %vm1029_vm0 = vcmp.eq.f32.partialorder %v1028_v48, 8.507059e+37 }
 0xddd   :  { %v1038_v36 = vadd.f32 %v1853_v25, %v1037_v34 }
 0xddf   :  { %v1042_v26 = vsel %vm1041_vm10, %v1853_v25, %v1038_v36 }
 0xde0   :  { %v1047_v38 = vsel %vm1044_vm12, %v1046_v28, %v1042_v26  ;;  %v1857_v40 = vpop.eup %1856 }
 0xde1   :  { %v1020_v42 = vmul.f32 %v1857_v40, %v1017_v35  ;;  %vm1025_vm13 = vweird.f32 %v1857_v40  ;;  %v1058_v55 = vmul.f32 %v1054_v54, %v1047_v38 }
 0xde2   :  { %vm1026_vm15 = vmor %vm1024_vm14, %vm1025_vm13 }
 0xde3   :  { %v1021_v43 = vsub.f32 1.0, %v1020_v42 }
 0xde5   :  { %v1022_v45 = vmul.f32 %v1857_v40, %v1021_v43 }
 0xde7   :  { %v1023_v46 = vadd.f32 %v1857_v40, %v1022_v45 }
 0xde9   :  { %v1027_v49 = vsel %vm1026_vm15, %v1857_v40, %v1023_v46 }
 0xdea   :  { %v1032_v52 = vsel %vm1029_vm0, %v1031_v50, %v1027_v49 }
 0xdeb   :  { %v1057_v60 = vmul.f32 %v1053_v59, %v1032_v52 }
 0xe27   :  { %v1064_v29 = vpop.permute.xlu2 %1063 }
 0xe28   :  { %v1068_v41 = vmul.f32 %v1064_v29, %v1047_v38 }
 0xe2a   :  { %1073 = vrot.lane.b32.xlu0 %v1068_v41, %s1955_s2 }
 0xe3e   :  { %v1062_v51 = vpop.permute.xlu0 %1061 }
 0xe3f   :  { %v1067_v53 = vmul.f32 %v1062_v51, %v1032_v52 }
 0xe41   :  { %1071 = vrot.lane.b32.xlu1 %v1067_v53, %s1955_s2 }
 0xe9c   :  { %v1074_v56 = vpop.permute.xlu0 %1073 }
 0xe9d   :  { %v2353_v57 = vadd.f32 %v1074_v56, %v1058_v55 }
 0xe9f   :  { %1858 = vtanh.f32 %v2353_v57  ;;  %v1170_v51 = vrot.slane %v2353_v57, 7 }
 0xea5   :  { %v1859_v58 = vpop.eup %1858 }
 0xea6   :  { %1085 = vrot.lane.b32.xlu1 %v1859_v58, %s1958_s6 }
 0xeb3   :  { %v1072_v61 = vpop.permute.xlu1 %1071 }
 0xeb4   :  { %v2358_v63 = vadd.f32 %v1072_v61, %v1057_v60 }
 0xeb6   :  { %1860 = vtanh.f32 %v2358_v63  ;;  %v1169_v50 = vrot.slane %v2358_v63, 7 }
 0xebc   :  { %v1861_v0 = vpop.eup %1860 }
 0xebd   :  { %1083 = vrot.lane.b32.xlu2 %v1861_v0, %s1958_s6 }
 0xf17   :  { %v1084_v1 = vpop.permute.xlu2 %1083 }
 0xf18   :  { %v1086_v2 = vpop.permute.xlu1 %1085  ;;  %v1089_v3 = vmul.f32 %v1084_v1, %v1032_v52 }
 0xf19   :  { %v1090_v4 = vmul.f32 %v1086_v2, %v1047_v38 }
 0xf1a   :  { %v1093_v5 = vrot.slane %v1089_v3, 3 }
 0xf1b   :  { %v1094_v7 = vrot.slane %v1090_v4, 2 }
 0xf1d   :  { %v2363_v8 = vsel %vm748_vm5, %v1094_v7, %v1093_v5 }
 0xf1e   :  { %1096 = vrot.lane.b32.xlu0 %v2363_v8, %s1955_s2 }
 0xf90   :  { %v1097_v62 = vpop.permute.xlu0 %1096 }
 0xf91   :  { %1748 = vmatmul.msk.f32.vlgmr.msra.gmra.mxu2 %vm204_vm11, %v1097_v62 }
0x1014   :  { %v1117_v9 = vpop.f32.mrf.mxu2 }
0x1015   :  { %v1121_v10 = vrot.slane %v1117_v9, 4  ;;  %v1122_v11 = vrot.slane %v1117_v9, 5 }
0x1017   :  { %v1125_v6 = vadd.f32 %v1121_v10, %v2274_v39  ;;  %v1126_v13 = vadd.f32 %v1122_v11, %v2278_v44 }
0x1019   :  { %1862 = vtanh.f32 %v1125_v6  ;;  %v1749_v16 = vmul.f32 -1.442695, %v1125_v6  ;;  %v1750_v22 = vmul.f32 -1.442695, %v1126_v13 }
0x101a   :  { %1864 = vtanh.f32 %v1126_v13 }
0x101b   :  { %1866 = vpow2.f32 %v1749_v16 }
0x101f   :  { %v1863_v14 = vpop.eup %1862 }
0x1020   :  { %v1865_v15 = vpop.eup %1864  ;;  %1177 = vrot.lane.b32.xlu2 %v1863_v14, %s1958_s6 }
0x1021   :  { %1179 = vrot.lane.b32.xlu1 %v1865_v15, %s1958_s6  ;;  %v1867_v19 = vpop.eup %1866 }
0x1022   :  { %v1133_v20 = vadd.f32 1.0, %v1867_v19 }
0x1024   :  { %1868 = vrcp.f32 %v1133_v20  ;;  %v1146_v33 = vand.u32 2147483648, %v1133_v20  ;;  %vm1140_vm2 = vweird.f32 %v1133_v20  ;;  %v1144_v34 = vand.u32 2147483647, %v1133_v20 }
0x1025   :  { %1870 = vpow2.f32 %v1750_v22 }
0x1026   :  { %v1147_v36 = vor.u32 1.1754944e-38, %v1146_v33  ;;  %vm1145_vm4 = vcmp.eq.f32.partialorder %v1144_v34, 8.507059e+37 }
0x102a   :  { %v1869_v21 = vpop.eup %1868 }
0x102b   :  { %v1136_v23 = vmul.f32 %v1869_v21, %v1133_v20  ;;  %v1871_v27 = vpop.eup %1870  ;;  %vm1141_vm1 = vweird.f32 %v1869_v21 }
0x102c   :  { %v1134_v30 = vadd.f32 1.0, %v1871_v27  ;;  %vm1142_vm3 = vmor %vm1140_vm2, %vm1141_vm1 }
0x102d   :  { %v1137_v24 = vsub.f32 1.0, %v1136_v23 }
0x102e   :  { %1872 = vrcp.f32 %v1134_v30  ;;  %v1161_v42 = vand.u32 2147483648, %v1134_v30  ;;  %vm1155_vm7 = vweird.f32 %v1134_v30  ;;  %v1159_v43 = vand.u32 2147483647, %v1134_v30 }
0x102f   :  { %v1138_v25 = vmul.f32 %v1869_v21, %v1137_v24 }
0x1030   :  { %v1162_v46 = vor.u32 1.1754944e-38, %v1161_v42  ;;  %vm1160_vm9 = vcmp.eq.f32.partialorder %v1159_v43, 8.507059e+37 }
0x1031   :  { %v1139_v32 = vadd.f32 %v1869_v21, %v1138_v25 }
0x1033   :  { %v1143_v35 = vsel %vm1142_vm3, %v1869_v21, %v1139_v32 }
0x1034   :  { %v1148_v18 = vsel %vm1145_vm4, %v1147_v36, %v1143_v35  ;;  %v1873_v28 = vpop.eup %1872 }
0x1035   :  { %v1151_v29 = vmul.f32 %v1873_v28, %v1134_v30  ;;  %vm1156_vm6 = vweird.f32 %v1873_v28  ;;  %v1173_v52 = vmul.f32 %v1169_v50, %v1148_v18 }
0x1036   :  { %vm1157_vm8 = vmor %vm1155_vm7, %vm1156_vm6 }
0x1037   :  { %v1152_v38 = vsub.f32 1.0, %v1151_v29 }
0x1039   :  { %v1153_v40 = vmul.f32 %v1873_v28, %v1152_v38 }
0x103b   :  { %v1154_v41 = vadd.f32 %v1873_v28, %v1153_v40 }
0x103d   :  { %v1158_v45 = vsel %vm1157_vm8, %v1873_v28, %v1154_v41 }
0x103e   :  { %v1163_v48 = vsel %vm1160_vm9, %v1162_v46, %v1158_v45 }
0x103f   :  { %v1174_v53 = vmul.f32 %v1170_v51, %v1163_v48 }
0x107a   :  { %v1178_v37 = vpop.permute.xlu2 %1177 }
0x107b   :  { %v1183_v26 = vmul.f32 %v1178_v37, %v1148_v18 }
0x107d   :  { %1187 = vrot.lane.b32.xlu0 %v1183_v26, %s1955_s2 }
0x1093   :  { %v1180_v47 = vpop.permute.xlu1 %1179 }
0x1094   :  { %v1184_v49 = vmul.f32 %v1180_v47, %v1163_v48 }
0x1096   :  { %1189 = vrot.lane.b32.xlu2 %v1184_v49, %s1955_s2 }
0x10ef   :  { %v1188_v54 = vpop.permute.xlu0 %1187 }
0x10f0   :  { %v1190_v55 = vpop.permute.xlu2 %1189  ;;  %v2376_v56 = vadd.f32 %v1188_v54, %v1173_v52 }
0x10f1   :  { %v2378_v58 = vadd.f32 %v1190_v55, %v1174_v53 }
0x10f2   :  { %1874 = vtanh.f32 %v2376_v56  ;;  %v1285_v47 = vrot.slane %v2376_v56, 7 }
0x10f3   :  { %1876 = vtanh.f32 %v2378_v58  ;;  %v1286_v52 = vrot.slane %v2378_v58, 7 }
0x10f8   :  { %v1875_v59 = vpop.eup %1874 }
0x10f9   :  { %v1877_v60 = vpop.eup %1876  ;;  %1199 = vrot.lane.b32.xlu1 %v1875_v59, %s1958_s6 }
0x10fa   :  { %1201 = vrot.lane.b32.xlu0 %v1877_v60, %s1958_s6 }
0x116b   :  { %v1200_v61 = vpop.permute.xlu1 %1199 }
0x116c   :  { %v1202_v57 = vpop.permute.xlu0 %1201  ;;  %v1205_v63 = vmul.f32 %v1200_v61, %v1148_v18 }
0x116d   :  { %v1206_v0 = vmul.f32 %v1202_v57, %v1163_v48 }
0x116e   :  { %v1209_v1 = vrot.slane %v1205_v63, 4 }
0x116f   :  { %v1210_v2 = vrot.slane %v1206_v0, 3 }
0x1171   :  { %v1211_v3 = vsel %vm748_vm5, %v1210_v2, %v1209_v1 }
0x1172   :  { %1212 = vrot.lane.b32.xlu2 %v1211_v3, %s1955_s2 }
0x11cc   :  { %v2386_v4 = vpop.permute.xlu2 %1212 }
0x11cd   :  { %1751 = vmatmul.msk.f32.vlgmr.msra.gmra.mxu0 %vm204_vm11, %v2386_v4 }
0x124a   :  { %v1233_v5 = vpop.f32.mrf.mxu0 }
0x124b   :  { %v1237_v7 = vrot.slane %v1233_v5, 3  ;;  %v1238_v62 = vrot.slane %v1233_v5, 4 }
0x124d   :  { %v1241_v9 = vadd.f32 %v1237_v7, %v2274_v39  ;;  %v1242_v10 = vadd.f32 %v1238_v62, %v2278_v44 }
0x124f   :  { %1878 = vtanh.f32 %v1241_v9  ;;  %v1752_v13 = vmul.f32 -1.442695, %v1241_v9  ;;  %v1753_v14 = vmul.f32 -1.442695, %v1242_v10 }
0x1250   :  { %1880 = vtanh.f32 %v1242_v10 }
0x1251   :  { %1882 = vpow2.f32 %v1752_v13 }
0x1252   :  { %1884 = vpow2.f32 %v1753_v14 }
0x1255   :  { %v1879_v11 = vpop.eup %1878 }
0x1256   :  { %v1881_v6 = vpop.eup %1880  ;;  %1293 = vrot.lane.b32.xlu1 %v1879_v11, %s1958_s6 }
0x1257   :  { %1295 = vrot.lane.b32.xlu0 %v1881_v6, %s1958_s6  ;;  %v1883_v15 = vpop.eup %1882 }
0x1258   :  { %v1885_v16 = vpop.eup %1884  ;;  %v1249_v19 = vadd.f32 1.0, %v1883_v15 }
0x1259   :  { %v1250_v20 = vadd.f32 1.0, %v1885_v16 }
0x125a   :  { %1886 = vrcp.f32 %v1249_v19  ;;  %v1262_v35 = vand.u32 2147483648, %v1249_v19  ;;  %vm1256_vm13 = vweird.f32 %v1249_v19  ;;  %v1260_v37 = vand.u32 2147483647, %v1249_v19 }
0x125b   :  { %1888 = vrcp.f32 %v1250_v20  ;;  %v1277_v36 = vand.u32 2147483648, %v1250_v20  ;;  %vm1271_vm14 = vweird.f32 %v1250_v20  ;;  %v1275_v18 = vand.u32 2147483647, %v1250_v20 }
0x125c   :  { %v1263_v29 = vor.u32 1.1754944e-38, %v1262_v35  ;;  %vm1261_vm1 = vcmp.eq.f32.partialorder %v1260_v37, 8.507059e+37 }
0x125d   :  { %v1278_v38 = vor.u32 1.1754944e-38, %v1277_v36  ;;  %vm1276_vm2 = vcmp.eq.f32.partialorder %v1275_v18, 8.507059e+37 }
0x1260   :  { %v1887_v21 = vpop.eup %1886 }
0x1261   :  { %v1889_v22 = vpop.eup %1888  ;;  %v1252_v23 = vmul.f32 %v1887_v21, %v1249_v19  ;;  %vm1257_vm10 = vweird.f32 %v1887_v21 }
0x1262   :  { %v1267_v24 = vmul.f32 %v1889_v22, %v1250_v20  ;;  %vm1272_vm12 = vweird.f32 %v1889_v22  ;;  %vm1258_vm15 = vmor %vm1256_vm13, %vm1257_vm10 }
0x1263   :  { %v1253_v25 = vsub.f32 1.0, %v1252_v23  ;;  %vm1273_vm0 = vmor %vm1271_vm14, %vm1272_vm12 }
0x1264   :  { %v1268_v27 = vsub.f32 1.0, %v1267_v24 }
0x1265   :  { %v1254_v30 = vmul.f32 %v1887_v21, %v1253_v25 }
0x1266   :  { %v1269_v32 = vmul.f32 %v1889_v22, %v1268_v27 }
0x1267   :  { %v1255_v33 = vadd.f32 %v1887_v21, %v1254_v30 }
0x1268   :  { %v1270_v34 = vadd.f32 %v1889_v22, %v1269_v32 }
0x1269   :  { %v1259_v26 = vsel %vm1258_vm15, %v1887_v21, %v1255_v33 }
0x126a   :  { %v1274_v28 = vsel %vm1273_vm0, %v1889_v22, %v1270_v34  ;;  %v1264_v41 = vsel %vm1261_vm1, %v1263_v29, %v1259_v26 }
0x126b   :  { %v1279_v43 = vsel %vm1276_vm2, %v1278_v38, %v1274_v28  ;;  %v1289_v48 = vmul.f32 %v1285_v47, %v1264_v41 }
0x126c   :  { %v1290_v53 = vmul.f32 %v1286_v52, %v1279_v43 }
0x12c8   :  { %v1294_v40 = vpop.permute.xlu1 %1293 }
0x12c9   :  { %v1296_v42 = vpop.permute.xlu0 %1295  ;;  %v1299_v45 = vmul.f32 %v1294_v40, %v1264_v41 }
0x12ca   :  { %v1300_v46 = vmul.f32 %v1296_v42, %v1279_v43 }
0x12cb   :  { %1303 = vrot.lane.b32.xlu2 %v1299_v45, %s1955_s2 }
0x12cc   :  { %1305 = vrot.lane.b32.xlu1 %v1300_v46, %s1955_s2 }
0x1325   :  { %v1304_v49 = vpop.permute.xlu2 %1303 }
0x1326   :  { %v2397_v50 = vadd.f32 %v1304_v49, %v1289_v48 }
0x1328   :  { %1890 = vtanh.f32 %v2397_v50 }
0x132e   :  { %v1891_v51 = vpop.eup %1890 }
0x132f   :  { %1315 = vrot.lane.b32.xlu0 %v1891_v51, %s1958_s6  ;;  %v1401_v51 = vrot.slane %v2397_v50, 7 }
0x133e   :  { %v1306_v54 = vpop.permute.xlu1 %1305 }
0x133f   :  { %v2402_v55 = vadd.f32 %v1306_v54, %v1290_v53 }
0x1341   :  { %1892 = vtanh.f32 %v2402_v55  ;;  %v1402_v45 = vrot.slane %v2402_v55, 7 }
0x1347   :  { %v1893_v59 = vpop.eup %1892 }
0x1348   :  { %1317 = vrot.lane.b32.xlu2 %v1893_v59, %s1958_s6 }
0x13a1   :  { %v1316_v56 = vpop.permute.xlu0 %1315 }
0x13a2   :  { %v1318_v60 = vpop.permute.xlu2 %1317  ;;  %v1321_v61 = vmul.f32 %v1316_v56, %v1264_v41 }
0x13a3   :  { %v1322_v57 = vmul.f32 %v1318_v60, %v1279_v43 }
0x13a4   :  { %v1325_v63 = vrot.slane %v1321_v61, 5 }
0x13a5   :  { %v1326_v0 = vrot.slane %v1322_v57, 4 }
0x13a7   :  { %v2407_v1 = vsel %vm748_vm5, %v1326_v0, %v1325_v63 }
0x13a8   :  { %1328 = vrot.lane.b32.xlu1 %v2407_v1, %s1955_s2 }
0x141a   :  { %v1329_v58 = vpop.permute.xlu1 %1328 }
0x141b   :  { %1754 = vmatmul.msk.f32.vlgmr.msra.gmra.mxu1 %vm204_vm11, %v1329_v58 }
0x1498   :  { %v1349_v2 = vpop.f32.mrf.mxu1 }
0x1499   :  { %v1353_v3 = vrot.slane %v1349_v2, 2  ;;  %v1354_v5 = vrot.slane %v1349_v2, 3 }
0x149b   :  { %v1357_v7 = vadd.f32 %v1353_v3, %v2274_v39  ;;  %v1358_v62 = vadd.f32 %v1354_v5, %v2278_v44 }
0x149d   :  { %1894 = vtanh.f32 %v1357_v7  ;;  %v1756_v11 = vmul.f32 -1.442695, %v1358_v62  ;;  %v1755_v15 = vmul.f32 -1.442695, %v1357_v7 }
0x149e   :  { %1896 = vtanh.f32 %v1358_v62 }
0x149f   :  { %1898 = vpow2.f32 %v1756_v11 }
0x14a3   :  { %v1895_v9 = vpop.eup %1894 }
0x14a4   :  { %v1897_v10 = vpop.eup %1896  ;;  %1409 = vrot.lane.b32.xlu0 %v1895_v9, %s1958_s6 }
0x14a5   :  { %1411 = vrot.lane.b32.xlu2 %v1897_v10, %s1958_s6  ;;  %v1899_v6 = vpop.eup %1898 }
0x14a6   :  { %v1366_v13 = vadd.f32 1.0, %v1899_v6 }
0x14a8   :  { %1900 = vrcp.f32 %v1366_v13  ;;  %v1393_v24 = vand.u32 2147483648, %v1366_v13  ;;  %vm1387_vm4 = vweird.f32 %v1366_v13  ;;  %v1391_v25 = vand.u32 2147483647, %v1366_v13 }
0x14a9   :  { %1902 = vpow2.f32 %v1755_v15 }
0x14aa   :  { %v1394_v30 = vor.u32 1.1754944e-38, %v1393_v24  ;;  %vm1392_vm7 = vcmp.eq.f32.partialorder %v1391_v25, 8.507059e+37 }
0x14ae   :  { %v1901_v14 = vpop.eup %1900 }
0x14af   :  { %v1383_v16 = vmul.f32 %v1901_v14, %v1366_v13  ;;  %v1903_v20 = vpop.eup %1902  ;;  %vm1388_vm3 = vweird.f32 %v1901_v14 }
0x14b0   :  { %v1365_v22 = vadd.f32 1.0, %v1903_v20  ;;  %vm1389_vm6 = vmor %vm1387_vm4, %vm1388_vm3 }
0x14b1   :  { %v1384_v19 = vsub.f32 1.0, %v1383_v16 }
0x14b2   :  { %1904 = vrcp.f32 %v1365_v22  ;;  %v1378_v28 = vand.u32 2147483648, %v1365_v22  ;;  %vm1372_vm9 = vweird.f32 %v1365_v22  ;;  %v1376_v29 = vand.u32 2147483647, %v1365_v22 }
0x14b3   :  { %v1385_v21 = vmul.f32 %v1901_v14, %v1384_v19 }
0x14b4   :  { %v1379_v40 = vor.u32 1.1754944e-38, %v1378_v28  ;;  %vm1377_vm12 = vcmp.eq.f32.partialorder %v1376_v29, 8.507059e+37  ;;  %v1593_v28 = vld [vmem:[%s2614_s12 + $0x48] sm:$0xff] }
0x14b5   :  { %v1386_v23 = vadd.f32 %v1901_v14, %v1385_v21 }
0x14b7   :  { %v1390_v27 = vsel %vm1389_vm6, %v1901_v14, %v1386_v23  ;;  %vm1577_vm6 = vcmask 523264  }
0x14b8   :  { %v1395_v33 = vsel %vm1392_vm7, %v1394_v30, %v1390_v27  ;;  %v1905_v34 = vpop.eup %1904  ;;  %v1599_v30 = vld [vmem:[%s2614_s12 + $0x78] sm:$0xff]  ;;  %vm1579_vm7 = vcmask 785408  }
0x14b9   :  { %v1368_v36 = vmul.f32 %v1905_v34, %v1365_v22  ;;  %vm1373_vm8 = vweird.f32 %v1905_v34  ;;  %v1406_v46 = vmul.f32 %v1402_v45, %v1395_v33  ;;  %1620 = vmatpush.msrb.mxu2 %v1599_v30  ;;  %v1589_v45 = vld [vmem:[%s2614_s12 + $0x28] sm:$0xff]  ;;  %v1665_v30 = vld [vmem:[%s2616_s14 + $0x20] sm:$0xff] }
0x14ba   :  { %vm1374_vm10 = vmor %vm1372_vm9, %vm1373_vm8 }
0x14bb   :  { %v1369_v37 = vsub.f32 1.0, %v1368_v36  ;;  %v1596_v36 = vld [vmem:[%s2614_s12 + $0x60] sm:$0xff] }
0x14bd   :  { %v1370_v18 = vmul.f32 %v1905_v34, %v1369_v37  ;;  %v1595_v37 = vld [vmem:[%s2614_s12 + $0x58] sm:$0xff] }
0x14bf   :  { %v1371_v26 = vadd.f32 %v1905_v34, %v1370_v18 }
0x14c1   :  { %v1375_v38 = vsel %vm1374_vm10, %v1905_v34, %v1371_v26  ;;  %v1597_v34 = vld [vmem:[%s2614_s12 + $0x68] sm:$0xff]  ;;  %v1594_v26 = vld [vmem:[%s2614_s12 + $0x50] sm:$0xff] }
0x14c2   :  { %v1380_v42 = vsel %vm1377_vm12, %v1379_v40, %v1375_v38  ;;  %v1592_v38 = vld [vmem:[%s2614_s12 + $0x40] sm:$0xff]  ;;  %v1591_v40 = vld [vmem:[%s2614_s12 + $0x38] sm:$0xff] }
0x14c3   :  { %v1405_v52 = vmul.f32 %v1401_v51, %v1380_v42 }
0x14ff   :  { %v1412_v32 = vpop.permute.xlu2 %1411 }
0x1500   :  { %v1416_v35 = vmul.f32 %v1412_v32, %v1395_v33  ;;  %v1598_v32 = vld [vmem:[%s2614_s12 + $0x70] sm:$0xff] }
0x1501   :  { %1621 = vmatpush.msrb.mxu2 %v1598_v32 }
0x1502   :  { %1421 = vrot.lane.b32.xlu0 %v1416_v35, %s1955_s2 }
0x1503   :  { %1622 = vmatpush.msrb.mxu2 %v1597_v34 }
0x1505   :  { %1623 = vmatpush.msrb.mxu2 %v1596_v36 }
0x1507   :  { %1624 = vmatpush.msrb.mxu2 %v1595_v37 }
0x1509   :  { %1625 = vmatpush.msrb.mxu2 %v1594_v26 }
0x150b   :  { %1626 = vmatpush.msrb.mxu2 %v1593_v28 }
0x150d   :  { %1627 = vmatpush.msrb.mxu2 %v1592_v38 }
0x150f   :  { %1628 = vmatpush.msrb.mxu2 %v1591_v40 }
0x1516   :  { %v1410_v41 = vpop.permute.xlu0 %1409 }
0x1517   :  { %v1415_v43 = vmul.f32 %v1410_v41, %v1380_v42 }
0x1519   :  { %1419 = vrot.lane.b32.xlu1 %v1415_v43, %s1955_s2 }
0x1574   :  { %v1422_v47 = vpop.permute.xlu0 %1421 }
0x1575   :  { %v2419_v48 = vadd.f32 %v1422_v47, %v1406_v46 }
0x1577   :  { %1906 = vtanh.f32 %v2419_v48 }
0x157d   :  { %v1907_v49 = vpop.eup %1906 }
0x157e   :  { %1433 = vrot.lane.b32.xlu1 %v1907_v49, %s1958_s6 }
0x158b   :  { %v1420_v53 = vpop.permute.xlu1 %1419 }
0x158c   :  { %v2424_v54 = vadd.f32 %v1420_v53, %v1405_v52  ;;  %v1587_v53 = vld [vmem:[%s2614_s12 + $0x18] sm:$0xff] }
0x158e   :  { %1908 = vtanh.f32 %v2424_v54 }
0x1594   :  { %v1909_v59 = vpop.eup %1908 }
0x1595   :  { %1431 = vrot.lane.b32.xlu2 %v1909_v59, %s1958_s6  ;;  %v1586_v59 = vld [vmem:[%s2614_s12 + $0x10] sm:$0xff] }
0x15ef   :  { %v1432_v55 = vpop.permute.xlu2 %1431 }
0x15f0   :  { %v1434_v56 = vpop.permute.xlu1 %1433  ;;  %v1437_v60 = vmul.f32 %v1432_v55, %v1380_v42  ;;  %v1585_v55 = vld [vmem:[%s2614_s12 + $0x8] sm:$0xff] }
0x15f1   :  { %v1438_v61 = vmul.f32 %v1434_v56, %v1395_v33  ;;  %v1584_v56 = vld [vmem:[%s2614_s12] sm:$0xff] }
0x15f2   :  { %v1441_v57 = vrot.slane %v1437_v60, 6  ;;  %v1615_v60 = vld [vmem:[%s2614_s12 + $0xf8] sm:$0xff] }
0x15f3   :  { %v1442_v63 = vrot.slane %v1438_v61, 5  ;;  %1640 = vmatpush.msrb.mxu0 %v1615_v60  ;;  %v1517_v61 = vrot.slane %v2424_v54, 7 }
0x15f5   :  { %v2429_v0 = vsel %vm748_vm5, %v1442_v63, %v1441_v57  ;;  %v1518_v57 = vrot.slane %v2419_v48, 7 }
0x15f6   :  { %1444 = vrot.lane.b32.xlu0 %v2429_v0, %s1955_s2 }
0x1668   :  { %v1445_v50 = vpop.permute.xlu0 %1444 }
0x1669   :  { %1757 = vmatmul.msk.f32.vlgmr.msrb.gmra.mxu3 %vm204_vm11, %v1445_v50 }
0x16ec   :  { %v1465_v58 = vpop.f32.mrf.mxu3 }
0x16ed   :  { %v1469_v2 = vrot.slane %v1465_v58, 1  ;;  %v1470_v3 = vrot.slane %v1465_v58, 2 }
0x16ef   :  { %v1473_v5 = vadd.f32 %v1469_v2, %v2274_v39  ;;  %v1474_v7 = vadd.f32 %v1470_v3, %v2278_v44 }
0x16f1   :  { %1910 = vtanh.f32 %v1473_v5  ;;  %v1758_v10 = vmul.f32 -1.442695, %v1473_v5  ;;  %v1759_v39 = vmul.f32 -1.442695, %v1474_v7 }
0x16f2   :  { %1912 = vtanh.f32 %v1474_v7 }
0x16f3   :  { %1914 = vpow2.f32 %v1758_v10 }
0x16f7   :  { %v1911_v62 = vpop.eup %1910 }
0x16f8   :  { %v1913_v9 = vpop.eup %1912  ;;  %1525 = vrot.lane.b32.xlu2 %v1911_v62, %s1958_s6 }
0x16f9   :  { %1527 = vrot.lane.b32.xlu1 %v1913_v9, %s1958_s6  ;;  %v1915_v11 = vpop.eup %1914 }
0x16fa   :  { %v1481_v6 = vadd.f32 1.0, %v1915_v11 }
0x16fc   :  { %1916 = vrcp.f32 %v1481_v6  ;;  %v1494_v21 = vand.u32 2147483648, %v1481_v6  ;;  %vm1488_vm14 = vweird.f32 %v1481_v6  ;;  %v1492_v22 = vand.u32 2147483647, %v1481_v6 }
0x16fd   :  { %1918 = vpow2.f32 %v1759_v39  ;;  %v1609_v39 = vld [vmem:[%s2614_s12 + $0xc8] sm:$0xff] }
0x16fe   :  { %v1495_v23 = vor.u32 1.1754944e-38, %v1494_v21  ;;  %vm1493_vm0 = vcmp.eq.f32.partialorder %v1492_v22, 8.507059e+37  ;;  %v1602_v21 = vld [vmem:[%s2614_s12 + $0x90] sm:$0xff]  ;;  %v1601_v22 = vld [vmem:[%s2614_s12 + $0x88] sm:$0xff] }
0x1701   :  { %1556 = vrot.lane.b32.xlu1 %v2319_v17, %s1958_s6 }
0x1702   :  { %v1917_v13 = vpop.eup %1916 }
0x1703   :  { %v1484_v14 = vmul.f32 %v1917_v13, %v1481_v6  ;;  %v1919_v16 = vpop.eup %1918  ;;  %vm1489_vm13 = vweird.f32 %v1917_v13  ;;  %v1613_v6 = vld [vmem:[%s2614_s12 + $0xe8] sm:$0xff] }
0x1704   :  { %v1482_v19 = vadd.f32 1.0, %v1919_v16  ;;  %vm1490_vm15 = vmor %vm1488_vm14, %vm1489_vm13  ;;  %v1605_v16 = vld [vmem:[%s2614_s12 + $0xa8] sm:$0xff] }
0x1705   :  { %v1485_v44 = vsub.f32 1.0, %v1484_v14  ;;  %v1608_v14 = vld [vmem:[%s2614_s12 + $0xc0] sm:$0xff] }
0x1706   :  { %1920 = vrcp.f32 %v1482_v19  ;;  %v1509_v42 = vand.u32 2147483648, %v1482_v19  ;;  %vm1503_vm2 = vweird.f32 %v1482_v19  ;;  %v1507_v43 = vand.u32 2147483647, %v1482_v19 }
0x1707   :  { %v1486_v15 = vmul.f32 %v1917_v13, %v1485_v44  ;;  %v1607_v44 = vld [vmem:[%s2614_s12 + $0xb8] sm:$0xff] }
0x1708   :  { %v1510_v47 = vor.u32 1.1754944e-38, %v1509_v42  ;;  %vm1508_vm4 = vcmp.eq.f32.partialorder %v1507_v43, 8.507059e+37  ;;  %v1780_v42 = vld [vmem:[%s2615_s13] ss:$0 sm:$0xff] }
0x1709   :  { %v1487_v20 = vadd.f32 %v1917_v13, %v1486_v15  ;;  %v1606_v15 = vld [vmem:[%s2614_s12 + $0xb0] sm:$0xff] }
0x170b   :  { %v1491_v17 = vsel %vm1490_vm15, %v1917_v13, %v1487_v20  ;;  %v1612_v13 = vld [vmem:[%s2614_s12 + $0xe0] sm:$0xff]  ;;  %v1603_v20 = vld [vmem:[%s2614_s12 + $0x98] sm:$0xff] }
0x170c   :  { %v2440_v25 = vsel %vm1493_vm0, %v1495_v23, %v1491_v17  ;;  %v1921_v33 = vpop.eup %1920  ;;  %v1600_v17 = vld [vmem:[%s2614_s12 + $0x80] sm:$0xff]  ;;  %v1668_v23 = vld [vmem:[%s2616_s14 + $0x38] sm:$0xff] }
0x170d   :  { %v1499_v35 = vmul.f32 %v1921_v33, %v1482_v19  ;;  %vm1504_vm1 = vweird.f32 %v1921_v33  ;;  %v1521_v63 = vmul.f32 %v1517_v61, %v2440_v25  ;;  %v1604_v19 = vld [vmem:[%s2614_s12 + $0xa0] sm:$0xff]  ;;  %1684 = vmatpush.msrb.mxu1 %v1668_v23 }
0x170e   :  { %vm1505_vm3 = vmor %vm1503_vm2, %vm1504_vm1 }
0x170f   :  { %v1500_v18 = vsub.f32 1.0, %v1499_v35 }
0x1711   :  { %v1501_v29 = vmul.f32 %v1921_v33, %v1500_v18 }
0x1713   :  { %v1502_v41 = vadd.f32 %v1921_v33, %v1501_v29 }
0x1715   :  { %v1506_v46 = vsel %vm1505_vm3, %v1921_v33, %v1502_v41  ;;  %v1664_v33 = vld [vmem:[%s2616_s14 + $0x18] sm:$0xff] }
0x1716   :  { %v2481_v51 = vsel %vm1508_vm4, %v1510_v47, %v1506_v46 }
0x1717   :  { %v1522_v50 = vmul.f32 %v1518_v57, %v2481_v51 }
0x1752   :  { %v1526_v24 = vpop.permute.xlu2 %1525 }
0x1753   :  { %v1531_v27 = vmul.f32 %v1526_v24, %v2440_v25  ;;  %v1667_v24 = vld [vmem:[%s2616_s14 + $0x30] sm:$0xff] }
0x1754   :  { %1685 = vmatpush.msrb.mxu1 %v1667_v24 }
0x1755   :  { %1535 = vrot.lane.b32.xlu0 %v1531_v27, %s1955_s2  ;;  %v1666_v27 = vld [vmem:[%s2616_s14 + $0x28] sm:$0xff] }
0x1756   :  { %1686 = vmatpush.msrb.mxu1 %v1666_v27 }
0x1758   :  { %1687 = vmatpush.msrb.mxu1 %v1665_v30 }
0x175a   :  { %1688 = vmatpush.msrb.mxu1 %v1664_v33 }
0x175d   :  { %1559 = vrot.lane.b32.xlu0 %v2341_v12, %s1956_s5  ;;  %v1590_v12 = vld [vmem:[%s2614_s12 + $0x30] sm:$0xff] }
0x175e   :  { %1629 = vmatpush.msrb.mxu2 %v1590_v12  ;;  %v1662_v12 = vld [vmem:[%s2616_s14 + $0x8] sm:$0xff] }
0x1760   :  { %1630 = vmatpush.msrb.mxu2 %v1589_v45 }
0x1765   :  { %1564 = vrot.lane.b32.xlu0 %v2407_v1, %s1958_s6  ;;  %v1588_v1 = vld [vmem:[%s2614_s12 + $0x20] sm:$0xff] }
0x1766   :  { %1631 = vmatpush.msrb.mxu2 %v1588_v1 }
0x1768   :  { %1632 = vmatpush.msrb.mxu2 %v1587_v53 }
0x176a   :  { %1633 = vmatpush.msrb.mxu2 %v1586_v59 }
0x176b   :  { %v1528_v49 = vpop.permute.xlu1 %1527 }
0x176c   :  { %v1532_v52 = vmul.f32 %v1528_v49, %v2481_v51  ;;  %1634 = vmatpush.msrb.mxu2 %v1585_v55 }
0x176e   :  { %1537 = vrot.lane.b32.xlu2 %v1532_v52, %s1955_s2  ;;  %1635 = vmatpush.msrb.mxu2 %v1584_v56 }
0x1773   :  { %v1557_v7 = vpop.permute.xlu1 %1556 }
0x1774   :  { %v1576_v62 = vsel %vm204_vm11, %v2294_v31, %v1557_v7  ;;  %v1614_v31 = vld [vmem:[%s2614_s12 + $0xf0] sm:$0xff] }
0x1775   :  { %1641 = vmatpush.msrb.mxu0 %v1614_v31 }
0x1777   :  { %1642 = vmatpush.msrb.mxu0 %v1613_v6 }
0x1779   :  { %1643 = vmatpush.msrb.mxu0 %v1612_v13 }
0x17c7   :  { %v1536_v58 = vpop.permute.xlu0 %1535 }
0x17c8   :  { %v1538_v2 = vpop.permute.xlu2 %1537  ;;  %v1541_v3 = vadd.f32 %v1536_v58, %v1521_v63 }
0x17c9   :  { %v1542_v5 = vadd.f32 %v1538_v2, %v1522_v50 }
0x17ca   :  { %1922 = vtanh.f32 %v1541_v3 }
0x17cb   :  { %1924 = vtanh.f32 %v1542_v5 }
0x17cf   :  { %v1560_v9 = vpop.permute.xlu0 %1559 }
0x17d0   :  { %v1923_v54 = vpop.eup %1922  ;;  %v1578_v48 = vsel %vm1577_vm6, %v1576_v62, %v1560_v9 }
0x17d1   :  { %v1925_v10 = vpop.eup %1924  ;;  %1547 = vrot.lane.b32.xlu2 %v1923_v54, %s1958_s6  ;;  %v1580_v11 = vsel %vm1579_vm7, %v1578_v48, %v2363_v8  ;;  %v1611_v8 = vld [vmem:[%s2614_s12 + $0xd8] sm:$0xff] }
0x17d2   :  { %1549 = vrot.lane.b32.xlu1 %v1925_v10, %s1958_s6  ;;  %1636 = vmatmul.f32.vlgmr.msrb.gmra.mxu2 %v1580_v11 }
0x17d3   :  { %1644 = vmatpush.msrb.mxu0 %v1611_v8 }
0x17d7   :  { %v1565_v36 = vpop.permute.xlu0 %1564 }
0x17d8   :  { %v1581_v29 = vsel %vm204_vm11, %v2386_v4, %v1565_v36  ;;  %v1661_v4 = vld [vmem:[%s2616_s14] sm:$0xff]  ;;  %vm1696_vm11 = vcmask 254976  }
0x17d9   :  { %1567 = vrot.lane.b32.xlu2 %v2429_v0, %s1956_s5  ;;  %v1610_v0 = vld [vmem:[%s2614_s12 + $0xd0] sm:$0xff] }
0x17da   :  { %1645 = vmatpush.msrb.mxu0 %v1610_v0 }
0x17dc   :  { %1646 = vmatpush.msrb.mxu0 %v1609_v39 }
0x17de   :  { %1647 = vmatpush.msrb.mxu0 %v1608_v14 }
0x17e0   :  { %1648 = vmatpush.msrb.mxu0 %v1607_v44 }
0x17e2   :  { %1649 = vmatpush.msrb.mxu0 %v1606_v15 }
0x17e4   :  { %1650 = vmatpush.msrb.mxu0 %v1605_v16 }
0x17e6   :  { %1651 = vmatpush.msrb.mxu0 %v1604_v19 }
0x17e8   :  { %1652 = vmatpush.msrb.mxu0 %v1603_v20 }
0x17ea   :  { %1653 = vmatpush.msrb.mxu0 %v1602_v21 }
0x17ec   :  { %1654 = vmatpush.msrb.mxu0 %v1601_v22 }
0x17ee   :  { %1655 = vmatpush.msrb.mxu0 %v1600_v17 }
0x182b   :  { %v1548_v32 = vpop.permute.xlu2 %1547 }
0x182c   :  { %v1553_v34 = vmul.f32 %v1548_v32, %v2440_v25  ;;  %v1663_v25 = vld [vmem:[%s2616_s14 + $0x10] sm:$0xff] }
0x182d   :  { %1689 = vmatpush.msrb.mxu1 %v1663_v25 }
0x182e   :  { %v1572_v26 = vrot.slane %v1553_v34, 7 }
0x182f   :  { %1690 = vmatpush.msrb.mxu1 %v1662_v12 }
0x1831   :  { %1691 = vmatpush.msrb.mxu1 %v1661_v4 }
0x1833   :  { %v1568_v18 = vpop.permute.xlu2 %1567 }
0x1834   :  { %v1582_v38 = vsel %vm1577_vm6, %v1581_v29, %v1568_v18 }
0x1844   :  { %v1550_v35 = vpop.permute.xlu1 %1549 }
0x1845   :  { %v1554_v37 = vmul.f32 %v1550_v35, %v2481_v51  ;;  %v1781_v51 = vld [vmem:[%s2617_s15] ss:$0 sm:$0xff] }
0x1847   :  { %v1573_v28 = vrot.slane %v1554_v37, 6 }
0x1849   :  { %v1574_v40 = vsel %vm748_vm5, %v1573_v28, %v1572_v26 }
0x184a   :  { %v1583_v41 = vsel %vm1579_vm7, %v1582_v38, %v1574_v40 }
0x184b   :  { %1656 = vmatmul.f32.vlgmr.msrb.gmra.mxu0 %v1583_v41 }
0x1855   :  { %v1637_v43 = vpop.f32.mrf.mxu2 }
0x1856   :  { %v1638_v45 = vadd.f32 %v1780_v42, %v1637_v43 }
0x18c8   :  { %v1657_v46 = vpop.f32.mrf.mxu0 }
0x18c9   :  { %v1658_v47 = vadd.f32 %v1657_v46, %v1638_v45 }
0x18cb   :  { %v1660_v49 = vmax.f32 %v1658_v47, 0.0 }
0x18cd   :  { %1760 = vmatmul.msk.f32.vlgmr.msrb.gmra.mxu1 %vm1577_vm6, %v1660_v49 }
0x194a   :  { %v1693_v52 = vpop.f32.mrf.mxu1 }
0x194b   :  { %v1694_v1 = vadd.f32 %v1781_v51, %v1693_v52 }
0x194d   :  { %1697 = vst.msk [vmem:[#allocation2] sm:$0x3] %vm1696_vm11, %v1694_v1 }
0x194e   :  { %1708 = dma.vmem_to_hbm [thread:$0]  %s1704_s24, 32, %s1706_s18, [#allocation3]  }
0x194f   :  { %1950 = dma.done.wait [#allocation3], 32  }
0x1950   :  { %1951 = vsyncadd [#allocation3], 4294967264 }
0x1951   :  { %1713 = vsyncpa [#allocation3], 1 }

</bundles_post_ra>
